<compile_context>
chip_gen: v7x
topology: tpu7x:2x2x1
jax: 0.10.0
libtpu: 0.0.40
codegen_flags: <defaults>
</compile_context>

<pallas_src>
import functools

import jax
import jax.numpy as jnp
from jax.experimental import pallas as pl
from jax.experimental.pallas import tpu as pltpu


# ----------------------------------------------------------------------------
# Fused kernel:  2x2/2 maxpool -> zero-pad -> im2col -> one matmul (+bias)
# ----------------------------------------------------------------------------
def fused_pool_conv_kernel(x_ref, w_ref, b_ref, o_ref, pad_ref, col_ref,
                           *, C, Ho, Wo):
    # x_ref  : [Ho, 2, Wo, 2C] bf16  (free regrouping of the HWC input so the
    #                                 four pool taps are aligned lane slices)
    # w_ref  : [9C, TCo]       bf16  (3x3 taps stacked along the K axis)
    # b_ref  : [1, TCo]        f32
    # o_ref  : [Ho*Wo, TCo]    f32   (lane-dense output block)
    # pad_ref: [Ho+2, Wo+2, C] bf16  VMEM scratch: zero-padded pooled slab
    # col_ref: [Ho*Wo, 9C]     bf16  VMEM scratch: im2col matrix
    M = Ho * Wo

    # ---- MaxPool2d(2, 2): four taps, all aligned lane-dense slices ----
    a = jnp.maximum(x_ref[:, 0, :, :C], x_ref[:, 0, :, C:])   # h even, w even/odd
    b = jnp.maximum(x_ref[:, 1, :, :C], x_ref[:, 1, :, C:])   # h odd,  w even/odd
    pooled = jnp.maximum(a, b)                                # [Ho, Wo, C]

    # ---- zero padding (conv padding=1) done in VMEM, never in HBM ----
    # (full zero-fill of the small padded slab is ~100 KB of stores: cheap and
    #  simpler than zeroing only the halo)
    pad_ref[...] = jnp.zeros_like(pad_ref)
    pad_ref[1:Ho + 1, 1:Wo + 1, :] = pooled

    # ---- im2col: 9 static shifted slices -> [M, 9C] VMEM scratch ----
    # (reshape is a free shape-cast since Wo is a multiple of 8 here)
    for t in range(9):
        kh, kw = divmod(t, 3)
        col_ref[:, t * C:(t + 1) * C] = (
            pad_ref[kh:kh + Ho, kw:kw + Wo, :].reshape(M, C))

    # ---- single MXU matmul, K = 9C, f32 accumulation, bias epilogue ----
    acc = jnp.dot(col_ref[...], w_ref[...], preferred_element_type=jnp.float32)
    o_ref[...] = (acc + b_ref[...]).astype(o_ref.dtype)


def fused_pool_conv(x_hwc, w_k, b2, *, co_block=256):
    """x_hwc: [H, W, C] f32, w_k: [9C, Co] bf16, b2: [1, Co] f32.

    Returns conv3x3_pad1(maxpool2x2(x)) as [H/2, W/2, Co] f32.
    """
    H, W, C = x_hwc.shape
    assert H % 2 == 0 and W % 2 == 0
    Ho, Wo = H // 2, W // 2
    M = Ho * Wo
    Co = w_k.shape[1]
    TCo = min(co_block, Co)
    assert Co % TCo == 0 and w_k.shape[0] == 9 * C

    # Boundary glue (one fused XLA transpose+cast upstream produces x_hwc; this
    # reshape + bf16 cast fuses into it): [H,W,C] -> [Ho,2,Wo,2C] so the 2x2
    # pool taps are pure lane slices inside the kernel.
    x_r = x_hwc.astype(jnp.bfloat16).reshape(Ho, 2, Wo, 2 * C)

    kern = functools.partial(fused_pool_conv_kernel, C=C, Ho=Ho, Wo=Wo)
    out = pl.pallas_call(
        kern,
        out_shape=jax.ShapeDtypeStruct((M, Co), jnp.float32),
        grid_spec=pltpu.PrefetchScalarGridSpec(
            num_scalar_prefetch=0,
            grid=(Co // TCo,),                      # parallel over Cout blocks
            in_specs=[
                pl.BlockSpec((Ho, 2, Wo, 2 * C), lambda j: (0, 0, 0, 0)),
                pl.BlockSpec((9 * C, TCo), lambda j: (0, j)),
                pl.BlockSpec((1, TCo), lambda j: (0, j)),
            ],
            out_specs=pl.BlockSpec((M, TCo), lambda j: (0, j)),
            scratch_shapes=[
                pltpu.VMEM((Ho + 2, Wo + 2, C), jnp.bfloat16),   # padded pooled
                pltpu.VMEM((M, 9 * C), jnp.bfloat16),            # im2col
            ],
        ),
        compiler_params=pltpu.CompilerParams(
            dimension_semantics=("parallel",)),     # 2 blocks -> both TCs on v7x
    )(x_r, w_k, b2)
    return out.reshape(Ho, Wo, Co)


# ----------------------------------------------------------------------------
# One-time weight preparation (kernel-native layout, done at "module init").
# ----------------------------------------------------------------------------
def prepare_conv_weights(w_oihw, bias):
    """[Co,Cin,3,3] f32 -> ([9*Cin, Co] bf16, [1, Co] f32), im2col K-order."""
    Co, Cin, KH, KW = w_oihw.shape
    assert (KH, KW) == (3, 3)
    w_k = (jnp.transpose(w_oihw, (2, 3, 1, 0))        # [3,3,Cin,Co]
           .reshape(KH * KW * Cin, Co)
           .astype(jnp.bfloat16))
    b2 = bias.reshape(1, Co).astype(jnp.float32)
    return w_k, b2


# ----------------------------------------------------------------------------
# Full module forward: NCHW in, NCHW out (like the PyTorch module).
# ----------------------------------------------------------------------------
@jax.jit
def module_forward(x_nchw, w_k, b2):
    outs = []
    for n in range(x_nchw.shape[0]):                # handles any (static) batch
        x_hwc = jnp.transpose(x_nchw[n], (1, 2, 0))      # CHW -> HWC
        y_hwc = fused_pool_conv(x_hwc, w_k, b2)          # [H/2, W/2, Cout]
        outs.append(jnp.transpose(y_hwc, (2, 0, 1)))     # HWC -> CHW
    return jnp.stack(outs, axis=0)


if __name__ == "__main__":
    key = jax.random.PRNGKey(0)
    k1, k2, k3 = jax.random.split(key, 3)

    # Channels are fixed at 512 by the module; spatial reduced (28 -> 16) to
    # keep the example small. Batch = 1 as in the original module's input.
    N, Cin, H, W = 1, 512, 16, 16
    Cout, KH, KW = 512, 3, 3

    x = jax.random.normal(k1, (N, Cin, H, W), dtype=jnp.float32)
    bound = 1.0 / (Cin * KH * KW) ** 0.5               # PyTorch-style init bound
    w = jax.random.uniform(k2, (Cout, Cin, KH, KW), minval=-bound, maxval=bound,
                           dtype=jnp.float32)
    b = jax.random.uniform(k3, (Cout,), minval=-bound, maxval=bound,
                           dtype=jnp.float32)

    # One-time weight layout transform (kernel-native), then the hot forward.
    w_k, b2 = prepare_conv_weights(w, b)
    y = module_forward(x, w_k, b2)
    y = jax.block_until_ready(y)

    # ---- plain-JAX f32 reference (same math, no Pallas) ----
    Ho, Wo = H // 2, W // 2
    x_hwc = jnp.transpose(x[0], (1, 2, 0))
    pooled_ref = jnp.max(x_hwc.reshape(Ho, 2, Wo, 2, Cin), axis=(1, 3))
    xpad = jnp.pad(pooled_ref, ((1, 1), (1, 1), (0, 0)))
    taps = jnp.stack([xpad[kh:kh + Ho, kw:kw + Wo, :].reshape(Ho * Wo, Cin)
                      for kh in range(3) for kw in range(3)])
    w_taps = jnp.transpose(w, (2, 3, 1, 0)).reshape(9, Cin, Cout)
    y_ref = (jnp.einsum('tmc,tcd->md', taps, w_taps) + b[None]).reshape(Ho, Wo, Cout)
    y_ref = jnp.transpose(y_ref, (2, 0, 1))[None]

    assert y.shape == (N, Cout, Ho, Wo), y.shape
    err = float(jnp.max(jnp.abs(y - y_ref)))
    if err < 3e-2:       # bf16 matmul w/ f32 accumulation vs f32 reference
        print("KERNEL_OK")
    else:
        print("max abs err:", err)
</pallas_src>

<mosaic_0001>
module attributes {stable_mosaic.version = 11 : i64} {
  func.func @fused_pool_conv_kernel(%arg0: i32, %arg1: memref<8x2x8x1024xbf16, #tpu.memory_space<vmem>>, %arg2: memref<4608x256xbf16, #tpu.memory_space<vmem>>, %arg3: memref<1x256xf32, #tpu.memory_space<vmem>>, %arg4: memref<64x256xf32, #tpu.memory_space<vmem>>, %arg5: memref<10x10x512xbf16, #tpu.memory_space<vmem>>, %arg6: memref<64x4608xbf16, #tpu.memory_space<vmem>>) attributes {dimension_semantics = [#tpu.dimension_semantics<parallel>], iteration_bounds = array<i64: 2>, scalar_prefetch = 0 : i64, scratch_operands = 2 : i64, tpu.core_type = #tpu.core_type<tc>, window_params = [{pipeline_mode = #tpu.pipeline_mode<synchronous>, transform_indices = @transform_0, window_bounds = array<i64: 8, 2, 8, 1024>}, {transform_indices = @transform_1, window_bounds = array<i64: 4608, 256>}, {transform_indices = @transform_2, window_bounds = array<i64: 1, 256>}, {transform_indices = @transform_3, window_bounds = array<i64: 64, 256>}]} {
    %c0 = arith.constant 0 : index
    %c0_0 = arith.constant 0 : index
    %c0_1 = arith.constant 0 : index
    %c0_2 = arith.constant 0 : index
    %0 = vector.load %arg1[%c0, %c0_0, %c0_1, %c0_2] : memref<8x2x8x1024xbf16, #tpu.memory_space<vmem>>, vector<8x1x8x512xbf16>
    %1 = vector.shape_cast %0 : vector<8x1x8x512xbf16> to vector<8x8x512xbf16>
    %c0_3 = arith.constant 0 : index
    %c0_4 = arith.constant 0 : index
    %c0_5 = arith.constant 0 : index
    %c512 = arith.constant 512 : index
    %2 = vector.load %arg1[%c0_3, %c0_4, %c0_5, %c512] : memref<8x2x8x1024xbf16, #tpu.memory_space<vmem>>, vector<8x1x8x512xbf16>
    %3 = vector.shape_cast %2 : vector<8x1x8x512xbf16> to vector<8x8x512xbf16>
    %4 = arith.maximumf %1, %3 : vector<8x8x512xbf16>
    %c0_6 = arith.constant 0 : index
    %c1 = arith.constant 1 : index
    %c0_7 = arith.constant 0 : index
    %c0_8 = arith.constant 0 : index
    %5 = vector.load %arg1[%c0_6, %c1, %c0_7, %c0_8] : memref<8x2x8x1024xbf16, #tpu.memory_space<vmem>>, vector<8x1x8x512xbf16>
    %6 = vector.shape_cast %5 : vector<8x1x8x512xbf16> to vector<8x8x512xbf16>
    %c0_9 = arith.constant 0 : index
    %c1_10 = arith.constant 1 : index
    %c0_11 = arith.constant 0 : index
    %c512_12 = arith.constant 512 : index
    %7 = vector.load %arg1[%c0_9, %c1_10, %c0_11, %c512_12] : memref<8x2x8x1024xbf16, #tpu.memory_space<vmem>>, vector<8x1x8x512xbf16>
    %8 = vector.shape_cast %7 : vector<8x1x8x512xbf16> to vector<8x8x512xbf16>
    %9 = arith.maximumf %6, %8 : vector<8x8x512xbf16>
    %10 = arith.maximumf %4, %9 : vector<8x8x512xbf16>
    %cst = arith.constant 0.000000e+00 : bf16
    %11 = vector.broadcast %cst : bf16 to vector<10x10x512xbf16>
    %c0_13 = arith.constant 0 : index
    %c0_14 = arith.constant 0 : index
    %c0_15 = arith.constant 0 : index
    %12 = vector.load %arg5[%c0_13, %c0_14, %c0_15] : memref<10x10x512xbf16, #tpu.memory_space<vmem>>, vector<10x10x512xbf16>
    tpu.vector_store %arg5[%c0_13, %c0_14, %c0_15], %11 {strides = array<i32>} : memref<10x10x512xbf16, #tpu.memory_space<vmem>>, vector<10x10x512xbf16>,
    %c1_16 = arith.constant 1 : index
    %c1_17 = arith.constant 1 : index
    %c0_18 = arith.constant 0 : index
    %13 = vector.load %arg5[%c1_16, %c1_17, %c0_18] : memref<10x10x512xbf16, #tpu.memory_space<vmem>>, vector<8x8x512xbf16>
    tpu.vector_store %arg5[%c1_16, %c1_17, %c0_18], %10 {strides = array<i32>} : memref<10x10x512xbf16, #tpu.memory_space<vmem>>, vector<8x8x512xbf16>,
    %c0_19 = arith.constant 0 : index
    %c0_20 = arith.constant 0 : index
    %c0_21 = arith.constant 0 : index
    %14 = vector.load %arg5[%c0_19, %c0_20, %c0_21] : memref<10x10x512xbf16, #tpu.memory_space<vmem>>, vector<8x8x512xbf16>
    %15 = vector.shape_cast %14 : vector<8x8x512xbf16> to vector<64x512xbf16>
    %c0_22 = arith.constant 0 : index
    %c0_23 = arith.constant 0 : index
    %16 = vector.load %arg6[%c0_22, %c0_23] : memref<64x4608xbf16, #tpu.memory_space<vmem>>, vector<64x512xbf16>
    tpu.vector_store %arg6[%c0_22, %c0_23], %15 {strides = array<i32>} : memref<64x4608xbf16, #tpu.memory_space<vmem>>, vector<64x512xbf16>,
    %c0_24 = arith.constant 0 : index
    %c1_25 = arith.constant 1 : index
    %c0_26 = arith.constant 0 : index
    %17 = vector.load %arg5[%c0_24, %c1_25, %c0_26] : memref<10x10x512xbf16, #tpu.memory_space<vmem>>, vector<8x8x512xbf16>
    %18 = vector.shape_cast %17 : vector<8x8x512xbf16> to vector<64x512xbf16>
    %c0_27 = arith.constant 0 : index
    %c512_28 = arith.constant 512 : index
    %19 = vector.load %arg6[%c0_27, %c512_28] : memref<64x4608xbf16, #tpu.memory_space<vmem>>, vector<64x512xbf16>
    tpu.vector_store %arg6[%c0_27, %c512_28], %18 {strides = array<i32>} : memref<64x4608xbf16, #tpu.memory_space<vmem>>, vector<64x512xbf16>,
    %c0_29 = arith.constant 0 : index
    %c2 = arith.constant 2 : index
    %c0_30 = arith.constant 0 : index
    %20 = vector.load %arg5[%c0_29, %c2, %c0_30] : memref<10x10x512xbf16, #tpu.memory_space<vmem>>, vector<8x8x512xbf16>
    %21 = vector.shape_cast %20 : vector<8x8x512xbf16> to vector<64x512xbf16>
    %c0_31 = arith.constant 0 : index
    %c1024 = arith.constant 1024 : index
    %22 = vector.load %arg6[%c0_31, %c1024] : memref<64x4608xbf16, #tpu.memory_space<vmem>>, vector<64x512xbf16>
    tpu.vector_store %arg6[%c0_31, %c1024], %21 {strides = array<i32>} : memref<64x4608xbf16, #tpu.memory_space<vmem>>, vector<64x512xbf16>,
    %c1_32 = arith.constant 1 : index
    %c0_33 = arith.constant 0 : index
    %c0_34 = arith.constant 0 : index
    %23 = vector.load %arg5[%c1_32, %c0_33, %c0_34] : memref<10x10x512xbf16, #tpu.memory_space<vmem>>, vector<8x8x512xbf16>
    %24 = vector.shape_cast %23 : vector<8x8x512xbf16> to vector<64x512xbf16>
    %c0_35 = arith.constant 0 : index
    %c1536 = arith.constant 1536 : index
    %25 = vector.load %arg6[%c0_35, %c1536] : memref<64x4608xbf16, #tpu.memory_space<vmem>>, vector<64x512xbf16>
    tpu.vector_store %arg6[%c0_35, %c1536], %24 {strides = array<i32>} : memref<64x4608xbf16, #tpu.memory_space<vmem>>, vector<64x512xbf16>,
    %c1_36 = arith.constant 1 : index
    %c1_37 = arith.constant 1 : index
    %c0_38 = arith.constant 0 : index
    %26 = vector.load %arg5[%c1_36, %c1_37, %c0_38] : memref<10x10x512xbf16, #tpu.memory_space<vmem>>, vector<8x8x512xbf16>
    %27 = vector.shape_cast %26 : vector<8x8x512xbf16> to vector<64x512xbf16>
    %c0_39 = arith.constant 0 : index
    %c2048 = arith.constant 2048 : index
    %28 = vector.load %arg6[%c0_39, %c2048] : memref<64x4608xbf16, #tpu.memory_space<vmem>>, vector<64x512xbf16>
    tpu.vector_store %arg6[%c0_39, %c2048], %27 {strides = array<i32>} : memref<64x4608xbf16, #tpu.memory_space<vmem>>, vector<64x512xbf16>,
    %c1_40 = arith.constant 1 : index
    %c2_41 = arith.constant 2 : index
    %c0_42 = arith.constant 0 : index
    %29 = vector.load %arg5[%c1_40, %c2_41, %c0_42] : memref<10x10x512xbf16, #tpu.memory_space<vmem>>, vector<8x8x512xbf16>
    %30 = vector.shape_cast %29 : vector<8x8x512xbf16> to vector<64x512xbf16>
    %c0_43 = arith.constant 0 : index
    %c2560 = arith.constant 2560 : index
    %31 = vector.load %arg6[%c0_43, %c2560] : memref<64x4608xbf16, #tpu.memory_space<vmem>>, vector<64x512xbf16>
    tpu.vector_store %arg6[%c0_43, %c2560], %30 {strides = array<i32>} : memref<64x4608xbf16, #tpu.memory_space<vmem>>, vector<64x512xbf16>,
    %c2_44 = arith.constant 2 : index
    %c0_45 = arith.constant 0 : index
    %c0_46 = arith.constant 0 : index
    %32 = vector.load %arg5[%c2_44, %c0_45, %c0_46] : memref<10x10x512xbf16, #tpu.memory_space<vmem>>, vector<8x8x512xbf16>
    %33 = vector.shape_cast %32 : vector<8x8x512xbf16> to vector<64x512xbf16>
    %c0_47 = arith.constant 0 : index
    %c3072 = arith.constant 3072 : index
    %34 = vector.load %arg6[%c0_47, %c3072] : memref<64x4608xbf16, #tpu.memory_space<vmem>>, vector<64x512xbf16>
    tpu.vector_store %arg6[%c0_47, %c3072], %33 {strides = array<i32>} : memref<64x4608xbf16, #tpu.memory_space<vmem>>, vector<64x512xbf16>,
    %c2_48 = arith.constant 2 : index
    %c1_49 = arith.constant 1 : index
    %c0_50 = arith.constant 0 : index
    %35 = vector.load %arg5[%c2_48, %c1_49, %c0_50] : memref<10x10x512xbf16, #tpu.memory_space<vmem>>, vector<8x8x512xbf16>
    %36 = vector.shape_cast %35 : vector<8x8x512xbf16> to vector<64x512xbf16>
    %c0_51 = arith.constant 0 : index
    %c3584 = arith.constant 3584 : index
    %37 = vector.load %arg6[%c0_51, %c3584] : memref<64x4608xbf16, #tpu.memory_space<vmem>>, vector<64x512xbf16>
    tpu.vector_store %arg6[%c0_51, %c3584], %36 {strides = array<i32>} : memref<64x4608xbf16, #tpu.memory_space<vmem>>, vector<64x512xbf16>,
    %c2_52 = arith.constant 2 : index
    %c2_53 = arith.constant 2 : index
    %c0_54 = arith.constant 0 : index
    %38 = vector.load %arg5[%c2_52, %c2_53, %c0_54] : memref<10x10x512xbf16, #tpu.memory_space<vmem>>, vector<8x8x512xbf16>
    %39 = vector.shape_cast %38 : vector<8x8x512xbf16> to vector<64x512xbf16>
    %c0_55 = arith.constant 0 : index
    %c4096 = arith.constant 4096 : index
    %40 = vector.load %arg6[%c0_55, %c4096] : memref<64x4608xbf16, #tpu.memory_space<vmem>>, vector<64x512xbf16>
    tpu.vector_store %arg6[%c0_55, %c4096], %39 {strides = array<i32>} : memref<64x4608xbf16, #tpu.memory_space<vmem>>, vector<64x512xbf16>,
    %c0_56 = arith.constant 0 : index
    %c0_57 = arith.constant 0 : index
    %41 = vector.load %arg6[%c0_56, %c0_57] : memref<64x4608xbf16, #tpu.memory_space<vmem>>, vector<64x4608xbf16>
    %c0_58 = arith.constant 0 : index
    %c0_59 = arith.constant 0 : index
    %42 = vector.load %arg2[%c0_58, %c0_59] : memref<4608x256xbf16, #tpu.memory_space<vmem>>, vector<4608x256xbf16>
    %cst_60 = arith.constant dense<0.000000e+00> : vector<64x256xf32>
    %43 = tpu.matmul %41, %42, %cst_60 {dimension_numbers = #tpu.dot_dimension_numbers<[1], [0], [0], [1], [0, 0, 1, 1], [], []>} : vector<64x4608xbf16>, vector<4608x256xbf16>, vector<64x256xf32> -> vector<64x256xf32>
    %c0_61 = arith.constant 0 : index
    %c0_62 = arith.constant 0 : index
    %44 = vector.load %arg3[%c0_61, %c0_62] : memref<1x256xf32, #tpu.memory_space<vmem>>, vector<1x256xf32>
    %45 = vector.broadcast %44 : vector<1x256xf32> to vector<64x256xf32>
    %46 = arith.addf %43, %45 : vector<64x256xf32>
    %c0_63 = arith.constant 0 : index
    %c0_64 = arith.constant 0 : index
    %47 = vector.load %arg4[%c0_63, %c0_64] : memref<64x256xf32, #tpu.memory_space<vmem>>, vector<64x256xf32>
    tpu.vector_store %arg4[%c0_63, %c0_64], %46 {strides = array<i32>} : memref<64x256xf32, #tpu.memory_space<vmem>>, vector<64x256xf32>,
    return
  }
  func.func @transform_0(%arg0: i32) -> (i32, i32, i32, i32) {
    %c0_i32 = arith.constant 0 : i32
    %c0_i32_0 = arith.constant 0 : i32
    %c0_i32_1 = arith.constant 0 : i32
    %c0_i32_2 = arith.constant 0 : i32
    %c0_i32_3 = arith.constant 0 : i32
    return %c0_i32, %c0_i32_0, %c0_i32_1, %c0_i32_2 : i32, i32, i32, i32
  }
  func.func @transform_1(%arg0: i32) -> (i32, i32) {
    %c0_i32 = arith.constant 0 : i32
    %c0_i32_0 = arith.constant 0 : i32
    return %c0_i32, %arg0 : i32, i32
  }
  func.func @transform_2(%arg0: i32) -> (i32, i32) {
    %c0_i32 = arith.constant 0 : i32
    %c0_i32_0 = arith.constant 0 : i32
    return %c0_i32, %arg0 : i32, i32
  }
  func.func @transform_3(%arg0: i32) -> (i32, i32) {
    %c0_i32 = arith.constant 0 : i32
    %c0_i32_0 = arith.constant 0 : i32
    return %c0_i32, %arg0 : i32, i32
  }
}

</mosaic_0001>

<bundles_post_ra>
// kernel: module_forward.1
= control target key start
LH: loop header
LB: loop body
LE: loop exit
PB: predicated region body
PF: predicated region fallthrough
CT: control target
= control target key end

     0   :  { %8 = vsyncpa [#allocation5], 0  ;;  %s11624_s0 = inlined_call_operand.vmem [shape: bf16[8,2,8,1024], index: 0, kind: input, shape index: {}]   ;;  %s11625_s1 = inlined_call_operand.hbm [shape: bf16[4608,512], index: 1, kind: input, shape index: {}]   ;;  %s11626_s2 = inlined_call_operand.hbm [shape: f32[1,512], index: 2, kind: input, shape index: {}]   ;;  %s11627_s3 = inlined_call_operand.hbm [shape: f32[64,512], index: 3, kind: output, shape index: {}]  }
   0x1   :  { %10 = vsyncpa [#allocation5 + $0x1], 0 }
   0x2   :  { %11 = vsyncpa [#allocation8], 0 }
   0x3   :  { %13 = vsyncpa [#allocation8 + $0x1], 0 }
   0x4   :  { %14 = vsyncpa [#allocation6], 0 }
   0x5   :  { %16 = vsyncpa [#allocation6 + $0x1], 0  ;;  %s9879_s12 = smov 0   ;;  %s9881_s13 = smov 0  }
   0x6   :  { %s9883_s14 = smov 0   ;;  %s9885_s15 = smov 0  }
   0x7 LB: > { %s9900_s16 = sadd.s32 4294967295, %s9847_s15   ;;  %s7682_s17 = sadd.s32 4294967294, %s9847_s15   ;;  %s9847_s15 = sphi %s9885_s15, %s11660_s15   ;;  %s9843_s14 = sphi %s9883_s14, %s11659_s14   ;;  %s9839_s13 = sphi %s9881_s13, %s11658_s13   ;;  %s9835_s12 = sphi %s9879_s12, %s11657_s12  }
   0x8   : > { %s9904_s18 = sadd.s32 1, %s9847_s15   ;;  %s50_s19 = sadd.s32 1, %s9843_s14 }
   0x9   : > { %s47_s20 = ssub.s32 %s9847_s15, %s9904_s18  ;;  %p57_p0 = scmp.ne.s32.totalorder %s9843_s14, %s9839_s13 }
   0xa   : > { %p48_p1 = scmp.eq.s32.totalorder %s47_s20, 0  ;;  %p58_p2 = scmp.eq.s32.totalorder %s9847_s15, 0 }
   0xb   : > { %p63_p3 = scmp.ne.s32.totalorder %s9839_s13, %s9835_s12  ;;  %p64_p4 = scmp.eq.s32.totalorder %s9900_s16, 0 }
   0xc   : > { %s9916_s21 = scalar_select %p48_p1, %s9843_s14, %s50_s19  }
   0xd   : > { %p59_p5 = por %p58_p2, %p57_p0  ;;  %p9918_p6 = por %p64_p4, %p63_p3 }
   0xe   : > { %p113_p7 = scmp.eq.s32.totalorder %s9900_s16, 1  ;;  %p119_p8 = scmp.eq.s32.totalorder %s7682_s17, 1 }
   0xf   : > { %s11630_s22 = scalar_select %p9918_p6, 1, 0 }
  0x10   : > { %p8808_p10 = scmp.lt.s32.totalorder %s9847_s15, 2  ;;  %p9925_p11 = por %p113_p7, %p57_p0 }
  0x11   : > { %p9929_p12 = por %p119_p8, %p63_p3  ;;  %s9934_s25 = sand.u32 1, %s9843_s14  }
  0x12   : > { %s11631_s23 = scalar_select %p9925_p11, 1, 0 }
  0x13   : > { %s11632_s24 = scalar_select %p9929_p12, 1, 0 }
  0x14   : > { %s8498_s26 = sshll.u32 %s9847_s15, 7  ;;  %s8789_s27 = smul.u32 4608, %s9934_s25 }
  0x15   : > { %s9941_s30 = scalar_lea.hbm %s11625_s1, %s8498_s26  ;;  %p9943_p13 = pnand %p8808_p10, %p59_p5 }
  0x16   : > { %s146_s5 = scalar_lea.vmem [#allocation4], %s8789_s27  ;;  %s143_s7 = scalar_lea.sflag [#allocation5], %s9934_s25 }
  0x17   : > { %s153_s6 = sshll.u32 %s146_s5, 4  ;;  %s9717_s8 = scalar_lea.hbm %s9941_s30, 73728  ;;  %s9947_s6 = int_to_ptr.vmem [resolvable:$true] %s153_s6 }
  0x18   : > { %p9718_p1 = scmp.ne.s32.totalorder %s9941_s30, %s9717_s8  ;;  %p9719_p2 = pneg %p9943_p13 }
  0x19   : > { %s9722_s11 = scalar_lea.hbm %s11625_s1, 147456  ;;  %p9723_p5 = scmp.lt.u32.totalorder %s9941_s30, %s11625_s1 }
  0x1a   : > { %p9720_p3 = pnand %p9719_p2, %p9718_p1  ;;  %p9724_p7 = scmp.lt.u32.totalorder %s9722_s11, %s9717_s8 }
  0x1b   : > { %p9726_p10 = scmp.lt.u32.totalorder %s9717_s8, %s9941_s30 }
  0x1c   : > { %p9721_p4 = pneg %p9720_p3  ;;  %p9725_p8 = por %p9724_p7, %p9723_p5 }
  0x1e   : > { %p9727_p9 = por %p9726_p10, %p9725_p8 }
  0x20   : > { %p9728_p0 = pnand %p9727_p9, %p9721_p4 }
  0x22   : > { %9731 = shalt.err (!%p9728_p0)
}
  0x23   : > { %s9732_s20 = scalar_lea.vmem %s9947_s6, 73728  ;;  %s9849_s26 = smov [#allocation4]  }
  0x24   : > { %p9733_p1 = scmp.ne.s32.totalorder %s9947_s6, %s9732_s20  ;;  %s9737_s27 = sshll.u32 %s9849_s26, 4  ;;  %s9738_s27 = int_to_ptr.vmem [resolvable:$false] %s9737_s27 }
  0x25   : > { %s9739_s28 = scalar_lea.vmem %s9738_s27, 147456  ;;  %p9740_p11 = scmp.lt.s32.totalorder %s9947_s6, %s9738_s27 }
  0x26   : > { %p9735_p3 = pnand %p9733_p1, %p9719_p2  ;;  %p9741_p5 = scmp.lt.s32.totalorder %s9739_s28, %s9732_s20 }
  0x28   : > { %p9736_p12 = pneg %p9735_p3  ;;  %p9742_p7 = por %p9741_p5, %p9740_p11 }
  0x2a   : > { %p9743_p8 = pnand %p9742_p7, %p9736_p12 }
  0x2c   : > { %9746 = shalt.err (!%p9743_p8)
}
  0x2d   : > { %s9850_s29 = smov 256   ;;  %s9851_s5 = smov 128  }
  0x2e   : > { %s9852_s8 = smov 8   ;;  %p180_p9 = scmp.lt.s32.totalorder %s9847_s15, 3 }
  0x2f   : > { %8800 = dma.hbm_to_vmem [thread:$0]  (!%p9943_p13), %s9941_s30, 73728, %s9947_s6, %s143_s7, %s9850_s29, %s9851_s5, %s9852_s8  }
  0x30   : > { %s7687_s9 = sshll.u32 %s9934_s25, 1  ;;  %s8499_s10 = sshll.u32 %s9847_s15, 5 }
  0x31   : > { %p11634_p11 = scmp.ge.s32.totalorder %s9847_s15, 1  ;;  %s9990_s20 = scalar_lea.hbm %s11626_s2, %s8499_s10 }
  0x32   : > { %s167_s26 = scalar_lea.vmem [#allocation7], %s7687_s9  ;;  %s164_s30 = scalar_lea.sflag [#allocation8], %s9934_s25 }
  0x33   : > { %p9983_p12 = pnand %p11634_p11, %p180_p9  ;;  %s175_s27 = sshll.u32 %s167_s26, 4  ;;  %s176_s27 = int_to_ptr.vmem [resolvable:$true] %s175_s27 }
  0x34   : > { %s9747_s6 = scalar_lea.hbm %s9990_s20, 32  ;;  %s9752_s29 = scalar_lea.hbm %s11626_s2, 64 }
  0x35   : > { %s11635_s11 = scalar_select %p9983_p12, 1, 0 }
  0x36   : > { %p9748_p0 = scmp.ne.s32.totalorder %s9990_s20, %s9747_s6  ;;  %p9753_p1 = scmp.lt.u32.totalorder %s9990_s20, %s11626_s2 }
  0x37   : > { %p9754_p3 = scmp.lt.u32.totalorder %s9752_s29, %s9747_s6  ;;  %p9756_p7 = scmp.lt.u32.totalorder %s9747_s6, %s9990_s20 }
  0x38   : > { %p9750_p4 = pnand %p9748_p0, %p9719_p2 }
  0x39   : > { %p9755_p5 = por %p9754_p3, %p9753_p1 }
  0x3a   : > { %p9751_p10 = pneg %p9750_p4 }
  0x3b   : > { %p9757_p8 = por %p9756_p7, %p9755_p5 }
  0x3d   : > { %p9758_p9 = pnand %p9757_p8, %p9751_p10 }
  0x3f   : > { %9761 = shalt.err (!%p9758_p9)
}
  0x40   : > { %s9762_s25 = scalar_lea.vmem %s176_s27, 32  ;;  %s9853_s9 = smov [#allocation7]  }
  0x41   : > { %p9763_p11 = scmp.ne.s32.totalorder %s176_s27, %s9762_s25  ;;  %s9767_s10 = sshll.u32 %s9853_s9, 4  ;;  %s9768_s10 = int_to_ptr.vmem [resolvable:$false] %s9767_s10 }
  0x42   : > { %s9769_s17 = scalar_lea.vmem %s9768_s10, 64  ;;  %p9770_p6 = scmp.lt.s32.totalorder %s176_s27, %s9768_s10 }
  0x43   : > { %p9765_p0 = pnand %p9763_p11, %p9719_p2  ;;  %p9771_p12 = scmp.lt.s32.totalorder %s9769_s17, %s9762_s25 }
  0x45   : > { %p9766_p4 = pneg %p9765_p0  ;;  %p9772_p1 = por %p9771_p12, %p9770_p6 }
  0x47   : > { %p9773_p3 = pnand %p9772_p1, %p9766_p4 }
  0x49   : > { %9776 = shalt.err (!%p9773_p3)
}
  0x4a   : > { %8803 = dma.hbm_to_vmem [thread:$0]  (!%p9943_p13), %s9990_s20, 32, %s176_s27, %s164_s30  }
  0x4b   : > { %p11636_p10 = scmp.ne.s32.totalorder %s11635_s11, 0 }
  0x4c   : > { %s10015_s19 = sand.u32 (!%p11636_p10), 1, %s9839_s13   ;;  %p11637_p6 = scmp.ne.s32.totalorder (!%p11636_p10), %s11630_s22, 0 }
  0x4d   : > { %184 = sbr.rel (%p11636_p10) target bundleno = 933 (0x3a5), region = 32  ;;  %s187_s6 = scalar_lea.sflag (!%p11636_p10), [#allocation5], %s10015_s19 }
  0x4e   : > { %s8790_s26 = smul.u32 (!%p11636_p10), 4608, %s10015_s19 }
  0x50   : > { %s10019_s7 = scalar_lea.vmem (!%p11636_p10), [#allocation4], %s8790_s26 }
  0x54   : > { %9822 = dma.done.wait (%p11637_p6), %s187_s6, 73728  }
  0x55   : > { %9824 = vsyncadd (%p11637_p6), %s187_s6, 4294893568  ;;  %s7691_s4 = sshll.u32 %s10015_s19, 1  ;;  %s196_s11 = scalar_lea.sflag [#allocation8], %s10015_s19 }
  0x56   : > { %s10027_s20 = scalar_lea.vmem [#allocation7], %s7691_s4 }
  0x57   : > { %9826 = dma.done.wait (%p11637_p6), %s196_s11, 32  }
  0x58   : > { %9828 = vsyncadd (%p11637_p6), %s196_s11, 4294967264  ;;  %v9854_v0 = vmov 0   ;;  %v8849_v1 = vld [vmem:[%s10019_s7 + $0x4] ss:$8 sps:$4 sm:$0xff]   ;;  %v8853_v3 = vld [vmem:[%s10019_s7] ss:$8 sps:$4 sm:$0xff]  }
  0x59   : > { %344 = vst [vmem:[#allocation2] sm:$0xff] %v9854_v0  ;;  %345 = vst [vmem:[#allocation2 + $0x8] sm:$0xff] %v9854_v0  ;;  %v8851_v2 = vld [vmem:[%s10019_s7 + $0x904] ss:$8 sps:$4 sm:$0xff]   ;;  %6242 = vmatprep.subr.bf16.mxu1 %v8849_v1  ;;  %v8854_v4 = vld [vmem:[%s10019_s7 + $0x900] ss:$8 sps:$4 sm:$0xff]  }
  0x5a   : > { %346 = vst [vmem:[#allocation2 + $0x10] sm:$0x11] %v9854_v0  ;;  %347 = vst [vmem:[#allocation2 + $0x18] sm:$0x11] %v9854_v0  ;;  %6899 = vmatprep.subr.bf16.mxu0 %v8851_v2  ;;  %v8855_v5 = vld [vmem:[%s10019_s7 + $0x14] ss:$8 sps:$4 sm:$0xff]   ;;  %6243 = vmatpush1.bf16.msra.mxu1 %v8853_v3 }
  0x5b   : > { %350 = vst [vmem:[#allocation2 + $0x30] sm:$0x11] %v9854_v0  ;;  %351 = vst [vmem:[#allocation2 + $0x38] sm:$0x11] %v9854_v0  ;;  %6900 = vmatpush1.bf16.msra.mxu0 %v8854_v4  ;;  %v8857_v6 = vld [vmem:[%s10019_s7 + $0x914] ss:$8 sps:$4 sm:$0xff]   ;;  %6244 = vmatprep.subr.bf16.mxu1 %v8855_v5 }
  0x5c   : > { %354 = vst [vmem:[#allocation2 + $0x50] sm:$0x11] %v9854_v0  ;;  %355 = vst [vmem:[#allocation2 + $0x58] sm:$0x11] %v9854_v0  ;;  %v8859_v7 = vld [vmem:[%s10019_s7 + $0x10] ss:$8 sps:$4 sm:$0xff]   ;;  %6901 = vmatprep.subr.bf16.mxu0 %v8857_v6 }
  0x5d   : > { %358 = vst [vmem:[#allocation2 + $0x70] sm:$0x11] %v9854_v0  ;;  %359 = vst [vmem:[#allocation2 + $0x78] sm:$0x11] %v9854_v0  ;;  %v8860_v8 = vld [vmem:[%s10019_s7 + $0x910] ss:$8 sps:$4 sm:$0xff]  }
  0x5e   : > { %362 = vst [vmem:[#allocation2 + $0x90] sm:$0x11] %v9854_v0  ;;  %363 = vst [vmem:[#allocation2 + $0x98] sm:$0x11] %v9854_v0  ;;  %v8861_v9 = vld [vmem:[%s10019_s7 + $0x24] ss:$8 sps:$4 sm:$0xff]   ;;  %6245 = vmatpush1.bf16.msra.mxu1 %v8859_v7 }
  0x5f   : > { %366 = vst [vmem:[#allocation2 + $0xb0] sm:$0x11] %v9854_v0  ;;  %367 = vst [vmem:[#allocation2 + $0xb8] sm:$0x11] %v9854_v0  ;;  %v8863_v10 = vld [vmem:[%s10019_s7 + $0x924] ss:$8 sps:$4 sm:$0xff]   ;;  %6902 = vmatpush1.bf16.msra.mxu0 %v8860_v8  ;;  %6246 = vmatprep.subr.bf16.mxu1 %v8861_v9 }
  0x60   : > { %370 = vst [vmem:[#allocation2 + $0xd0] sm:$0x11] %v9854_v0  ;;  %371 = vst [vmem:[#allocation2 + $0xd8] sm:$0x11] %v9854_v0  ;;  %v8865_v11 = vld [vmem:[%s10019_s7 + $0x20] ss:$8 sps:$4 sm:$0xff]   ;;  %6903 = vmatprep.subr.bf16.mxu0 %v8863_v10 }
  0x61   : > { %374 = vst [vmem:[#allocation2 + $0xf0] sm:$0x11] %v9854_v0  ;;  %375 = vst [vmem:[#allocation2 + $0xf8] sm:$0x11] %v9854_v0  ;;  %v8866_v12 = vld [vmem:[%s10019_s7 + $0x920] ss:$8 sps:$4 sm:$0xff]  }
  0x62   : > { %378 = vst [vmem:[#allocation2 + $0x110] sm:$0x11] %v9854_v0  ;;  %379 = vst [vmem:[#allocation2 + $0x118] sm:$0x11] %v9854_v0  ;;  %v8867_v13 = vld [vmem:[%s10019_s7 + $0x34] ss:$8 sps:$4 sm:$0xff]   ;;  %6247 = vmatpush1.bf16.msra.mxu1 %v8865_v11 }
  0x63   : > { %380 = vst [vmem:[#allocation2 + $0x120] sm:$0xff] %v9854_v0  ;;  %381 = vst [vmem:[#allocation2 + $0x128] sm:$0xff] %v9854_v0  ;;  %v8869_v14 = vld [vmem:[%s10019_s7 + $0x934] ss:$8 sps:$4 sm:$0xff]   ;;  %v8871_v15 = vld [vmem:[%s10019_s7 + $0x30] ss:$8 sps:$4 sm:$0xff]   ;;  %6904 = vmatpush1.bf16.msra.mxu0 %v8866_v12  ;;  %6248 = vmatprep.subr.bf16.mxu1 %v8867_v13 }
  0x64   : > { %382 = vst [vmem:[#allocation2 + $0x130] sm:$0x11] %v9854_v0  ;;  %383 = vst [vmem:[#allocation2 + $0x138] sm:$0x11] %v9854_v0  ;;  %v8872_v16 = vld [vmem:[%s10019_s7 + $0x930] ss:$8 sps:$4 sm:$0xff]   ;;  %6905 = vmatprep.subr.bf16.mxu0 %v8869_v14 }
  0x65   : > { %v8873_v17 = vld [vmem:[%s10019_s7 + $0x44] ss:$8 sps:$4 sm:$0xff]   ;;  %v8877_v19 = vld [vmem:[%s10019_s7 + $0x40] ss:$8 sps:$4 sm:$0xff]   ;;  %v8879_v21 = vld [vmem:[%s10019_s7 + $0x54] ss:$8 sps:$4 sm:$0xff]  }
  0x66   : > { %v8875_v18 = vld [vmem:[%s10019_s7 + $0x944] ss:$8 sps:$4 sm:$0xff]   ;;  %v8878_v20 = vld [vmem:[%s10019_s7 + $0x940] ss:$8 sps:$4 sm:$0xff]   ;;  %6249 = vmatpush1.bf16.msra.mxu1 %v8871_v15  ;;  %v8881_v22 = vld [vmem:[%s10019_s7 + $0x954] ss:$8 sps:$4 sm:$0xff]  }
  0x67   : > { %6906 = vmatpush1.bf16.msra.mxu0 %v8872_v16  ;;  %6250 = vmatprep.subr.bf16.mxu1 %v8873_v17  ;;  %v8883_v23 = vld [vmem:[%s10019_s7 + $0x50] ss:$8 sps:$4 sm:$0xff]   ;;  %v8885_v25 = vld [vmem:[%s10019_s7 + $0x64] ss:$8 sps:$4 sm:$0xff]   ;;  %v8889_v27 = vld [vmem:[%s10019_s7 + $0x60] ss:$8 sps:$4 sm:$0xff]  }
  0x68   : > { %6907 = vmatprep.subr.bf16.mxu0 %v8875_v18  ;;  %v8884_v24 = vld [vmem:[%s10019_s7 + $0x950] ss:$8 sps:$4 sm:$0xff]   ;;  %v8887_v26 = vld [vmem:[%s10019_s7 + $0x964] ss:$8 sps:$4 sm:$0xff]   ;;  %v8890_v28 = vld [vmem:[%s10019_s7 + $0x960] ss:$8 sps:$4 sm:$0xff]  }
  0x69   : > { %v8891_v29 = vld [vmem:[%s10019_s7 + $0x74] ss:$8 sps:$4 sm:$0xff]   ;;  %v8895_v31 = vld [vmem:[%s10019_s7 + $0x70] ss:$8 sps:$4 sm:$0xff]   ;;  %v8897_v33 = vld [vmem:[%s10019_s7 + $0x84] ss:$8 sps:$4 sm:$0xff]  }
  0x6a   : > { %6251 = vmatpush1.bf16.msra.mxu1 %v8877_v19  ;;  %v8893_v30 = vld [vmem:[%s10019_s7 + $0x974] ss:$8 sps:$4 sm:$0xff]   ;;  %v8896_v32 = vld [vmem:[%s10019_s7 + $0x970] ss:$8 sps:$4 sm:$0xff]   ;;  %v8899_v34 = vld [vmem:[%s10019_s7 + $0x984] ss:$8 sps:$4 sm:$0xff]  }
  0x6b   : > { %6908 = vmatpush1.bf16.msra.mxu0 %v8878_v20  ;;  %6252 = vmatprep.subr.bf16.mxu1 %v8879_v21  ;;  %v8901_v35 = vld [vmem:[%s10019_s7 + $0x80] ss:$8 sps:$4 sm:$0xff]   ;;  %v8903_v37 = vld [vmem:[%s10019_s7 + $0x94] ss:$8 sps:$4 sm:$0xff]   ;;  %vm545_vm0 = vcmask 1043456   ;;  %vm548_vm3 = vcmask 1047556  }
  0x6c   : > { %6909 = vmatprep.subr.bf16.mxu0 %v8881_v22  ;;  %v8902_v36 = vld [vmem:[%s10019_s7 + $0x980] ss:$8 sps:$4 sm:$0xff]   ;;  %v8905_v38 = vld [vmem:[%s10019_s7 + $0x994] ss:$8 sps:$4 sm:$0xff]   ;;  %vm546_vm1 = vsmask.f32 7938 }
  0x6d   : > { %v8907_v39 = vld [vmem:[%s10019_s7 + $0x90] ss:$8 sps:$4 sm:$0xff]   ;;  %vm549_vm2 = vsmask.f32 7954  ;;  %v8909_v41 = vld [vmem:[%s10019_s7 + $0xa4] ss:$8 sps:$4 sm:$0xff]   ;;  %vm10103_vm6 = vmand %vm545_vm0, %vm546_vm1 }
  0x6e   : > { %6253 = vmatpush1.bf16.msra.mxu1 %v8883_v23  ;;  %v8908_v40 = vld [vmem:[%s10019_s7 + $0x990] ss:$8 sps:$4 sm:$0xff]   ;;  %v8911_v42 = vld [vmem:[%s10019_s7 + $0x9a4] ss:$8 sps:$4 sm:$0xff]   ;;  %vm558_vm4 = vcmask 1040384   ;;  %vm10107_vm7 = vmand %vm548_vm3, %vm549_vm2  ;;  %vm561_vm9 = vcmask 1044484  }
  0x6f   : > { %6910 = vmatpush1.bf16.msra.mxu0 %v8884_v24  ;;  %6254 = vmatprep.subr.bf16.mxu1 %v8885_v25  ;;  %vm559_vm5 = vsmask.f32 256  ;;  %v8913_v43 = vld [vmem:[%s10019_s7 + $0xa0] ss:$8 sps:$4 sm:$0xff]   ;;  %v8915_v47 = vld [vmem:[%s10019_s7 + $0xb4] ss:$8 sps:$4 sm:$0xff]   ;;  %vm10173_vm12 = vmor %vm10107_vm7, %vm10103_vm6 }
  0x70   : > { %6911 = vmatprep.subr.bf16.mxu0 %v8887_v26  ;;  %v8914_v44 = vld [vmem:[%s10019_s7 + $0x9a0] ss:$8 sps:$4 sm:$0xff]   ;;  %v8917_v48 = vld [vmem:[%s10019_s7 + $0x9b4] ss:$8 sps:$4 sm:$0xff]   ;;  %vm10113_vm8 = vmand %vm558_vm4, %vm559_vm5  ;;  %vm562_vm10 = vsmask.f32 4352 }
  0x71   : > { %v8919_v50 = vld [vmem:[%s10019_s7 + $0xb0] ss:$8 sps:$4 sm:$0xff]   ;;  %v231_v52 = vld [vmem:[%s11624_s0] sm:$0xff]  ;;  %v232_v60 = vld [vmem:[%s11624_s0 + $0x8] sm:$0xff]  ;;  %vm799_vm14 = vsmask.f32 3328 }
  0x72   : > { %6255 = vmatpush1.bf16.msra.mxu1 %v8889_v27  ;;  %v8920_v51 = vld [vmem:[%s10019_s7 + $0x9b0] ss:$8 sps:$4 sm:$0xff]   ;;  %v7693_v54 = vld [vmem:[%s11624_s0 + $0x20] sm:$0xff]  ;;  %v234_v61 = vld [vmem:[%s11624_s0 + $0x48] sm:$0xff]  ;;  %vm800_vm15 = vsmask.f32 7440 }
  0x73   : > { %6912 = vmatpush1.bf16.msra.mxu0 %v8890_v28  ;;  %6256 = vmatprep.subr.bf16.mxu1 %v8891_v29  ;;  %v247_v53 = vld [vmem:[%s11624_s0 + $0x10] sm:$0xff]  ;;  %v8921_v56 = vld [vmem:[%s10019_s7 + $0xc4] ss:$8 sps:$4 sm:$0xff]   ;;  %v8925_v62 = vld [vmem:[%s10019_s7 + $0xc0] ss:$8 sps:$4 sm:$0xff]   ;;  %vm1170_vm1 = vcmask 1042432  }
  0x74   : > { %6913 = vmatprep.subr.bf16.mxu0 %v8893_v30  ;;  %v7709_v55 = vld [vmem:[%s11624_s0 + $0x30] sm:$0xff]  ;;  %v263_v57 = vmax.bf16 %v247_v53, %v231_v52  ;;  %v8923_v59 = vld [vmem:[%s10019_s7 + $0x9c4] ss:$8 sps:$4 sm:$0xff]   ;;  %v248_v1 = vld [vmem:[%s11624_s0 + $0x18] sm:$0xff]  ;;  %vm1171_vm2 = vcmask 1046532   ;;  %s8500_s9 = sshll.u32 %s9900_s16, 8 }
  0x75   : > { %v312_v58 = vmax.bf16 %v7709_v55, %v7693_v54  ;;  %v250_v2 = vld [vmem:[%s11624_s0 + $0x58] sm:$0xff]  ;;  %v7694_v3 = vld [vmem:[%s11624_s0 + $0x28] sm:$0xff]  ;;  %v264_v4 = vmax.bf16 %v248_v1, %v232_v60  ;;  %vm10162_vm11 = vmand %vm561_vm9, %vm562_vm10  ;;  %s11574_s6 = scalar_lea.hbm %s11627_s3, %s8500_s9  ;;  %s7573_s16 = scalar_lea.sflag [#allocation6], %s10015_s19 }
  0x76   : > { %6257 = vmatpush1.bf16.msra.mxu1 %v8895_v31  ;;  %v266_v5 = vmax.bf16 %v250_v2, %v234_v61  ;;  %v7696_v6 = vld [vmem:[%s11624_s0 + $0x68] sm:$0xff]  ;;  %v7710_v7 = vld [vmem:[%s11624_s0 + $0x38] sm:$0xff]  ;;  %vm10185_vm13 = vmor %vm10162_vm11, %vm10113_vm8  ;;  %p11654_p2 = scmp.ne.s32.totalorder %s11631_s23, 0  ;;  %s9855_s11 = smov [#allocation9]  }
  0x77   : > { %6914 = vmatpush1.bf16.msra.mxu0 %v8896_v32  ;;  %6258 = vmatprep.subr.bf16.mxu1 %v8897_v33  ;;  %v328_v63 = vmax.bf16 %v312_v58, %v263_v57  ;;  %v7712_v8 = vld [vmem:[%s11624_s0 + $0x78] sm:$0xff]  ;;  %v8926_v9 = vld [vmem:[%s10019_s7 + $0x9c0] ss:$8 sps:$4 sm:$0xff]   ;;  %v313_v13 = vmax.bf16 %v7710_v7, %v7694_v3  ;;  %v8933_v23 = vld [vmem:[%s10019_s7 + $0xe4] ss:$8 sps:$4 sm:$0xff]   ;;  %s9781_s22 = sshll.u32 %s9855_s11, 4  ;;  %s9782_s22 = int_to_ptr.vmem [resolvable:$false] %s9781_s22 }
  0x78   : > { %6915 = vmatprep.subr.bf16.mxu0 %v8899_v34  ;;  %v8927_v10 = vld [vmem:[%s10019_s7 + $0xd4] ss:$8 sps:$4 sm:$0xff]   ;;  %v315_v14 = vmax.bf16 %v7712_v8, %v7696_v6  ;;  %v8931_v21 = vld [vmem:[%s10019_s7 + $0xd0] ss:$8 sps:$4 sm:$0xff]   ;;  %v8935_v28 = vld [vmem:[%s10019_s7 + $0x9e4] ss:$8 sps:$4 sm:$0xff]  }
  0x79   : > { %v385_v11 = vshrl.u32 %v328_v63, 16  ;;  %v388_v12 = vshll.u32 %v328_v63, 16  ;;  %v8929_v16 = vld [vmem:[%s10019_s7 + $0x9d4] ss:$8 sps:$4 sm:$0xff]   ;;  %v329_v19 = vmax.bf16 %v313_v13, %v264_v4  ;;  %v8932_v22 = vld [vmem:[%s10019_s7 + $0x9d0] ss:$8 sps:$4 sm:$0xff]   ;;  %vm10212_vm0 = vmor %vm799_vm14, %vm800_vm15 }
  0x7a   : > { %6259 = vmatpush1.bf16.msra.mxu1 %v8901_v35  ;;  %v331_v20 = vmax.bf16 %v315_v14, %v266_v5  ;;  %v8937_v31 = vld [vmem:[%s10019_s7 + $0xe0] ss:$8 sps:$4 sm:$0xff]   ;;  %v8939_v35 = vld [vmem:[%s10019_s7 + $0xf4] ss:$8 sps:$4 sm:$0xff]   ;;  %v8944_v52 = vld [vmem:[%s10019_s7 + $0x9f0] ss:$8 sps:$4 sm:$0xff]  }
  0x7b   : > { %6916 = vmatpush1.bf16.msra.mxu0 %v8902_v36  ;;  %6260 = vmatprep.subr.bf16.mxu1 %v8903_v37  ;;  %v10167_v17 = vrot.slane %v385_v11, 7  ;;  %v392_v25 = vshrl.u32 %v329_v19, 16  ;;  %v395_v26 = vshll.u32 %v329_v19, 16  ;;  %v8938_v32 = vld [vmem:[%s10019_s7 + $0x9e0] ss:$8 sps:$4 sm:$0xff]   ;;  %vm10547_vm3 = vmor %vm1170_vm1, %vm1171_vm2  ;;  %s9783_s27 = scalar_lea.vmem %s9782_s22, 4096 }
  0x7c   : > { %6917 = vmatprep.subr.bf16.mxu0 %v8905_v38  ;;  %v408_v29 = vshrl.u32 %v331_v20, 16  ;;  %v411_v30 = vshll.u32 %v331_v20, 16  ;;  %v568_v38 = vld [vmem:[#allocation2 + $0x38] sm:$0x11]  ;;  %v8947_v55 = vld [vmem:[%s10019_s7 + $0x104] ss:$8 sps:$4 sm:$0xff]  }
  0x7d   : > { %v390_v24 = vor.u32 %v388_v12, %v10167_v17  ;;  %v394_v34 = vrot.slane %v392_v25, 7  ;;  %v8950_v58 = vld [vmem:[%s10019_s7 + $0xa04] ss:$8 sps:$4 sm:$0xff]   ;;  %v8945_v63 = vld [vmem:[%s10019_s7 + $0x100] ss:$8 sps:$4 sm:$0xff]  }
  0x7e   : > { %6261 = vmatpush1.bf16.msra.mxu1 %v8907_v39  ;;  %v410_v37 = vrot.slane %v408_v29, 7  ;;  %v8953_v2 = vld [vmem:[%s10019_s7 + $0x114] ss:$8 sps:$4 sm:$0xff]   ;;  %v8959_v11 = vld [vmem:[%s10019_s7 + $0x124] ss:$8 sps:$4 sm:$0xff]  }
  0x7f   : > { %6918 = vmatpush1.bf16.msra.mxu0 %v8908_v40  ;;  %6262 = vmatprep.subr.bf16.mxu1 %v8909_v41  ;;  %v553_v33 = vsel %vm10173_vm12, %v390_v24, 0  ;;  %v397_v39 = vor.u32 %v395_v26, %v394_v34  ;;  %v399_v40 = vrot.slane %v394_v34, 4  ;;  %v580_v41 = vld [vmem:[#allocation2 + $0x58] sm:$0x11]  ;;  %v8948_v15 = vld [vmem:[%s10019_s7 + $0xa00] ss:$8 sps:$4 sm:$0xff]  }
  0x80   : > { %6919 = vmatprep.subr.bf16.mxu0 %v8911_v42  ;;  %554 = vst [vmem:[#allocation2 + $0x20] sm:$0xff] %v553_v33  ;;  %v7726_v36 = vcombine.high %v9854_v0, %v553_v33  ;;  %v8941_v42 = vld [vmem:[%s10019_s7 + $0x9f4] ss:$8 sps:$4 sm:$0xff]   ;;  %v7725_v61 = vcombine.low %v9854_v0, %v553_v33  ;;  %v8963_v24 = vld [vmem:[%s10019_s7 + $0x130] ss:$8 sps:$4 sm:$0xff]   ;;  %v233_v26 = vld [vmem:[%s11624_s0 + $0x40] sm:$0xff] }
  0x81   : > { %v556_v45 = vsel %vm10173_vm12, %v397_v39, 0  ;;  %v569_v46 = vsel %vm10185_vm13, %v399_v40, %v568_v38  ;;  %v8971_v25 = vld [vmem:[%s10019_s7 + $0x144] ss:$8 sps:$4 sm:$0xff]   ;;  %v8960_v39 = vld [vmem:[%s10019_s7 + $0xa20] ss:$8 sps:$4 sm:$0xff]  }
  0x82   : > { %6263 = vmatpush1.bf16.msra.mxu1 %v8913_v43  ;;  %v413_v43 = vor.u32 %v411_v30, %v410_v37  ;;  %6274 = vmatprep.mubr.bf16.mxu1 %v7726_v36  ;;  %557 = vst [vmem:[#allocation2 + $0x28] sm:$0xff] %v556_v45  ;;  %570 = vst [vmem:[#allocation2 + $0x38] sm:$0x11] %v569_v46  ;;  %v235_v29 = vld [vmem:[%s11624_s0 + $0x80] sm:$0xff]  ;;  %v249_v30 = vld [vmem:[%s11624_s0 + $0x50] sm:$0xff] }
  0x83   : > { %6920 = vmatpush1.bf16.msra.mxu0 %v8914_v44  ;;  %6264 = vmatprep.subr.bf16.mxu1 %v8915_v47  ;;  %v415_v44 = vrot.slane %v410_v37, 4  ;;  %v8943_v47 = vld [vmem:[%s10019_s7 + $0xf0] ss:$8 sps:$4 sm:$0xff]   ;;  %v7695_v34 = vld [vmem:[%s11624_s0 + $0x60] sm:$0xff] }
  0x84   : > { %6921 = vmatprep.subr.bf16.mxu0 %v8917_v48  ;;  %v575_v48 = vsel %vm10173_vm12, %v413_v43, 0  ;;  %v7711_v36 = vld [vmem:[%s11624_s0 + $0x70] sm:$0xff]  ;;  %v8969_v40 = vld [vmem:[%s10019_s7 + $0x140] ss:$8 sps:$4 sm:$0xff]   ;;  %v252_v46 = vld [vmem:[%s11624_s0 + $0x98] sm:$0xff] }
  0x85   : > { %v581_v49 = vsel %vm10185_vm13, %v415_v44, %v580_v41  ;;  %576 = vst [vmem:[#allocation2 + $0x48] sm:$0xff] %v575_v48  ;;  %v1504_v53 = vshrl.u32 %v575_v48, 16  ;;  %v1507_v54 = vshll.u32 %v575_v48, 16  ;;  %v7713_v37 = vld [vmem:[%s11624_s0 + $0xb0] sm:$0xff]  ;;  %v314_v38 = vmax.bf16 %v7711_v36, %v7695_v34  ;;  %v236_v43 = vld [vmem:[%s11624_s0 + $0x88] sm:$0xff] }
  0x86   : > { %6265 = vmatpush1.bf16.msra.mxu1 %v8919_v50  ;;  %v1476_v50 = vshrl.u32 %v556_v45, 16  ;;  %582 = vst [vmem:[#allocation2 + $0x58] sm:$0x11] %v581_v49  ;;  %v8977_v41 = vld [vmem:[%s10019_s7 + $0x154] ss:$8 sps:$4 sm:$0xff]   ;;  %v268_v49 = vmax.bf16 %v252_v46, %v236_v43  ;;  %v240_v46 = vld [vmem:[%s11624_s0 + $0x108] sm:$0xff] }
  0x87   : > { %6922 = vmatpush1.bf16.msra.mxu0 %v8920_v51  ;;  %6266 = vmatprep.subr.bf16.mxu1 %v8921_v56  ;;  %v1479_v51 = vshll.u32 %v556_v45, 16  ;;  %v1509_v60 = vrot.slane %v1507_v54, 5  ;;  %v238_v45 = vld [vmem:[%s11624_s0 + $0xc8] sm:$0xff]  ;;  %v8968_v54 = vld [vmem:[%s10019_s7 + $0xa34] ss:$8 sps:$4 sm:$0xff]  }
  0x88   : > { %6923 = vmatprep.subr.bf16.mxu0 %v8923_v59  ;;  %v1478_v56 = vrot.slane %v1476_v50, 4  ;;  %v1506_v59 = vrot.slane %v1504_v53, 4  ;;  %v7714_v53 = vld [vmem:[%s11624_s0 + $0xb8] sm:$0xff]  ;;  %v7715_v34 = vld [vmem:[%s11624_s0 + $0xf0] sm:$0xff] }
  0x89   : > { %v1481_v57 = vrot.slane %v1479_v51, 5  ;;  %v1432_v3 = vld [vmem:[#allocation2 + $0x38] sm:$0x11]  ;;  %v7698_v51 = vld [vmem:[%s11624_s0 + $0xa8] sm:$0xff] }
  0x8a   : > { %6267 = vmatpush1.bf16.msra.mxu1 %v8925_v62  ;;  %v1510_v1 = vor.u32 %v1509_v60, %v1506_v59  ;;  %v1485_v6 = vshll.u32 %v1432_v3, 16  ;;  %v8974_v3 = vld [vmem:[%s10019_s7 + $0xa44] ss:$8 sps:$4 sm:$0xff]  }
  0x8b   : > { %6924 = vmatpush1.bf16.msra.mxu0 %v8926_v9  ;;  %6268 = vmatprep.subr.bf16.mxu1 %v8927_v10  ;;  %v1482_v62 = vor.u32 %v1481_v57, %v1478_v56  ;;  %v8951_v9 = vld [vmem:[%s10019_s7 + $0x110] ss:$8 sps:$4 sm:$0xff]  }
  0x8c   : > { %6925 = vmatprep.subr.bf16.mxu0 %v8929_v16  ;;  %v1511_v7 = vrot.slane %v1510_v1, 4  ;;  %v1487_v10 = vrot.slane %v1485_v6, 5  ;;  %v8957_v16 = vld [vmem:[%s10019_s7 + $0x120] ss:$8 sps:$4 sm:$0xff]   ;;  %v7716_v57 = vld [vmem:[%s11624_s0 + $0xf8] sm:$0xff] }
  0x8d   : > { %v1436_v4 = vld [vmem:[#allocation2 + $0x58] sm:$0x11]  ;;  %v1483_v5 = vrot.slane %v1482_v62, 4 }
  0x8e   : > { %6269 = vmatpush1.bf16.msra.mxu1 %v8931_v21  ;;  %v1513_v8 = vshll.u32 %v1436_v4, 16  ;;  %v8965_v21 = vld [vmem:[%s10019_s7 + $0x134] ss:$8 sps:$4 sm:$0xff]   ;;  %v8966_v62 = vld [vmem:[%s10019_s7 + $0xa30] ss:$8 sps:$4 sm:$0xff]  }
  0x8f   : > { %6926 = vmatpush1.bf16.msra.mxu0 %v8932_v22  ;;  %6270 = vmatprep.subr.bf16.mxu1 %v8933_v23  ;;  %v1488_v13 = vsel %vm10212_vm0, %v1483_v5, %v1487_v10  ;;  %v8956_v22 = vld [vmem:[%s10019_s7 + $0xa14] ss:$8 sps:$4 sm:$0xff]   ;;  %v8954_v23 = vld [vmem:[%s10019_s7 + $0xa10] ss:$8 sps:$4 sm:$0xff]   ;;  %v8983_v4 = vld [vmem:[%s10019_s7 + $0x164] ss:$8 sps:$4 sm:$0xff]  }
  0x90   : > { %6927 = vmatprep.subr.bf16.mxu0 %v8935_v28  ;;  %v1515_v12 = vrot.slane %v1513_v8, 5  ;;  %v8962_v28 = vld [vmem:[%s10019_s7 + $0xa24] ss:$8 sps:$4 sm:$0xff]  }
  0x92   : > { %6271 = vmatpush1.bf16.msra.mxu1 %v8937_v31  ;;  %v1516_v14 = vsel %vm10212_vm0, %v1511_v7, %v1515_v12  ;;  %v251_v31 = vld [vmem:[%s11624_s0 + $0x90] sm:$0xff]  ;;  %v8981_v7 = vld [vmem:[%s10019_s7 + $0x160] ss:$8 sps:$4 sm:$0xff]  }
  0x93   : > { %6928 = vmatpush1.bf16.msra.mxu0 %v8938_v32  ;;  %6272 = vmatprep.subr.bf16.mxu1 %v8939_v35  ;;  %v7807_v19 = vcombine.low %v1488_v13, %v1516_v14  ;;  %v7808_v20 = vcombine.high %v1488_v13, %v1516_v14  ;;  %v265_v32 = vmax.bf16 %v249_v30, %v233_v26  ;;  %v7697_v35 = vld [vmem:[%s11624_s0 + $0xa0] sm:$0xff]  ;;  %v8989_v12 = vld [vmem:[%s10019_s7 + $0x174] ss:$8 sps:$4 sm:$0xff]  }
  0x94   : > { %6929 = vmatprep.subr.bf16.mxu0 %v8941_v42  ;;  %v267_v33 = vmax.bf16 %v251_v31, %v235_v29  ;;  %v316_v42 = vmax.bf16 %v7713_v37, %v7697_v35  ;;  %v255_v26 = vld [vmem:[%s11624_s0 + $0x110] sm:$0xff] }
  0x95   : > { %6931 = vmatprep.mubr.bf16.mxu0 %v7808_v20  ;;  %v330_v44 = vmax.bf16 %v314_v38, %v265_v32  ;;  %v8980_v20 = vld [vmem:[%s10019_s7 + $0xa54] ss:$8 sps:$4 sm:$0xff]   ;;  %v7699_v32 = vld [vmem:[%s11624_s0 + $0xe0] sm:$0xff] }
  0x96   : > { %6273 = vmatpush1.bf16.msra.mxu1 %v8943_v47  ;;  %v254_v47 = vld [vmem:[%s11624_s0 + $0xd8] sm:$0xff]  ;;  %v332_v48 = vmax.bf16 %v316_v42, %v267_v33  ;;  %v7701_v33 = vld [vmem:[%s11624_s0 + $0x120] sm:$0xff] }
  0x97   : > { %6930 = vmatpush1.bf16.msra.mxu0 %v8944_v52  ;;  %6315 = vmatprep.subr.bf16.mxu1 %v8947_v55  ;;  %v270_v50 = vmax.bf16 %v254_v47, %v238_v45  ;;  %v7700_v52 = vld [vmem:[%s11624_s0 + $0xe8] sm:$0xff]  ;;  %v401_v55 = vshrl.u32 %v330_v44, 16  ;;  %v404_v56 = vshll.u32 %v330_v44, 16  ;;  %v318_v44 = vmax.bf16 %v7715_v34, %v7699_v32 }
  0x98   : > { %6972 = vmatprep.subr.bf16.mxu0 %v8950_v58  ;;  %v317_v58 = vmax.bf16 %v7714_v53, %v7698_v51  ;;  %v417_v59 = vshrl.u32 %v332_v48, 16  ;;  %v420_v60 = vshll.u32 %v332_v48, 16  ;;  %v8986_v47 = vld [vmem:[%s10019_s7 + $0xa64] ss:$8 sps:$4 sm:$0xff]   ;;  %v256_v51 = vld [vmem:[%s11624_s0 + $0x118] sm:$0xff] }
  0x99   : > { %6275 = vmatmul.mubr.bf16.vlgmr.msra.gmra.mrb[0].mxu1 %v7725_v61  ;;  %v319_v61 = vmax.bf16 %v7716_v57, %v7700_v52  ;;  %v10284_v1 = vrot.slane %v401_v55, 7  ;;  %v258_v52 = vld [vmem:[%s11624_s0 + $0x158] sm:$0xff]  ;;  %v8995_v53 = vld [vmem:[%s10019_s7 + $0x184] ss:$8 sps:$4 sm:$0xff]  }
  0x9a   : > { %6316 = vmatpush1.bf16.msra.mxu1 %v8945_v63  ;;  %6932 = vmatmul.mubr.bf16.vlgmr.msra.gmra.mrb[0].mxu0 %v7807_v19  ;;  %v8975_v63 = vld [vmem:[%s10019_s7 + $0x150] ss:$8 sps:$4 sm:$0xff]   ;;  %v10288_v5 = vrot.slane %v417_v59, 7  ;;  %v237_v19 = vld [vmem:[%s11624_s0 + $0xc0] sm:$0xff] }
  0x9b   : > { %6317 = vmatprep.subr.bf16.mxu1 %v8953_v2  ;;  %6973 = vmatpush1.bf16.msra.mxu0 %v8948_v15  ;;  %v333_v2 = vmax.bf16 %v317_v58, %v268_v49  ;;  %v335_v6 = vmax.bf16 %v319_v61, %v270_v50  ;;  %v406_v8 = vor.u32 %v404_v56, %v10284_v1  ;;  %v242_v50 = vld [vmem:[%s11624_s0 + $0x148] sm:$0xff] }
  0x9c   : > { %6974 = vmatprep.subr.bf16.mxu0 %v8956_v22  ;;  %v422_v13 = vor.u32 %v420_v60, %v10288_v5  ;;  %v7702_v58 = vld [vmem:[%s11624_s0 + $0x128] sm:$0xff] }
  0x9d   : > { %v427_v10 = vshll.u32 %v333_v2, 16  ;;  %v440_v14 = vshrl.u32 %v335_v6, 16  ;;  %v443_v15 = vshll.u32 %v335_v6, 16  ;;  %v9007_v32 = vld [vmem:[%s10019_s7 + $0x1a4] ss:$8 sps:$4 sm:$0xff]  }
  0x9e   : > { %6318 = vmatpush1.bf16.msra.mxu1 %v8951_v9  ;;  %v424_v9 = vshrl.u32 %v333_v2, 16  ;;  %v7718_v2 = vld [vmem:[%s11624_s0 + $0x138] sm:$0xff] }
  0x9f   : > { %6319 = vmatprep.subr.bf16.mxu1 %v8959_v11  ;;  %6975 = vmatpush1.bf16.msra.mxu0 %v8954_v23  ;;  %v8972_v11 = vld [vmem:[%s10019_s7 + $0xa40] ss:$8 sps:$4 sm:$0xff]   ;;  %v604_v23 = vld [vmem:[#allocation2 + $0x98] sm:$0x11]  ;;  %v442_v29 = vrot.slane %v440_v14, 7 }
  0xa0   : > { %6976 = vmatprep.subr.bf16.mxu0 %v8962_v28  ;;  %v426_v22 = vrot.slane %v424_v9, 7  ;;  %v584_v28 = vsel %vm10173_vm12, %v422_v13, 0  ;;  %v7720_v9 = vld [vmem:[%s11624_s0 + $0x178] sm:$0xff] }
  0xa1   : > { %585 = vst [vmem:[#allocation2 + $0x60] sm:$0xff] %v584_v28  ;;  %v445_v42 = vor.u32 %v443_v15, %v442_v29  ;;  %v447_v43 = vrot.slane %v442_v29, 4  ;;  %v9001_v15 = vld [vmem:[%s10019_s7 + $0x194] ss:$8 sps:$4 sm:$0xff]  }
  0xa2   : > { %6320 = vmatpush1.bf16.msra.mxu1 %v8957_v16  ;;  %v592_v16 = vld [vmem:[#allocation2 + $0x78] sm:$0x11]  ;;  %v429_v36 = vor.u32 %v427_v10, %v426_v22  ;;  %v431_v37 = vrot.slane %v426_v22, 4  ;;  %v8993_v10 = vld [vmem:[%s10019_s7 + $0x180] ss:$8 sps:$4 sm:$0xff]  }
  0xa3   : > { %6321 = vmatprep.subr.bf16.mxu1 %v8965_v21  ;;  %6977 = vmatpush1.bf16.msra.mxu0 %v8960_v39  ;;  %v572_v21 = vsel %vm10173_vm12, %v406_v8, 0  ;;  %v7717_v39 = vld [vmem:[%s11624_s0 + $0x130] sm:$0xff]  ;;  %v605_v55 = vsel %vm10185_vm13, %v447_v43, %v604_v23  ;;  %v274_v8 = vmax.bf16 %v258_v52, %v242_v50 }
  0xa4   : > { %6978 = vmatprep.subr.bf16.mxu0 %v8968_v54  ;;  %573 = vst [vmem:[#allocation2 + $0x40] sm:$0xff] %v572_v21  ;;  %v7730_v35 = vcombine.high %v572_v21, %v584_v28  ;;  %v7729_v38 = vcombine.low %v572_v21, %v584_v28  ;;  %v320_v45 = vmax.bf16 %v7717_v39, %v7701_v33  ;;  %v10332_v48 = vsel %vm10173_vm12, %v429_v36, 0  ;;  %v8992_v22 = vld [vmem:[%s10019_s7 + $0xa74] ss:$8 sps:$4 sm:$0xff]   ;;  %v8999_v28 = vld [vmem:[%s10019_s7 + $0x190] ss:$8 sps:$4 sm:$0xff]  }
  0xa5   : > { %v593_v49 = vsel %vm10185_vm13, %v431_v37, %v592_v16  ;;  %588 = vst [vmem:[#allocation2 + $0x68] sm:$0xff] %v10332_v48  ;;  %v10349_v54 = vsel %vm10173_vm12, %v445_v42, 0  ;;  %v1532_v56 = vshrl.u32 %v10332_v48, 16  ;;  %v1535_v57 = vshll.u32 %v10332_v48, 16  ;;  %606 = vst [vmem:[#allocation2 + $0x98] sm:$0x11] %v605_v55 }
  0xa6   : > { %6322 = vmatpush1.bf16.msra.mxu1 %v8963_v24  ;;  %v239_v24 = vld [vmem:[%s11624_s0 + $0x100] sm:$0xff]  ;;  %6284 = vmatprep.mubr.bf16.mxu1 %v7730_v35  ;;  %594 = vst [vmem:[#allocation2 + $0x78] sm:$0x11] %v593_v49  ;;  %600 = vst [vmem:[#allocation2 + $0x88] sm:$0xff] %v10349_v54  ;;  %v1560_v59 = vshrl.u32 %v10349_v54, 16  ;;  %v1563_v60 = vshll.u32 %v10349_v54, 16  ;;  %v321_v21 = vmax.bf16 %v7718_v2, %v7702_v58 }
  0xa7   : > { %6323 = vmatprep.subr.bf16.mxu1 %v8971_v25  ;;  %v253_v25 = vld [vmem:[%s11624_s0 + $0xd0] sm:$0xff]  ;;  %6979 = vmatpush1.bf16.msra.mxu0 %v8966_v62  ;;  %v271_v31 = vmax.bf16 %v255_v26, %v239_v24  ;;  %v1537_v6 = vrot.slane %v1535_v57, 5  ;;  %v9005_v42 = vld [vmem:[%s10019_s7 + $0x1a0] ss:$8 sps:$4 sm:$0xff]  }
  0xa8   : > { %v269_v30 = vmax.bf16 %v253_v25, %v237_v19  ;;  %6980 = vmatprep.subr.bf16.mxu0 %v8974_v3  ;;  %6285 = vmatmul.mubr.bf16.gmra.mrb[4].mxu1 %v7729_v38  ;;  %v8984_v3 = vld [vmem:[%s10019_s7 + $0xa60] ss:$8 sps:$4 sm:$0xff]   ;;  %v8990_v26 = vld [vmem:[%s10019_s7 + $0xa70] ss:$8 sps:$4 sm:$0xff]  }
  0xa9   : > { %v336_v62 = vmax.bf16 %v320_v45, %v271_v31  ;;  %v8998_v31 = vld [vmem:[%s10019_s7 + $0xa84] ss:$8 sps:$4 sm:$0xff]   ;;  %v10398_v50 = vld [vmem:[%s11624_s0 + $0x150] sm:$0xff] }
  0xaa   : > { %6324 = vmatpush1.bf16.msra.mxu1 %v8969_v40  ;;  %v8978_v40 = vld [vmem:[%s10019_s7 + $0xa50] ss:$8 sps:$4 sm:$0xff]   ;;  %v334_v61 = vmax.bf16 %v318_v44, %v269_v30  ;;  %v10385_v44 = vld [vmem:[#allocation2] sm:$0xff] }
  0xab   : > { %6325 = vmatprep.subr.bf16.mxu1 %v8977_v41  ;;  %v8987_v41 = vld [vmem:[%s10019_s7 + $0x170] ss:$8 sps:$4 sm:$0xff]   ;;  %6981 = vmatpush1.bf16.msra.mxu0 %v8972_v11  ;;  %v1562_v11 = vrot.slane %v1560_v59, 4  ;;  %v449_v19 = vshrl.u32 %v336_v62, 16  ;;  %v10393_v49 = vld [vmem:[%s11624_s0 + $0x140] sm:$0xff] }
  0xac   : > { %6982 = vmatprep.subr.bf16.mxu0 %v8980_v20  ;;  %v433_v13 = vshrl.u32 %v334_v61, 16  ;;  %v436_v14 = vshll.u32 %v334_v61, 16  ;;  %v452_v20 = vshll.u32 %v336_v62, 16  ;;  %v1444_v37 = vld [vmem:[#allocation2 + $0x98] sm:$0x11]  ;;  %v10407_v57 = vld [vmem:[%s11624_s0 + $0x180] sm:$0xff] }
  0xad   : > { %v10378_v29 = vrot.slane %v449_v19, 7  ;;  %v1440_v33 = vld [vmem:[#allocation2 + $0x78] sm:$0x11]  ;;  %v1569_v43 = vshll.u32 %v1444_v37, 16  ;;  %v10412_v58 = vld [vmem:[%s11624_s0 + $0x190] sm:$0xff] }
  0xae   : > { %6326 = vmatpush1.bf16.msra.mxu1 %v8975_v63  ;;  %v7704_v63 = vld [vmem:[%s11624_s0 + $0x168] sm:$0xff]  ;;  %v10374_v24 = vrot.slane %v433_v13, 7  ;;  %v1541_v38 = vshll.u32 %v1440_v33, 16  ;;  %v9004_v59 = vld [vmem:[%s10019_s7 + $0xa94] ss:$8 sps:$4 sm:$0xff]  }
  0xaf   : > { %6327 = vmatprep.subr.bf16.mxu1 %v8983_v4  ;;  %v1534_v4 = vrot.slane %v1532_v56, 4  ;;  %6983 = vmatpush1.bf16.msra.mxu0 %v8978_v40  ;;  %v323_v25 = vmax.bf16 %v7720_v9, %v7704_v63  ;;  %v454_v40 = vor.u32 %v452_v20, %v10378_v29  ;;  %v616_v63 = vld [vmem:[#allocation2 + $0xb8] sm:$0x11]  ;;  %v273_v9 = vmax.bf16 %v10398_v50, %v10393_v49  ;;  %v7719_v19 = vld [vmem:[%s11624_s0 + $0x170] sm:$0xff] }
  0xb0   : > { %6984 = vmatprep.subr.bf16.mxu0 %v8986_v47  ;;  %v438_v35 = vor.u32 %v436_v14, %v10374_v24  ;;  %v1543_v52 = vrot.slane %v1541_v38, 5  ;;  %v9011_v13 = vld [vmem:[%s10019_s7 + $0x1b0] ss:$8 sps:$4 sm:$0xff]   ;;  %v7706_v38 = vld [vmem:[%s11624_s0 + $0x1a8] sm:$0xff] }
  0xb1   : > { %v1538_v16 = vor.u32 %v1537_v6, %v1534_v4  ;;  %v339_v36 = vmax.bf16 %v323_v25, %v274_v8  ;;  %v9013_v4 = vld [vmem:[%s10019_s7 + $0x1b4] ss:$8 sps:$4 sm:$0xff]  }
  0xb2   : > { %6328 = vmatpush1.bf16.msra.mxu1 %v8981_v7  ;;  %v272_v7 = vmax.bf16 %v256_v51, %v240_v46  ;;  %v596_v45 = vsel %vm10173_vm12, %v438_v35, %v10385_v44  ;;  %v8996_v51 = vld [vmem:[%s10019_s7 + $0xa80] ss:$8 sps:$4 sm:$0xff]   ;;  %v628_v8 = vld [vmem:[#allocation2 + $0xd8] sm:$0x11]  ;;  %v7721_v20 = vld [vmem:[%s11624_s0 + $0x1b0] sm:$0xff] }
  0xb3   : > { %6329 = vmatprep.subr.bf16.mxu1 %v8989_v12  ;;  %v1565_v12 = vrot.slane %v1563_v60, 5  ;;  %v1539_v34 = vrot.slane %v1538_v16, 4  ;;  %6985 = vmatpush1.bf16.msra.mxu0 %v8984_v3  ;;  %v472_v47 = vshrl.u32 %v339_v36, 16  ;;  %597 = vst [vmem:[#allocation2 + $0x80] sm:$0xff] %v596_v45  ;;  %v475_v56 = vshll.u32 %v339_v36, 16  ;;  %v262_v33 = vld [vmem:[%s11624_s0 + $0x1d8] sm:$0xff] }
  0xb4   : > { %v337_v30 = vmax.bf16 %v321_v21, %v272_v7  ;;  %6986 = vmatprep.subr.bf16.mxu0 %v8992_v22  ;;  %v1571_v60 = vrot.slane %v1569_v43, 5  ;;  %v275_v16 = vmax.bf16 %v10412_v58, %v10407_v57  ;;  %v244_v21 = vld [vmem:[%s11624_s0 + $0x188] sm:$0xff]  ;;  %v9002_v22 = vld [vmem:[%s10019_s7 + $0xa90] ss:$8 sps:$4 sm:$0xff]  }
  0xb5   : > { %v1566_v23 = vor.u32 %v1565_v12, %v1562_v11  ;;  %v474_v62 = vrot.slane %v472_v47, 7  ;;  %v1544_v3 = vsel %vm10212_vm0, %v1539_v34, %v1543_v52  ;;  %v7705_v11 = vld [vmem:[%s11624_s0 + $0x1a0] sm:$0xff]  ;;  %v7708_v43 = vld [vmem:[%s11624_s0 + $0x1e8] sm:$0xff] }
  0xb6   : > { %6330 = vmatpush1.bf16.msra.mxu1 %v8987_v41  ;;  %v456_v41 = vshrl.u32 %v337_v30, 16  ;;  %v459_v46 = vshll.u32 %v337_v30, 16  ;;  %v9010_v47 = vld [vmem:[%s10019_s7 + $0xaa4] ss:$8 sps:$4 sm:$0xff]   ;;  %v9008_v58 = vld [vmem:[%s10019_s7 + $0xaa0] ss:$8 sps:$4 sm:$0xff]  }
  0xb7   : > { %6331 = vmatprep.subr.bf16.mxu1 %v8995_v53  ;;  %v1567_v39 = vrot.slane %v1566_v23, 4  ;;  %v608_v53 = vsel %vm10173_vm12, %v454_v40, %v10385_v44  ;;  %6987 = vmatpush1.bf16.msra.mxu0 %v8990_v26  ;;  %v477_v14 = vor.u32 %v475_v56, %v474_v62  ;;  %v9019_v26 = vld [vmem:[%s10019_s7 + $0x1c4] ss:$8 sps:$4 sm:$0xff]  }
  0xb8   : > { %v458_v55 = vrot.slane %v456_v41, 7  ;;  %609 = vst [vmem:[#allocation2 + $0xa0] sm:$0xff] %v608_v53  ;;  %v7734_v61 = vcombine.high %v596_v45, %v608_v53  ;;  %v7733_v2 = vcombine.low %v596_v45, %v608_v53  ;;  %6988 = vmatprep.subr.bf16.mxu0 %v8998_v31  ;;  %v246_v31 = vld [vmem:[%s11624_s0 + $0x1c8] sm:$0xff]  ;;  %v7722_v45 = vld [vmem:[%s11624_s0 + $0x1b8] sm:$0xff] }
  0xb9   : > { %v1572_v12 = vsel %vm10212_vm0, %v1567_v39, %v1571_v60  ;;  %v10462_v34 = vsel %vm10173_vm12, %v477_v14, %v10385_v44  ;;  %v278_v52 = vmax.bf16 %v262_v33, %v246_v31  ;;  %v9017_v60 = vld [vmem:[%s10019_s7 + $0x1c0] ss:$8 sps:$4 sm:$0xff]   ;;  %v9031_v33 = vld [vmem:[%s10019_s7 + $0x1e4] ss:$8 sps:$4 sm:$0xff]  }
  0xba   : > { %6332 = vmatpush1.bf16.msra.mxu1 %v8993_v10  ;;  %v461_v6 = vor.u32 %v459_v46, %v458_v55  ;;  %v463_v7 = vrot.slane %v458_v55, 4  ;;  %v7703_v10 = vld [vmem:[%s11624_s0 + $0x160] sm:$0xff]  ;;  %6294 = vmatprep.mubr.bf16.mxu1 %v7734_v61  ;;  %v7812_v23 = vcombine.high %v1544_v3, %v1572_v12  ;;  %v7811_v25 = vcombine.low %v1544_v3, %v1572_v12  ;;  %v7724_v46 = vld [vmem:[%s11624_s0 + $0x1f8] sm:$0xff] }
  0xbb   : > { %6333 = vmatprep.subr.bf16.mxu1 %v9001_v15  ;;  %v479_v15 = vrot.slane %v474_v62, 4  ;;  %6295 = vmatmul.mubr.bf16.gmra.mrb[8].mxu1 %v7733_v2  ;;  %624 = vst [vmem:[#allocation2 + $0xc8] sm:$0xff] %v10462_v34  ;;  %v1616_v39 = vshrl.u32 %v10462_v34, 16  ;;  %v1619_v40 = vshll.u32 %v10462_v34, 16  ;;  %v322_v41 = vmax.bf16 %v7719_v19, %v7703_v10  ;;  %v9025_v62 = vld [vmem:[%s10019_s7 + $0x1d4] ss:$8 sps:$4 sm:$0xff]  }
  0xbc   : > { %v617_v30 = vsel %vm10185_vm13, %v463_v7, %v616_v63  ;;  %6989 = vmatpush1.bf16.msra.mxu0 %v8996_v51  ;;  %6941 = vmatprep.mubr.bf16.mxu0 %v7812_v23  ;;  %v327_v63 = vmax.bf16 %v7724_v46, %v7708_v43  ;;  %v9029_v43 = vld [vmem:[%s10019_s7 + $0x1e0] ss:$8 sps:$4 sm:$0xff]   ;;  %v640_v46 = vld [vmem:[#allocation2 + $0xf8] sm:$0x11] }
  0xbd   : > { %618 = vst [vmem:[#allocation2 + $0xb8] sm:$0x11] %v617_v30  ;;  %v629_v35 = vsel %vm10185_vm13, %v479_v15, %v628_v8  ;;  %6990 = vmatprep.subr.bf16.mxu0 %v9004_v59  ;;  %6942 = vmatmul.mubr.bf16.gmra.mrb[4].mxu0 %v7811_v25  ;;  %v1618_v53 = vrot.slane %v1616_v39, 4  ;;  %v1621_v55 = vrot.slane %v1619_v40, 5  ;;  %v338_v56 = vmax.bf16 %v322_v41, %v273_v9  ;;  %v9016_v8 = vld [vmem:[%s10019_s7 + $0xab4] ss:$8 sps:$4 sm:$0xff]  }
  0xbe   : > { %6334 = vmatpush1.bf16.msra.mxu1 %v8999_v28  ;;  %v10445_v28 = vsel %vm10173_vm12, %v461_v6, %v10385_v44  ;;  %630 = vst [vmem:[#allocation2 + $0xd8] sm:$0x11] %v629_v35  ;;  %v325_v59 = vmax.bf16 %v7722_v45, %v7706_v38  ;;  %v9023_v9 = vld [vmem:[%s10019_s7 + $0x1d0] ss:$8 sps:$4 sm:$0xff]   ;;  %v343_v12 = vmax.bf16 %v327_v63, %v278_v52  ;;  %v414_v35 = vrot.slane %v10284_v1, 4 }
  0xbf   : > { %6335 = vmatprep.subr.bf16.mxu1 %v9007_v32  ;;  %v260_v32 = vld [vmem:[%s11624_s0 + $0x198] sm:$0xff]  ;;  %612 = vst [vmem:[#allocation2 + $0xa8] sm:$0xff] %v10445_v28  ;;  %v1588_v36 = vshrl.u32 %v10445_v28, 16  ;;  %v1591_v37 = vshll.u32 %v10445_v28, 16  ;;  %v1622_v2 = vor.u32 %v1621_v55, %v1618_v53  ;;  %v465_v3 = vshrl.u32 %v338_v56, 16 }
  0xc0   : > { %v276_v51 = vmax.bf16 %v260_v32, %v244_v21  ;;  %6991 = vmatpush1.bf16.msra.mxu0 %v9002_v22  ;;  %v468_v6 = vshll.u32 %v338_v56, 16  ;;  %v504_v23 = vshrl.u32 %v343_v12, 16  ;;  %v9014_v25 = vld [vmem:[%s10019_s7 + $0xab0] ss:$8 sps:$4 sm:$0xff]   ;;  %v507_v45 = vshll.u32 %v343_v12, 16 }
  0xc1   : > { %v1590_v49 = vrot.slane %v1588_v36, 4  ;;  %v1593_v50 = vrot.slane %v1591_v37, 5  ;;  %6992 = vmatprep.subr.bf16.mxu0 %v9010_v47  ;;  %v10490_v15 = vrot.slane %v465_v3, 7  ;;  %v9022_v37 = vld [vmem:[%s10019_s7 + $0xac4] ss:$8 sps:$4 sm:$0xff]  }
  0xc2   : > { %6336 = vmatpush1.bf16.msra.mxu1 %v9005_v42  ;;  %v324_v42 = vmax.bf16 %v7721_v20, %v7705_v11  ;;  %v341_v11 = vmax.bf16 %v325_v59, %v276_v51  ;;  %v506_v39 = vrot.slane %v504_v23, 7  ;;  %v9020_v47 = vld [vmem:[%s10019_s7 + $0xac0] ss:$8 sps:$4 sm:$0xff]   ;;  %v652_v52 = vld [vmem:[#allocation2 + $0x118] sm:$0x11] }
  0xc3   : > { %6337 = vmatprep.subr.bf16.mxu1 %v9013_v4  ;;  %v1594_v61 = vor.u32 %v1593_v50, %v1590_v49  ;;  %v398_v4 = vrot.slane %v10167_v17, 4  ;;  %v470_v31 = vor.u32 %v468_v6, %v10490_v15  ;;  %v565_v63 = vld [vmem:[#allocation2 + $0x30] sm:$0x11]  ;;  %v9034_v17 = vld [vmem:[%s10019_s7 + $0xae4] ss:$8 sps:$4 sm:$0xff]  }
  0xc4   : > { %v340_v57 = vmax.bf16 %v324_v42, %v275_v16  ;;  %v488_v21 = vshrl.u32 %v341_v11, 16  ;;  %v491_v22 = vshll.u32 %v341_v11, 16  ;;  %6993 = vmatpush1.bf16.msra.mxu0 %v9008_v58  ;;  %v509_v55 = vor.u32 %v507_v45, %v506_v39  ;;  %v9037_v58 = vld [vmem:[%s10019_s7 + $0x1f4] ss:$8 sps:$4 sm:$0xff]   ;;  %v9026_v23 = vld [vmem:[%s10019_s7 + $0xad0] ss:$8 sps:$4 sm:$0xff]  }
  0xc5   : > { %v1595_v14 = vrot.slane %v1594_v61, 4  ;;  %v1452_v19 = vld [vmem:[#allocation2 + $0xd8] sm:$0x11]  ;;  %6994 = vmatprep.subr.bf16.mxu0 %v9016_v8  ;;  %v620_v41 = vsel %vm10173_vm12, %v470_v31, %v10385_v44  ;;  %v511_v56 = vrot.slane %v506_v39, 4 }
  0xc6   : > { %6338 = vmatpush1.bf16.msra.mxu1 %v9011_v13  ;;  %v481_v7 = vshrl.u32 %v340_v57, 16  ;;  %v484_v10 = vshll.u32 %v340_v57, 16  ;;  %v1448_v13 = vld [vmem:[#allocation2 + $0xb8] sm:$0x11]  ;;  %v1625_v30 = vshll.u32 %v1452_v19, 16  ;;  %v490_v38 = vrot.slane %v488_v21, 7 }
  0xc7   : > { %6339 = vmatprep.subr.bf16.mxu1 %v9019_v26  ;;  %v1597_v20 = vshll.u32 %v1448_v13, 16  ;;  %v1623_v26 = vrot.slane %v1622_v2, 4  ;;  %621 = vst [vmem:[#allocation2 + $0xc0] sm:$0xff] %v620_v41  ;;  %v577_v2 = vld [vmem:[#allocation2 + $0x50] sm:$0x11]  ;;  %v653_v8 = vsel %vm10185_vm13, %v511_v56, %v652_v52  ;;  %v566_v21 = vsel %vm10185_vm13, %v398_v4, %v565_v63 }
  0xc8   : > { %v10492_v16 = vrot.slane %v481_v7, 7  ;;  %v1627_v40 = vrot.slane %v1625_v30, 5  ;;  %v493_v50 = vor.u32 %v491_v22, %v490_v38  ;;  %v495_v51 = vrot.slane %v490_v38, 4  ;;  %6995 = vmatpush1.bf16.msra.mxu0 %v9014_v25  ;;  %v9028_v3 = vld [vmem:[%s10019_s7 + $0xad4] ss:$8 sps:$4 sm:$0xff]  }
  0xc9   : > { %v1599_v36 = vrot.slane %v1597_v20, 5  ;;  %6996 = vmatprep.subr.bf16.mxu0 %v9022_v37  ;;  %v647_v7 = vsel %vm10173_vm12, %v509_v55, %v10385_v44  ;;  %654 = vst [vmem:[#allocation2 + $0x118] sm:$0x11] %v653_v8  ;;  %v9035_v13 = vld [vmem:[%s10019_s7 + $0x1f0] ss:$8 sps:$4 sm:$0xff]   ;;  %v578_v22 = vsel %vm10185_vm13, %v414_v35, %v577_v2 }
  0xca   : > { %6340 = vmatpush1.bf16.msra.mxu1 %v9017_v60  ;;  %v486_v32 = vor.u32 %v484_v10, %v10492_v16  ;;  %v1628_v53 = vsel %vm10212_vm0, %v1623_v26, %v1627_v40  ;;  %v658_v60 = vld [vmem:[#allocation2 + $0x28] sm:$0xff]  ;;  %v10516_v59 = vsel %vm10173_vm12, %v493_v50, %v10385_v44  ;;  %v641_v6 = vsel %vm10185_vm13, %v495_v51, %v640_v46  ;;  %v1765_v35 = vld [vmem:[#allocation2 + $0x20] sm:$0xee]  ;;  %v9040_v38 = vld [vmem:[%s10019_s7 + $0xaf4] ss:$8 sps:$4 sm:$0xff]  }
  0xcb   : > { %6341 = vmatprep.subr.bf16.mxu1 %v9025_v62  ;;  %v1600_v1 = vsel %vm10212_vm0, %v1595_v14, %v1599_v36  ;;  %636 = vst [vmem:[#allocation2 + $0xe8] sm:$0xff] %v10516_v59  ;;  %642 = vst [vmem:[#allocation2 + $0xf8] sm:$0x11] %v641_v6  ;;  %v1647_v10 = vshll.u32 %v10516_v59, 16  ;;  %v1672_v11 = vshrl.u32 %v647_v7, 16  ;;  %v1675_v12 = vshll.u32 %v647_v7, 16 }
  0xcc   : > { %v632_v42 = vsel %vm10173_vm12, %v486_v32, %v10385_v44  ;;  %v7816_v61 = vcombine.high %v1600_v1, %v1628_v53  ;;  %v7815_v62 = vcombine.low %v1600_v1, %v1628_v53  ;;  %648 = vst [vmem:[#allocation2 + $0x108] sm:$0xff] %v647_v7  ;;  %v7728_v14 = vcombine.high %v10385_v44, %v658_v60  ;;  %v9043_v20 = vld [vmem:[%s10019_s7 + $0x204] ss:$8 sps:$4 sm:$0xff]   ;;  %v9041_v4 = vld [vmem:[%s10019_s7 + $0x200] ss:$8 sps:$4 sm:$0xff]  }
  0xcd   : > { %633 = vst [vmem:[#allocation2 + $0xe0] sm:$0xff] %v632_v42  ;;  %v7738_v49 = vcombine.high %v620_v41, %v632_v42  ;;  %v7737_v57 = vcombine.low %v620_v41, %v632_v42  ;;  %6997 = vmatpush1.bf16.msra.mxu0 %v9020_v47  ;;  %v1649_v25 = vrot.slane %v1647_v10, 5  ;;  %v1674_v26 = vrot.slane %v1672_v11, 4  ;;  %567 = vst [vmem:[#allocation2 + $0x30] sm:$0x11] %v566_v21 }
  0xce   : > { %6342 = vmatpush1.bf16.msra.mxu1 %v9023_v9  ;;  %v1644_v9 = vshrl.u32 %v10516_v59, 16  ;;  %6951 = vmatprep.mubr.bf16.mxu0 %v7816_v61  ;;  %v1677_v30 = vrot.slane %v1675_v12, 5  ;;  %579 = vst [vmem:[#allocation2 + $0x50] sm:$0x11] %v578_v22  ;;  %v7727_v31 = vcombine.low %v10385_v44, %v658_v60  ;;  %v9032_v36 = vld [vmem:[%s10019_s7 + $0xae0] ss:$8 sps:$4 sm:$0xff]  }
  0xcf   : > { %6343 = vmatprep.subr.bf16.mxu1 %v9031_v33  ;;  %6304 = vmatprep.mubr.bf16.mxu1 %v7738_v49  ;;  %v1769_v37 = vld [vmem:[#allocation2 + $0x40] sm:$0xee]  ;;  %v9049_v39 = vld [vmem:[%s10019_s7 + $0x214] ss:$8 sps:$4 sm:$0xff]   ;;  %v9047_v40 = vld [vmem:[%s10019_s7 + $0x210] ss:$8 sps:$4 sm:$0xff]  }
  0xd0   : > { %6305 = vmatmul.mubr.bf16.gmra.mrb[12].mxu1 %v7737_v57  ;;  %6952 = vmatmul.mubr.bf16.gmra.mrb[8].mxu0 %v7815_v62  ;;  %v1646_v19 = vrot.slane %v1644_v9, 4  ;;  %v1678_v33 = vor.u32 %v1677_v30, %v1674_v26  ;;  %v1460_v42 = vld [vmem:[#allocation2 + $0x118] sm:$0x11]  ;;  %v7823_v45 = vrot.slane %v1769_v37, 9  ;;  %v9055_v53 = vld [vmem:[%s10019_s7 + $0x224] ss:$8 sps:$4 sm:$0xff]  }
  0xd1   : > { %6347 = vmatprep.mubr.bf16.mxu1 %v7728_v14  ;;  %6998 = vmatprep.subr.bf16.mxu0 %v9028_v3  ;;  %v1681_v49 = vshll.u32 %v1460_v42, 16  ;;  %v9038_v57 = vld [vmem:[%s10019_s7 + $0xaf0] ss:$8 sps:$4 sm:$0xff]   ;;  %v9046_v61 = vld [vmem:[%s10019_s7 + $0xb04] ss:$8 sps:$4 sm:$0xff]   ;;  %v446_v22 = vrot.slane %v10374_v24, 4 }
  0xd2   : > { %6344 = vmatpush1.bf16.msra.mxu1 %v9029_v43  ;;  %v1650_v32 = vor.u32 %v1649_v25, %v1646_v19  ;;  %6999 = vmatpush1.bf16.msra.mxu0 %v9026_v23  ;;  %v1456_v41 = vld [vmem:[#allocation2 + $0xf8] sm:$0x11]  ;;  %v7821_v43 = vrot.slane %v1765_v35, 9  ;;  %v1679_v47 = vrot.slane %v1678_v33, 4  ;;  %v9053_v6 = vld [vmem:[%s10019_s7 + $0x220] ss:$8 sps:$4 sm:$0xff]  }
  0xd3   : > { %6345 = vmatprep.subr.bf16.mxu1 %v9037_v58  ;;  %7000 = vmatprep.subr.bf16.mxu0 %v9034_v17  ;;  %v1653_v1 = vshll.u32 %v1456_v41, 16  ;;  %v1683_v56 = vrot.slane %v1681_v49, 5  ;;  %v9061_v10 = vld [vmem:[%s10019_s7 + $0x234] ss:$8 sps:$4 sm:$0xff]   ;;  %v9059_v11 = vld [vmem:[%s10019_s7 + $0x230] ss:$8 sps:$4 sm:$0xff]  }
  0xd4   : > { %v1651_v46 = vrot.slane %v1650_v32, 4  ;;  %v1767_v51 = vld [vmem:[#allocation2 + $0x30] sm:$0x11]  ;;  %v9067_v12 = vld [vmem:[%s10019_s7 + $0x244] ss:$8 sps:$4 sm:$0xff]   ;;  %v430_v19 = vrot.slane %v10288_v5, 4  ;;  %v7736_v5 = vcombine.high %v10349_v54, %v10445_v28 }
  0xd5   : > { %v1771_v52 = vld [vmem:[#allocation2 + $0x50] sm:$0x11]  ;;  %v1655_v55 = vrot.slane %v1653_v1, 5  ;;  %v1831_v58 = vrot.slane %v1767_v51, 5  ;;  %v1684_v63 = vsel %vm10212_vm0, %v1679_v47, %v1683_v56  ;;  %v9065_v14 = vld [vmem:[%s10019_s7 + $0x240] ss:$8 sps:$4 sm:$0xff]  }
  0xd6   : > { %6346 = vmatpush1.bf16.msra.mxu1 %v9035_v13  ;;  %7001 = vmatpush1.bf16.msra.mxu0 %v9032_v36  ;;  %v1839_v60 = vrot.slane %v1771_v52, 5  ;;  %v9073_v21 = vld [vmem:[%s10019_s7 + $0x254] ss:$8 sps:$4 sm:$0xff]   ;;  %v660_v25 = vld [vmem:[#allocation2 + $0x48] sm:$0xff]  ;;  %v9071_v26 = vld [vmem:[%s10019_s7 + $0x250] ss:$8 sps:$4 sm:$0xff]  }
  0xd7   : > { %6388 = vmatprep.subr.bf16.mxu1 %v9043_v20  ;;  %7002 = vmatprep.subr.bf16.mxu0 %v9040_v38  ;;  %v1656_v62 = vsel %vm10212_vm0, %v1651_v46, %v1655_v55  ;;  %v1832_v2 = vsel %vm10547_vm3, %v7821_v43, %v1831_v58  ;;  %v9044_v20 = vld [vmem:[%s10019_s7 + $0xb00] ss:$8 sps:$4 sm:$0xff]   ;;  %v9052_v23 = vld [vmem:[%s10019_s7 + $0xb14] ss:$8 sps:$4 sm:$0xff]   ;;  %v7732_v30 = vcombine.high %v660_v25, %v10332_v48  ;;  %v9079_v24 = vld [vmem:[%s10019_s7 + $0x264] ss:$8 sps:$4 sm:$0xff]  }
  0xd8   : > { %v1840_v3 = vsel %vm10547_vm3, %v7823_v45, %v1839_v60  ;;  %v7820_v7 = vcombine.high %v1656_v62, %v1684_v63  ;;  %v7819_v8 = vcombine.low %v1656_v62, %v1684_v63  ;;  %v589_v17 = vld [vmem:[#allocation2 + $0x70] sm:$0x11]  ;;  %v9058_v36 = vld [vmem:[%s10019_s7 + $0xb24] ss:$8 sps:$4 sm:$0xff]   ;;  %v462_v35 = vrot.slane %v10378_v29, 4 }
  0xd9   : > { %6348 = vmatmul.mubr.bf16.vlgmr.msra.gmra.mrb[0].mxu1 %v7727_v31  ;;  %v7838_v9 = vcombine.high %v1832_v2, %v1840_v3  ;;  %v7837_v13 = vcombine.low %v1832_v2, %v1840_v3  ;;  %v7731_v31 = vcombine.low %v660_v25, %v10332_v48  ;;  %v590_v32 = vsel %vm10185_vm13, %v430_v19, %v589_v17  ;;  %v601_v33 = vld [vmem:[#allocation2 + $0x90] sm:$0x11]  ;;  %v9056_v37 = vld [vmem:[%s10019_s7 + $0xb20] ss:$8 sps:$4 sm:$0xff]   ;;  %v9091_v49 = vld [vmem:[%s10019_s7 + $0x284] ss:$8 sps:$4 sm:$0xff]  }
  0xda   : > { %6389 = vmatpush1.bf16.msra.mxu1 %v9041_v4  ;;  %7003 = vmatpush1.bf16.msra.mxu0 %v9038_v57  ;;  %v9050_v4 = vld [vmem:[%s10019_s7 + $0xb10] ss:$8 sps:$4 sm:$0xff]   ;;  %591 = vst [vmem:[#allocation2 + $0x70] sm:$0x11] %v590_v32  ;;  %v602_v48 = vsel %vm10185_vm13, %v446_v22, %v601_v33  ;;  %v478_v38 = vrot.slane %v10490_v15, 4  ;;  %v803_v29 = vshrl.u32 %v10385_v44, 16  ;;  %v7735_v15 = vcombine.low %v10349_v54, %v10445_v28 }
  0xdb   : > { %6390 = vmatprep.subr.bf16.mxu1 %v9049_v39  ;;  %6961 = vmatprep.mubr.bf16.mxu0 %v7820_v7  ;;  %603 = vst [vmem:[#allocation2 + $0x90] sm:$0x11] %v602_v48  ;;  %v9064_v39 = vld [vmem:[%s10019_s7 + $0xb34] ss:$8 sps:$4 sm:$0xff]   ;;  %v1773_v42 = vld [vmem:[#allocation2 + $0x60] sm:$0xee]  ;;  %v7740_v55 = vcombine.high %v10462_v34, %v10516_v59 }
  0xdc   : > { %7045 = vmatprep.subr.bf16.mxu0 %v9046_v61  ;;  %6962 = vmatmul.mubr.bf16.gmra.mrb[12].mxu0 %v7819_v8  ;;  %v9085_v41 = vld [vmem:[%s10019_s7 + $0x274] ss:$8 sps:$4 sm:$0xff]   ;;  %v1777_v43 = vld [vmem:[#allocation2 + $0x80] sm:$0xee]  ;;  %v9062_v45 = vld [vmem:[%s10019_s7 + $0xb30] ss:$8 sps:$4 sm:$0xff]  }
  0xdd   : > { %7004 = vmatprep.mubr.bf16.mxu0 %v7838_v9  ;;  %6357 = vmatprep.mubr.bf16.mxu1 %v7732_v30  ;;  %v613_v46 = vld [vmem:[#allocation2 + $0xb0] sm:$0x11]  ;;  %v7825_v51 = vrot.slane %v1773_v42, 9  ;;  %v7827_v54 = vrot.slane %v1777_v43, 9  ;;  %v806_v28 = vshll.u32 %v10385_v44, 16  ;;  %v805_v7 = vrot.slane %v803_v29, 4 }
  0xde   : > { %6391 = vmatpush1.bf16.msra.mxu1 %v9047_v40  ;;  %v9077_v40 = vld [vmem:[%s10019_s7 + $0x260] ss:$8 sps:$4 sm:$0xff]   ;;  %v625_v1 = vld [vmem:[#allocation2 + $0xd0] sm:$0x11]  ;;  %v614_v52 = vsel %vm10185_vm13, %v462_v35, %v613_v46  ;;  %v9070_v57 = vld [vmem:[%s10019_s7 + $0xb44] ss:$8 sps:$4 sm:$0xff]  }
  0xdf   : > { %6392 = vmatprep.subr.bf16.mxu1 %v9055_v53  ;;  %v9083_v47 = vld [vmem:[%s10019_s7 + $0x270] ss:$8 sps:$4 sm:$0xff]   ;;  %v626_v53 = vsel %vm10185_vm13, %v478_v38, %v625_v1  ;;  %615 = vst [vmem:[#allocation2 + $0xb0] sm:$0x11] %v614_v52  ;;  %v9068_v61 = vld [vmem:[%s10019_s7 + $0xb40] ss:$8 sps:$4 sm:$0xff]  }
  0xe0   : > { %627 = vst [vmem:[#allocation2 + $0xd0] sm:$0x11] %v626_v53  ;;  %v9089_v62 = vld [vmem:[%s10019_s7 + $0x280] ss:$8 sps:$4 sm:$0xff]   ;;  %v494_v8 = vrot.slane %v10492_v16, 4  ;;  %v261_v22 = vld [vmem:[%s11624_s0 + $0x1d0] sm:$0xff] }
  0xe1   : > { %6358 = vmatmul.mubr.bf16.gmra.mrb[4].mxu1 %v7731_v31  ;;  %v1775_v56 = vld [vmem:[#allocation2 + $0x70] sm:$0x11]  ;;  %v1781_v3 = vld [vmem:[#allocation2 + $0xa0] sm:$0xee] }
  0xe2   : > { %6393 = vmatpush1.bf16.msra.mxu1 %v9053_v6  ;;  %6367 = vmatprep.mubr.bf16.mxu1 %v7736_v5  ;;  %v1779_v58 = vld [vmem:[#allocation2 + $0x90] sm:$0x11]  ;;  %v1847_v60 = vrot.slane %v1775_v56, 5  ;;  %v1785_v6 = vld [vmem:[#allocation2 + $0xc0] sm:$0xee] }
  0xe3   : > { %6394 = vmatprep.subr.bf16.mxu1 %v9061_v10  ;;  %v1855_v63 = vrot.slane %v1779_v58, 5  ;;  %v9097_v9 = vld [vmem:[%s10019_s7 + $0x294] ss:$8 sps:$4 sm:$0xff]   ;;  %v7831_v16 = vrot.slane %v1785_v6, 9  ;;  %v9103_v32 = vld [vmem:[%s10019_s7 + $0x2a4] ss:$8 sps:$4 sm:$0xff]  }
  0xe4   : > { %7005 = vmatmul.mubr.bf16.vlgmr.msra.gmra.mrb[0].mxu0 %v7837_v13  ;;  %v1848_v2 = vsel %vm10547_vm3, %v7825_v51, %v1847_v60  ;;  %v9095_v13 = vld [vmem:[%s10019_s7 + $0x290] ss:$8 sps:$4 sm:$0xff]   ;;  %v9082_v48 = vld [vmem:[%s10019_s7 + $0xb64] ss:$8 sps:$4 sm:$0xff]   ;;  %v9113_v6 = vld [vmem:[%s10019_s7 + $0x2c0] ss:$8 sps:$4 sm:$0xff]  }
  0xe5   : > { %7046 = vmatpush1.bf16.msra.mxu0 %v9044_v20  ;;  %v1856_v10 = vsel %vm10547_vm3, %v7827_v54, %v1855_v63  ;;  %v245_v20 = vld [vmem:[%s11624_s0 + $0x1c0] sm:$0xff]  ;;  %v7723_v25 = vld [vmem:[%s11624_s0 + $0x1f0] sm:$0xff] }
  0xe6   : > { %6395 = vmatpush1.bf16.msra.mxu1 %v9059_v11  ;;  %7047 = vmatprep.subr.bf16.mxu0 %v9052_v23  ;;  %v808_v11 = vrot.slane %v806_v28, 5  ;;  %v7841_v19 = vcombine.low %v1848_v2, %v1856_v10  ;;  %v7707_v23 = vld [vmem:[%s11624_s0 + $0x1e0] sm:$0xff]  ;;  %v1783_v30 = vld [vmem:[#allocation2 + $0xb0] sm:$0x11]  ;;  %v277_v31 = vmax.bf16 %v261_v22, %v245_v20  ;;  %v1768_v20 = vld [vmem:[#allocation2 + $0x38] sm:$0x11] }
  0xe7   : > { %6396 = vmatprep.subr.bf16.mxu1 %v9067_v12  ;;  %v9076_v12 = vld [vmem:[%s10019_s7 + $0xb54] ss:$8 sps:$4 sm:$0xff]   ;;  %v326_v5 = vmax.bf16 %v7723_v25, %v7707_v23  ;;  %v1863_v33 = vrot.slane %v1783_v30, 5  ;;  %v771_v51 = vld [vmem:[#allocation2 + $0x20] sm:$0xff]  ;;  %v9086_v52 = vld [vmem:[%s10019_s7 + $0xb70] ss:$8 sps:$4 sm:$0xff]  }
  0xe8   : > { %v1787_v17 = vld [vmem:[#allocation2 + $0xd0] sm:$0x11]  ;;  %v831_v56 = vshrl.u32 %v771_v51, 16  ;;  %v834_v54 = vshll.u32 %v771_v51, 16  ;;  %v9118_v51 = vld [vmem:[%s10019_s7 + $0xbc4] ss:$8 sps:$4 sm:$0xff]  }
  0xe9   : > { %7048 = vmatpush1.bf16.msra.mxu0 %v9050_v4  ;;  %6368 = vmatmul.mubr.bf16.gmra.mrb[8].mxu1 %v7735_v15  ;;  %v637_v4 = vld [vmem:[#allocation2 + $0xf0] sm:$0x11]  ;;  %v342_v35 = vmax.bf16 %v326_v5, %v277_v31  ;;  %v1835_v5 = vrot.slane %v1768_v20, 5 }
  0xea   : > { %6397 = vmatpush1.bf16.msra.mxu1 %v9065_v14  ;;  %7049 = vmatprep.subr.bf16.mxu0 %v9058_v36  ;;  %v7842_v14 = vcombine.high %v1848_v2, %v1856_v10  ;;  %v1871_v36 = vrot.slane %v1787_v17, 5  ;;  %v773_v53 = vld [vmem:[#allocation2 + $0x30] sm:$0x11]  ;;  %v833_v63 = vrot.slane %v831_v56, 4  ;;  %v836_v2 = vrot.slane %v834_v54, 5 }
  0xeb   : > { %6398 = vmatprep.subr.bf16.mxu1 %v9073_v21  ;;  %6377 = vmatprep.mubr.bf16.mxu1 %v7740_v55  ;;  %v7829_v21 = vrot.slane %v1781_v3, 9  ;;  %v497_v43 = vshrl.u32 %v342_v35, 16  ;;  %v500_v29 = vshll.u32 %v342_v35, 16  ;;  %v9107_v28 = vld [vmem:[%s10019_s7 + $0x2b0] ss:$8 sps:$4 sm:$0xff]   ;;  %v840_v60 = vshll.u32 %v773_v53, 16 }
  0xec   : > { %7014 = vmatprep.mubr.bf16.mxu0 %v7842_v14  ;;  %v9094_v3 = vld [vmem:[%s10019_s7 + $0xb84] ss:$8 sps:$4 sm:$0xff]   ;;  %v9092_v10 = vld [vmem:[%s10019_s7 + $0xb80] ss:$8 sps:$4 sm:$0xff]   ;;  %v9098_v22 = vld [vmem:[%s10019_s7 + $0xb90] ss:$8 sps:$4 sm:$0xff]  }
  0xed   : > { %7050 = vmatpush1.bf16.msra.mxu0 %v9056_v37  ;;  %v9080_v37 = vld [vmem:[%s10019_s7 + $0xb60] ss:$8 sps:$4 sm:$0xff]   ;;  %v1864_v38 = vsel %vm10547_vm3, %v7829_v21, %v1863_v33  ;;  %v499_v15 = vrot.slane %v497_v43, 7  ;;  %v842_v14 = vrot.slane %v840_v60, 5  ;;  %v9119_v17 = vld [vmem:[%s10019_s7 + $0x2d0] ss:$8 sps:$4 sm:$0xff]  }
  0xee   : > { %6399 = vmatpush1.bf16.msra.mxu1 %v9071_v26  ;;  %7051 = vmatprep.subr.bf16.mxu0 %v9064_v39  ;;  %v7739_v26 = vcombine.low %v10462_v34, %v10516_v59  ;;  %v638_v34 = vsel %vm10185_vm13, %v494_v8, %v637_v4  ;;  %v809_v59 = vor.u32 %v808_v11, %v805_v7  ;;  %v9121_v11 = vld [vmem:[%s10019_s7 + $0x2d4] ss:$8 sps:$4 sm:$0xff]   ;;  %v1770_v21 = vld [vmem:[#allocation2 + $0x48] sm:$0xee]  ;;  %v9155_v20 = vld [vmem:[%s10019_s7 + $0x330] ss:$8 sps:$4 sm:$0xff]  }
  0xef   : > { %6400 = vmatprep.subr.bf16.mxu1 %v9079_v24  ;;  %v9074_v24 = vld [vmem:[%s10019_s7 + $0xb50] ss:$8 sps:$4 sm:$0xff]   ;;  %7015 = vmatmul.mubr.bf16.gmra.mrb[4].mxu0 %v7841_v19  ;;  %639 = vst [vmem:[#allocation2 + $0xf0] sm:$0x11] %v638_v34  ;;  %v1872_v39 = vsel %vm10547_vm3, %v7831_v16, %v1871_v36  ;;  %v510_v58 = vrot.slane %v499_v15, 4  ;;  %v7824_v4 = vrot.slane %v1770_v21, 9 }
  0xf0   : > { %v7846_v42 = vcombine.high %v1864_v38, %v1872_v39  ;;  %v10641_v46 = vrot.slane %v809_v59, 4  ;;  %v7845_v1 = vcombine.low %v1864_v38, %v1872_v39  ;;  %v1766_v19 = vld [vmem:[#allocation2 + $0x28] sm:$0xee]  ;;  %v9100_v16 = vld [vmem:[%s10019_s7 + $0xb94] ss:$8 sps:$4 sm:$0xff]  }
  0xf1   : > { %7052 = vmatpush1.bf16.msra.mxu0 %v9062_v45  ;;  %6378 = vmatmul.mubr.bf16.gmra.mrb[12].mxu1 %v7739_v26  ;;  %v9109_v45 = vld [vmem:[%s10019_s7 + $0x2b4] ss:$8 sps:$4 sm:$0xff]   ;;  %v7822_v30 = vrot.slane %v1766_v19, 9  ;;  %v9106_v33 = vld [vmem:[%s10019_s7 + $0xba4] ss:$8 sps:$4 sm:$0xff]  }
  0xf2   : > { %6401 = vmatpush1.bf16.msra.mxu1 %v9077_v40  ;;  %7053 = vmatprep.subr.bf16.mxu0 %v9070_v57  ;;  %v9088_v40 = vld [vmem:[%s10019_s7 + $0xb74] ss:$8 sps:$4 sm:$0xff]   ;;  %v502_v57 = vor.u32 %v500_v29, %v499_v15  ;;  %v9131_v15 = vld [vmem:[%s10019_s7 + $0x2f0] ss:$8 sps:$4 sm:$0xff]   ;;  %v9137_v53 = vld [vmem:[%s10019_s7 + $0x300] ss:$8 sps:$4 sm:$0xff]  }
  0xf3   : > { %6402 = vmatprep.subr.bf16.mxu1 %v9085_v41  ;;  %v9101_v41 = vld [vmem:[%s10019_s7 + $0x2a0] ss:$8 sps:$4 sm:$0xff]   ;;  %7024 = vmatprep.mubr.bf16.mxu0 %v7846_v42  ;;  %v10670_v38 = vsel %vm10547_vm3, %v7822_v30, %v1835_v5  ;;  %v9133_v42 = vld [vmem:[%s10019_s7 + $0x2f4] ss:$8 sps:$4 sm:$0xff]   ;;  %v9130_v60 = vld [vmem:[%s10019_s7 + $0xbe4] ss:$8 sps:$4 sm:$0xff]  }
  0xf4   : > { %v644_v7 = vsel %vm10173_vm12, %v502_v57, %v10385_v44  ;;  %v1772_v44 = vld [vmem:[#allocation2 + $0x58] sm:$0x11]  ;;  %v9142_v19 = vld [vmem:[%s10019_s7 + $0xc04] ss:$8 sps:$4 sm:$0xff]  }
  0xf5   : > { %7054 = vmatpush1.bf16.msra.mxu0 %v9068_v61  ;;  %v9115_v61 = vld [vmem:[%s10019_s7 + $0x2c4] ss:$8 sps:$4 sm:$0xff]   ;;  %645 = vst [vmem:[#allocation2 + $0x100] sm:$0xff] %v644_v7  ;;  %v9112_v43 = vld [vmem:[%s10019_s7 + $0xbb4] ss:$8 sps:$4 sm:$0xff]  }
  0xf6   : > { %6403 = vmatpush1.bf16.msra.mxu1 %v9083_v47  ;;  %7055 = vmatprep.subr.bf16.mxu0 %v9076_v12  ;;  %v649_v47 = vld [vmem:[#allocation2 + $0x110] sm:$0x11]  ;;  %v10701_v7 = vld [vmem:[#allocation2 + $0x60] sm:$0xff] }
  0xf7   : > { %6404 = vmatprep.subr.bf16.mxu1 %v9091_v49  ;;  %v769_v49 = vld [vmem:[#allocation2 + $0x10] sm:$0x11]  ;;  %7025 = vmatmul.mubr.bf16.gmra.mrb[8].mxu0 %v7845_v1  ;;  %v650_v8 = vsel %vm10185_vm13, %v510_v58, %v649_v47  ;;  %v9151_v58 = vld [vmem:[%s10019_s7 + $0x324] ss:$8 sps:$4 sm:$0xff]  }
  0xf8   : > { %v812_v55 = vshll.u32 %v769_v49, 16  ;;  %651 = vst [vmem:[#allocation2 + $0x110] sm:$0x11] %v650_v8  ;;  %v1791_v12 = vld [vmem:[#allocation2 + $0xf0] sm:$0x11] }
  0xf9   : > { %7056 = vmatpush1.bf16.msra.mxu0 %v9074_v24  ;;  %v1879_v25 = vrot.slane %v1791_v12, 5  ;;  %v1843_v24 = vrot.slane %v1772_v44, 5  ;;  %v9110_v47 = vld [vmem:[%s10019_s7 + $0xbb0] ss:$8 sps:$4 sm:$0xff]   ;;  %v9139_v49 = vld [vmem:[%s10019_s7 + $0x304] ss:$8 sps:$4 sm:$0xff]  }
  0xfa   : > { %6405 = vmatpush1.bf16.msra.mxu1 %v9089_v62  ;;  %7057 = vmatprep.subr.bf16.mxu0 %v9082_v48  ;;  %v814_v62 = vrot.slane %v812_v55, 5  ;;  %v9116_v55 = vld [vmem:[%s10019_s7 + $0xbc0] ss:$8 sps:$4 sm:$0xff]   ;;  %v9145_v56 = vld [vmem:[%s10019_s7 + $0x314] ss:$8 sps:$4 sm:$0xff]  }
  0xfb   : > { %6406 = vmatprep.subr.bf16.mxu1 %v9097_v9  ;;  %v1789_v9 = vld [vmem:[#allocation2 + $0xe0] sm:$0xee]  ;;  %v10674_v39 = vsel %vm10547_vm3, %v7824_v4, %v1843_v24  ;;  %v9124_v54 = vld [vmem:[%s10019_s7 + $0xbd4] ss:$8 sps:$4 sm:$0xff]   ;;  %v9122_v57 = vld [vmem:[%s10019_s7 + $0xbd0] ss:$8 sps:$4 sm:$0xff]  }
  0xfc   : > { %v815_v18 = vsel %vm10212_vm0, %v10641_v46, %v814_v62  ;;  %v7833_v23 = vrot.slane %v1789_v9, 9  ;;  %v1793_v36 = vld [vmem:[#allocation2 + $0x100] sm:$0xee]  ;;  %v7840_v1 = vcombine.high %v10670_v38, %v10674_v39  ;;  %v781_v8 = vld [vmem:[#allocation2 + $0x70] sm:$0x11] }
  0xfd   : > { %7058 = vmatpush1.bf16.msra.mxu0 %v9080_v37  ;;  %v7835_v48 = vrot.slane %v1793_v36, 9  ;;  %v9125_v37 = vld [vmem:[%s10019_s7 + $0x2e0] ss:$8 sps:$4 sm:$0xff]   ;;  %v9163_v21 = vld [vmem:[%s10019_s7 + $0x344] ss:$8 sps:$4 sm:$0xff]  }
  0xfe   : > { %6407 = vmatpush1.bf16.msra.mxu1 %v9095_v13  ;;  %7059 = vmatprep.subr.bf16.mxu0 %v9088_v40  ;;  %v837_v13 = vor.u32 %v836_v2, %v833_v63  ;;  %v1880_v59 = vsel %vm10547_vm3, %v7833_v23, %v1879_v25  ;;  %v9104_v40 = vld [vmem:[%s10019_s7 + $0xba0] ss:$8 sps:$4 sm:$0xff]   ;;  %v9136_v63 = vld [vmem:[%s10019_s7 + $0xbf4] ss:$8 sps:$4 sm:$0xff]  }
  0xff   : > { %6408 = vmatprep.subr.bf16.mxu1 %v9103_v32  ;;  %v9127_v32 = vld [vmem:[%s10019_s7 + $0x2e4] ss:$8 sps:$4 sm:$0xff]   ;;  %v1795_v34 = vld [vmem:[#allocation2 + $0x110] sm:$0x11]  ;;  %v9149_v62 = vld [vmem:[%s10019_s7 + $0x320] ss:$8 sps:$4 sm:$0xff]  }
 0x100   : > { %v838_v27 = vrot.slane %v837_v13, 4  ;;  %v1887_v35 = vrot.slane %v1795_v34, 5  ;;  %v9157_v2 = vld [vmem:[%s10019_s7 + $0x334] ss:$8 sps:$4 sm:$0xff]   ;;  %v887_v13 = vshrl.u32 %v10701_v7, 16  ;;  %v7839_v34 = vcombine.low %v10670_v38, %v10674_v39 }
 0x101   : > { %7060 = vmatpush1.bf16.msra.mxu0 %v9086_v52  ;;  %v9146_v39 = vld [vmem:[%s10019_s7 + $0xc10] ss:$8 sps:$4 sm:$0xff]  }
 0x102   : > { %6409 = vmatpush1.bf16.msra.mxu1 %v9101_v41  ;;  %7061 = vmatprep.subr.bf16.mxu0 %v9094_v3  ;;  %v843_v26 = vsel %vm10212_vm0, %v838_v27, %v842_v14  ;;  %v1888_v41 = vsel %vm10547_vm3, %v7835_v48, %v1887_v35  ;;  %v10699_v3 = vld [vmem:[#allocation2 + $0x40] sm:$0xff]  ;;  %v890_v14 = vshll.u32 %v10701_v7, 16  ;;  %v896_v27 = vshll.u32 %v781_v8, 16 }
 0x103   : > { %6410 = vmatprep.subr.bf16.mxu1 %v9109_v45  ;;  %v7742_v31 = vcombine.high %v815_v18, %v843_v26  ;;  %v7850_v29 = vcombine.high %v1880_v59, %v1888_v41  ;;  %v7849_v45 = vcombine.low %v1880_v59, %v1888_v41  ;;  %v7741_v52 = vcombine.low %v815_v18, %v843_v26  ;;  %v1774_v26 = vld [vmem:[#allocation2 + $0x68] sm:$0xee] }
 0x104   : > { %v859_v9 = vshrl.u32 %v10699_v3, 16  ;;  %v7853_v44 = vcombine.low %v10699_v3, %v10701_v7  ;;  %v889_v23 = vrot.slane %v887_v13, 4  ;;  %v892_v25 = vrot.slane %v890_v14, 5  ;;  %v9140_v59 = vld [vmem:[%s10019_s7 + $0xc00] ss:$8 sps:$4 sm:$0xff]  }
 0x105   : > { %7062 = vmatpush1.bf16.msra.mxu0 %v9092_v10  ;;  %6420 = vmatprep.mubr.bf16.mxu1 %v7742_v31  ;;  %v9134_v10 = vld [vmem:[%s10019_s7 + $0xbf0] ss:$8 sps:$4 sm:$0xff]   ;;  %v898_v30 = vrot.slane %v896_v27, 5  ;;  %v1778_v31 = vld [vmem:[#allocation2 + $0x88] sm:$0xee]  ;;  %v7826_v5 = vrot.slane %v1774_v26, 9 }
 0x106   : > { %6411 = vmatpush1.bf16.msra.mxu1 %v9107_v28  ;;  %7063 = vmatprep.subr.bf16.mxu0 %v9100_v16  ;;  %v9143_v28 = vld [vmem:[%s10019_s7 + $0x310] ss:$8 sps:$4 sm:$0xff]   ;;  %v861_v18 = vrot.slane %v859_v9, 4  ;;  %v893_v24 = vor.u32 %v892_v25, %v889_v23  ;;  %v7828_v36 = vrot.slane %v1778_v31, 9  ;;  %v9161_v48 = vld [vmem:[%s10019_s7 + $0x340] ss:$8 sps:$4 sm:$0xff]  }
 0x107   : > { %6412 = vmatprep.subr.bf16.mxu1 %v9115_v61  ;;  %7034 = vmatprep.mubr.bf16.mxu0 %v7850_v29  ;;  %v9128_v61 = vld [vmem:[%s10019_s7 + $0xbe0] ss:$8 sps:$4 sm:$0xff]   ;;  %v9167_v29 = vld [vmem:[%s10019_s7 + $0x350] ss:$8 sps:$4 sm:$0xff]  }
 0x108   : > { %7035 = vmatmul.mubr.bf16.gmra.mrb[12].mxu0 %v7849_v45  ;;  %v894_v41 = vrot.slane %v893_v24, 4  ;;  %v9175_v45 = vld [vmem:[%s10019_s7 + $0x364] ss:$8 sps:$4 sm:$0xff]   ;;  %v9152_v9 = vld [vmem:[%s10019_s7 + $0xc20] ss:$8 sps:$4 sm:$0xff]  }
 0x109   : > { %7064 = vmatpush1.bf16.msra.mxu0 %v9098_v22  ;;  %7077 = vmatprep.mubr.bf16.mxu0 %v7840_v1  ;;  %v1782_v14 = vld [vmem:[#allocation2 + $0xa8] sm:$0xee]  ;;  %v1788_v27 = vld [vmem:[#allocation2 + $0xd8] sm:$0x11] }
 0x10a   : > { %6413 = vmatpush1.bf16.msra.mxu1 %v9113_v6  ;;  %7065 = vmatprep.subr.bf16.mxu0 %v9106_v33  ;;  %v777_v6 = vld [vmem:[#allocation2 + $0x50] sm:$0x11]  ;;  %v7830_v23 = vrot.slane %v1782_v14, 9  ;;  %v1875_v31 = vrot.slane %v1788_v27, 5 }
 0x10b   : > { %6414 = vmatprep.subr.bf16.mxu1 %v9121_v11  ;;  %v862_v11 = vshll.u32 %v10699_v3, 16  ;;  %v868_v12 = vshll.u32 %v777_v6, 16 }
 0x10d   : > { %7066 = vmatpush1.bf16.msra.mxu0 %v9104_v40  ;;  %v864_v16 = vrot.slane %v862_v11, 5  ;;  %v870_v22 = vrot.slane %v868_v12, 5 }
 0x10e   : > { %6415 = vmatpush1.bf16.msra.mxu1 %v9119_v17  ;;  %7067 = vmatprep.subr.bf16.mxu0 %v9112_v43  ;;  %v1776_v17 = vld [vmem:[#allocation2 + $0x78] sm:$0x11] }
 0x10f   : > { %6416 = vmatprep.subr.bf16.mxu1 %v9127_v32  ;;  %v865_v4 = vor.u32 %v864_v16, %v861_v18  ;;  %v1780_v32 = vld [vmem:[#allocation2 + $0x98] sm:$0x11]  ;;  %v1851_v33 = vrot.slane %v1776_v17, 5  ;;  %v1786_v18 = vld [vmem:[#allocation2 + $0xc8] sm:$0xee] }
 0x110   : > { %v1859_v35 = vrot.slane %v1780_v32, 5  ;;  %v9148_v43 = vld [vmem:[%s10019_s7 + $0xc14] ss:$8 sps:$4 sm:$0xff]   ;;  %v7832_v26 = vrot.slane %v1786_v18, 9  ;;  %v9166_v32 = vld [vmem:[%s10019_s7 + $0xc44] ss:$8 sps:$4 sm:$0xff]  }
 0x111   : > { %7068 = vmatpush1.bf16.msra.mxu0 %v9110_v47  ;;  %v866_v40 = vrot.slane %v865_v4, 4  ;;  %v9181_v16 = vld [vmem:[%s10019_s7 + $0x374] ss:$8 sps:$4 sm:$0xff]  }
 0x112   : > { %6417 = vmatpush1.bf16.msra.mxu1 %v9125_v37  ;;  %7069 = vmatprep.subr.bf16.mxu0 %v9118_v51  ;;  %v9169_v37 = vld [vmem:[%s10019_s7 + $0x354] ss:$8 sps:$4 sm:$0xff]   ;;  %v1860_v38 = vsel %vm10547_vm3, %v7828_v36, %v1859_v35  ;;  %v9187_v36 = vld [vmem:[%s10019_s7 + $0x384] ss:$8 sps:$4 sm:$0xff]  }
 0x113   : > { %6418 = vmatprep.subr.bf16.mxu1 %v9133_v42  ;;  %v10720_v42 = vsel %vm10547_vm3, %v7826_v5, %v1851_v33  ;;  %v871_v1 = vsel %vm10212_vm0, %v866_v40, %v870_v22  ;;  %v785_v51 = vld [vmem:[#allocation2 + $0x90] sm:$0x11] }
 0x114   : > { %v7844_v47 = vcombine.high %v10720_v42, %v1860_v38  ;;  %v9158_v5 = vld [vmem:[%s10019_s7 + $0xc30] ss:$8 sps:$4 sm:$0xff]  }
 0x115   : > { %7070 = vmatpush1.bf16.msra.mxu0 %v9116_v55  ;;  %v10735_v55 = vld [vmem:[#allocation2 + $0xa0] sm:$0xff]  ;;  %v9179_v33 = vld [vmem:[%s10019_s7 + $0x370] ss:$8 sps:$4 sm:$0xff]  }
 0x116   : > { %6419 = vmatpush1.bf16.msra.mxu1 %v9131_v15  ;;  %7071 = vmatprep.subr.bf16.mxu0 %v9124_v54  ;;  %v899_v15 = vsel %vm10212_vm0, %v894_v41, %v898_v30  ;;  %v9160_v30 = vld [vmem:[%s10019_s7 + $0xc34] ss:$8 sps:$4 sm:$0xff]   ;;  %v10763_v41 = vld [vmem:[#allocation2 + $0xe0] sm:$0xff] }
 0x117   : > { %6461 = vmatprep.subr.bf16.mxu1 %v9139_v49  ;;  %v10733_v49 = vld [vmem:[#allocation2 + $0x80] sm:$0xff]  ;;  %v793_v40 = vld [vmem:[#allocation2 + $0xd0] sm:$0x11] }
 0x118   : > { %v915_v54 = vshrl.u32 %v10733_v49, 16  ;;  %v7857_v8 = vcombine.low %v10733_v49, %v10735_v55 }
 0x119   : > { %6421 = vmatmul.mubr.bf16.vlgmr.msra.gmra.mrb[0].mxu1 %v7741_v52  ;;  %7072 = vmatpush1.bf16.msra.mxu0 %v9122_v57  ;;  %v7746_v52 = vcombine.high %v871_v1, %v899_v15  ;;  %v924_v57 = vshll.u32 %v785_v51, 16  ;;  %v1002_v51 = vshll.u32 %v10763_v41, 16 }
 0x11a   : > { %6462 = vmatpush1.bf16.msra.mxu1 %v9137_v53  ;;  %7073 = vmatprep.subr.bf16.mxu0 %v9130_v60  ;;  %v7745_v53 = vcombine.low %v871_v1, %v899_v15  ;;  %v946_v60 = vshll.u32 %v10735_v55, 16  ;;  %v9185_v1 = vld [vmem:[%s10019_s7 + $0x380] ss:$8 sps:$4 sm:$0xff]   ;;  %v980_v15 = vshll.u32 %v793_v40, 16  ;;  %v9205_v40 = vld [vmem:[%s10019_s7 + $0x3b4] ss:$8 sps:$4 sm:$0xff]  }
 0x11b   : > { %6463 = vmatprep.subr.bf16.mxu1 %v9145_v56  ;;  %v789_v56 = vld [vmem:[#allocation2 + $0xb0] sm:$0x11]  ;;  %6430 = vmatprep.mubr.bf16.mxu1 %v7746_v52 }
 0x11c   : > { %v948_v12 = vrot.slane %v946_v60, 5 }
 0x11d   : > { %7074 = vmatpush1.bf16.msra.mxu0 %v9128_v61  ;;  %v952_v61 = vshll.u32 %v789_v56, 16  ;;  %v9193_v56 = vld [vmem:[%s10019_s7 + $0x394] ss:$8 sps:$4 sm:$0xff]  }
 0x11e   : > { %6464 = vmatpush1.bf16.msra.mxu1 %v9143_v28  ;;  %7075 = vmatprep.subr.bf16.mxu0 %v9136_v63  ;;  %v918_v28 = vshll.u32 %v10733_v49, 16  ;;  %v9173_v63 = vld [vmem:[%s10019_s7 + $0x360] ss:$8 sps:$4 sm:$0xff]  }
 0x11f   : > { %6465 = vmatprep.subr.bf16.mxu1 %v9151_v58  ;;  %v943_v58 = vshrl.u32 %v10735_v55, 16  ;;  %v954_v13 = vrot.slane %v952_v61, 5  ;;  %v982_v61 = vrot.slane %v980_v15, 5  ;;  %v9203_v15 = vld [vmem:[%s10019_s7 + $0x3b0] ss:$8 sps:$4 sm:$0xff]  }
 0x120   : > { %v920_v6 = vrot.slane %v918_v28, 5 }
 0x121   : > { %7076 = vmatpush1.bf16.msra.mxu0 %v9134_v10  ;;  %6431 = vmatmul.mubr.bf16.gmra.mrb[4].mxu1 %v7745_v53  ;;  %v926_v10 = vrot.slane %v924_v57, 5  ;;  %v945_v11 = vrot.slane %v943_v58, 4  ;;  %v9172_v53 = vld [vmem:[%s10019_s7 + $0xc54] ss:$8 sps:$4 sm:$0xff]   ;;  %v1790_v58 = vld [vmem:[#allocation2 + $0xe8] sm:$0xee] }
 0x122   : > { %6466 = vmatpush1.bf16.msra.mxu1 %v9149_v62  ;;  %7118 = vmatprep.subr.bf16.mxu0 %v9142_v19  ;;  %v9154_v62 = vld [vmem:[%s10019_s7 + $0xc24] ss:$8 sps:$4 sm:$0xff]   ;;  %v7843_v19 = vcombine.low %v10720_v42, %v1860_v38 }
 0x123   : > { %6467 = vmatprep.subr.bf16.mxu1 %v9157_v2  ;;  %v917_v2 = vrot.slane %v915_v54, 4  ;;  %v949_v22 = vor.u32 %v948_v12, %v945_v11  ;;  %v7834_v11 = vrot.slane %v1790_v58, 9  ;;  %v9188_v58 = vld [vmem:[%s10019_s7 + $0xc80] ss:$8 sps:$4 sm:$0xff]  }
 0x124   : > { %7078 = vmatmul.mubr.bf16.vlgmr.msra.gmra.mrb[0].mxu0 %v7839_v34 }
 0x125   : > { %7119 = vmatpush1.bf16.msra.mxu0 %v9140_v59  ;;  %7087 = vmatprep.mubr.bf16.mxu0 %v7844_v47  ;;  %v950_v4 = vrot.slane %v949_v22, 4  ;;  %v1876_v59 = vsel %vm10547_vm3, %v7832_v26, %v1875_v31  ;;  %v999_v47 = vshrl.u32 %v10763_v41, 16  ;;  %v9199_v22 = vld [vmem:[%s10019_s7 + $0x3a4] ss:$8 sps:$4 sm:$0xff]   ;;  %v9176_v31 = vld [vmem:[%s10019_s7 + $0xc60] ss:$8 sps:$4 sm:$0xff]  }
 0x126   : > { %6468 = vmatpush1.bf16.msra.mxu1 %v9155_v20  ;;  %7120 = vmatprep.subr.bf16.mxu0 %v9148_v43  ;;  %v921_v20 = vor.u32 %v920_v6, %v917_v2  ;;  %v1792_v2 = vld [vmem:[#allocation2 + $0xf8] sm:$0x11]  ;;  %v9178_v26 = vld [vmem:[%s10019_s7 + $0xc64] ss:$8 sps:$4 sm:$0xff]  }
 0x127   : > { %6469 = vmatprep.subr.bf16.mxu1 %v9163_v21  ;;  %v1784_v21 = vld [vmem:[#allocation2 + $0xb8] sm:$0x11]  ;;  %v1883_v12 = vrot.slane %v1792_v2, 5 }
 0x128   : > { %v1867_v25 = vrot.slane %v1784_v21, 5  ;;  %v922_v17 = vrot.slane %v921_v20, 4  ;;  %v9191_v21 = vld [vmem:[%s10019_s7 + $0x390] ss:$8 sps:$4 sm:$0xff]  }
 0x129   : > { %7121 = vmatpush1.bf16.msra.mxu0 %v9146_v39  ;;  %v1884_v27 = vsel %vm10547_vm3, %v7834_v11, %v1883_v12  ;;  %v9221_v11 = vld [vmem:[%s10019_s7 + $0x3e0] ss:$8 sps:$4 sm:$0xff]  }
 0x12a   : > { %6470 = vmatpush1.bf16.msra.mxu1 %v9161_v48  ;;  %7122 = vmatprep.subr.bf16.mxu0 %v9154_v62  ;;  %v1868_v24 = vsel %vm10547_vm3, %v7830_v23, %v1867_v25  ;;  %v927_v34 = vsel %vm10212_vm0, %v922_v17, %v926_v10  ;;  %v955_v48 = vsel %vm10212_vm0, %v950_v4, %v954_v13  ;;  %v1001_v62 = vrot.slane %v999_v47, 4  ;;  %v1796_v10 = vld [vmem:[#allocation2 + $0x118] sm:$0x11]  ;;  %v9200_v12 = vld [vmem:[%s10019_s7 + $0xca0] ss:$8 sps:$4 sm:$0xff]  }
 0x12b   : > { %6471 = vmatprep.subr.bf16.mxu1 %v9169_v37  ;;  %v7848_v35 = vcombine.high %v1868_v24, %v1876_v59  ;;  %v10761_v37 = vld [vmem:[#allocation2 + $0xc0] sm:$0xff]  ;;  %v7750_v42 = vcombine.high %v927_v34, %v955_v48  ;;  %v7749_v43 = vcombine.low %v927_v34, %v955_v48  ;;  %v7847_v54 = vcombine.low %v1868_v24, %v1876_v59  ;;  %v770_v24 = vld [vmem:[#allocation2 + $0x18] sm:$0x11] }
 0x12c   : > { %7088 = vmatmul.mubr.bf16.gmra.mrb[4].mxu0 %v7843_v19  ;;  %v971_v38 = vshrl.u32 %v10761_v37, 16  ;;  %v974_v39 = vshll.u32 %v10761_v37, 16  ;;  %v7861_v60 = vcombine.low %v10761_v37, %v10763_v41  ;;  %v1891_v20 = vrot.slane %v1796_v10, 5  ;;  %v9182_v47 = vld [vmem:[%s10019_s7 + $0xc70] ss:$8 sps:$4 sm:$0xff]  }
 0x12d   : > { %7123 = vmatpush1.bf16.msra.mxu0 %v9152_v9  ;;  %7097 = vmatprep.mubr.bf16.mxu0 %v7848_v35  ;;  %v1794_v9 = vld [vmem:[#allocation2 + $0x108] sm:$0xee]  ;;  %v826_v48 = vshll.u32 %v770_v24, 16 }
 0x12e   : > { %6472 = vmatpush1.bf16.msra.mxu1 %v9167_v29  ;;  %7124 = vmatprep.subr.bf16.mxu0 %v9160_v30  ;;  %v797_v29 = vld [vmem:[#allocation2 + $0xf0] sm:$0x11]  ;;  %v973_v28 = vrot.slane %v971_v38, 4  ;;  %v976_v57 = vrot.slane %v974_v39, 5  ;;  %v7836_v19 = vrot.slane %v1794_v9, 9  ;;  %v7854_v39 = vcombine.high %v10699_v3, %v10701_v7 }
 0x12f   : > { %6473 = vmatprep.subr.bf16.mxu1 %v9175_v45  ;;  %v9164_v45 = vld [vmem:[%s10019_s7 + $0xc40] ss:$8 sps:$4 sm:$0xff]   ;;  %v1008_v52 = vshll.u32 %v797_v29, 16  ;;  %6440 = vmatprep.mubr.bf16.mxu1 %v7750_v42  ;;  %v9184_v29 = vld [vmem:[%s10019_s7 + $0xc74] ss:$8 sps:$4 sm:$0xff]  }
 0x130   : > { %6441 = vmatmul.mubr.bf16.gmra.mrb[8].mxu1 %v7749_v43  ;;  %v977_v6 = vor.u32 %v976_v57, %v973_v28  ;;  %v1892_v25 = vsel %vm10547_vm3, %v7836_v19, %v1891_v20  ;;  %v9209_v57 = vld [vmem:[%s10019_s7 + $0x3c0] ss:$8 sps:$4 sm:$0xff]   ;;  %v9223_v9 = vld [vmem:[%s10019_s7 + $0x3e4] ss:$8 sps:$4 sm:$0xff]   ;;  %v9227_v19 = vld [vmem:[%s10019_s7 + $0x3f0] ss:$8 sps:$4 sm:$0xff]  }
 0x131   : > { %7125 = vmatpush1.bf16.msra.mxu0 %v9158_v5  ;;  %v1010_v14 = vrot.slane %v1008_v52, 5  ;;  %v7852_v17 = vcombine.high %v1884_v27, %v1892_v25  ;;  %v7851_v4 = vcombine.low %v1884_v27, %v1892_v25  ;;  %v9202_v10 = vld [vmem:[%s10019_s7 + $0xca4] ss:$8 sps:$4 sm:$0xff]   ;;  %v9206_v20 = vld [vmem:[%s10019_s7 + $0xcb0] ss:$8 sps:$4 sm:$0xff]  }
 0x132   : > { %6474 = vmatpush1.bf16.msra.mxu1 %v9173_v63  ;;  %v1004_v63 = vrot.slane %v1002_v51, 5  ;;  %7126 = vmatprep.subr.bf16.mxu0 %v9166_v32  ;;  %v978_v18 = vrot.slane %v977_v6, 4  ;;  %v772_v32 = vld [vmem:[#allocation2 + $0x28] sm:$0xff]  ;;  %v9194_v6 = vld [vmem:[%s10019_s7 + $0xc90] ss:$8 sps:$4 sm:$0xff]  }
 0x133   : > { %6475 = vmatprep.subr.bf16.mxu1 %v9181_v16  ;;  %v9170_v16 = vld [vmem:[%s10019_s7 + $0xc50] ss:$8 sps:$4 sm:$0xff]   ;;  %v845_v35 = vshrl.u32 %v772_v32, 16  ;;  %v848_v42 = vshll.u32 %v772_v32, 16  ;;  %v9211_v51 = vld [vmem:[%s10019_s7 + $0x3c4] ss:$8 sps:$4 sm:$0xff]  }
 0x134   : > { %v1005_v13 = vor.u32 %v1004_v63, %v1001_v62  ;;  %7098 = vmatmul.mubr.bf16.gmra.mrb[8].mxu0 %v7847_v54  ;;  %v983_v30 = vsel %vm10212_vm0, %v978_v18, %v982_v61  ;;  %v9217_v61 = vld [vmem:[%s10019_s7 + $0x3d4] ss:$8 sps:$4 sm:$0xff]   ;;  %v9214_v18 = vld [vmem:[%s10019_s7 + $0xcc4] ss:$8 sps:$4 sm:$0xff]  }
 0x135   : > { %7127 = vmatpush1.bf16.msra.mxu0 %v9164_v45  ;;  %7107 = vmatprep.mubr.bf16.mxu0 %v7852_v17  ;;  %v847_v38 = vrot.slane %v845_v35, 4  ;;  %v828_v45 = vrot.slane %v826_v48, 5  ;;  %v9196_v63 = vld [vmem:[%s10019_s7 + $0xc94] ss:$8 sps:$4 sm:$0xff]   ;;  %v10824_v17 = vld [vmem:[#allocation2 + $0x48] sm:$0xff] }
 0x136   : > { %6476 = vmatpush1.bf16.msra.mxu1 %v9179_v33  ;;  %v1006_v23 = vrot.slane %v1005_v13, 4  ;;  %7128 = vmatprep.subr.bf16.mxu0 %v9172_v53  ;;  %v774_v33 = vld [vmem:[#allocation2 + $0x38] sm:$0x11]  ;;  %v873_v24 = vshrl.u32 %v10824_v17, 16  ;;  %v876_v32 = vshll.u32 %v10824_v17, 16 }
 0x137   : > { %6477 = vmatprep.subr.bf16.mxu1 %v9187_v36  ;;  %v9197_v36 = vld [vmem:[%s10019_s7 + $0x3a0] ss:$8 sps:$4 sm:$0xff]   ;;  %v854_v43 = vshll.u32 %v774_v33, 16  ;;  %v829_v54 = vsel %vm10212_vm0, %v10641_v46, %v828_v45  ;;  %v9215_v46 = vld [vmem:[%s10019_s7 + $0x3d0] ss:$8 sps:$4 sm:$0xff]  }
 0x138   : > { %v1011_v5 = vsel %vm10212_vm0, %v1006_v23, %v1010_v14  ;;  %v9229_v13 = vld [vmem:[%s10019_s7 + $0x3f4] ss:$8 sps:$4 sm:$0xff]  }
 0x139   : > { %v7754_v34 = vcombine.high %v983_v30, %v1011_v5  ;;  %v7753_v59 = vcombine.low %v983_v30, %v1011_v5  ;;  %7129 = vmatpush1.bf16.msra.mxu0 %v9170_v16  ;;  %v856_v53 = vrot.slane %v854_v43, 5  ;;  %v9208_v14 = vld [vmem:[%s10019_s7 + $0xcb4] ss:$8 sps:$4 sm:$0xff]   ;;  %v9233_v16 = vld [vmem:[%s10019_s7 + $0x400] ss:$8 sps:$4 sm:$0xff]   ;;  %v878_v43 = vrot.slane %v876_v32, 5 }
 0x13a   : > { %6478 = vmatpush1.bf16.msra.mxu1 %v9185_v1  ;;  %7130 = vmatprep.subr.bf16.mxu0 %v9178_v26  ;;  %v850_v1 = vrot.slane %v848_v42, 5  ;;  %v9241_v23 = vld [vmem:[%s10019_s7 + $0x414] ss:$8 sps:$4 sm:$0xff]   ;;  %v9239_v26 = vld [vmem:[%s10019_s7 + $0x410] ss:$8 sps:$4 sm:$0xff]   ;;  %v10826_v5 = vld [vmem:[#allocation2 + $0x68] sm:$0xff] }
 0x13b   : > { %6479 = vmatprep.subr.bf16.mxu1 %v9193_v56  ;;  %6450 = vmatprep.mubr.bf16.mxu1 %v7754_v34  ;;  %v9190_v56 = vld [vmem:[%s10019_s7 + $0xc84] ss:$8 sps:$4 sm:$0xff]   ;;  %v9220_v25 = vld [vmem:[%s10019_s7 + $0xcd4] ss:$8 sps:$4 sm:$0xff]   ;;  %v9218_v30 = vld [vmem:[%s10019_s7 + $0xcd0] ss:$8 sps:$4 sm:$0xff]   ;;  %v7855_v35 = vcombine.low %v10824_v17, %v10826_v5 }
 0x13c   : > { %6451 = vmatmul.mubr.bf16.gmra.mrb[12].mxu1 %v7753_v59  ;;  %7108 = vmatmul.mubr.bf16.gmra.mrb[12].mxu0 %v7851_v4  ;;  %v851_v52 = vor.u32 %v850_v1, %v847_v38  ;;  %v782_v4 = vld [vmem:[#allocation2 + $0x78] sm:$0x11]  ;;  %v9247_v34 = vld [vmem:[%s10019_s7 + $0x424] ss:$8 sps:$4 sm:$0xff]   ;;  %v904_v59 = vshll.u32 %v10826_v5, 16  ;;  %v875_v42 = vrot.slane %v873_v24, 4 }
 0x13d   : > { %7131 = vmatpush1.bf16.msra.mxu0 %v9176_v31  ;;  %7150 = vmatprep.mubr.bf16.mxu0 %v7854_v39  ;;  %v778_v31 = vld [vmem:[#allocation2 + $0x58] sm:$0x11]  ;;  %v910_v48 = vshll.u32 %v782_v4, 16  ;;  %v9245_v39 = vld [vmem:[%s10019_s7 + $0x420] ss:$8 sps:$4 sm:$0xff]  }
 0x13e   : > { %6480 = vmatpush1.bf16.msra.mxu1 %v9191_v21  ;;  %7132 = vmatprep.subr.bf16.mxu0 %v9184_v29  ;;  %v852_v28 = vrot.slane %v851_v52, 4  ;;  %v9235_v21 = vld [vmem:[%s10019_s7 + $0x404] ss:$8 sps:$4 sm:$0xff]   ;;  %v882_v33 = vshll.u32 %v778_v31, 16  ;;  %v906_v38 = vrot.slane %v904_v59, 5  ;;  %v879_v45 = vor.u32 %v878_v43, %v875_v42 }
 0x13f   : > { %6481 = vmatprep.subr.bf16.mxu1 %v9199_v22  ;;  %v9212_v22 = vld [vmem:[%s10019_s7 + $0xcc0] ss:$8 sps:$4 sm:$0xff]   ;;  %v912_v52 = vrot.slane %v910_v48, 5  ;;  %v9265_v24 = vld [vmem:[%s10019_s7 + $0x454] ss:$8 sps:$4 sm:$0xff]   ;;  %v7858_v59 = vcombine.high %v10733_v49, %v10735_v55 }
 0x140   : > { %v857_v62 = vsel %vm10212_vm0, %v852_v28, %v856_v53  ;;  %v884_v1 = vrot.slane %v882_v33, 5  ;;  %v9232_v53 = vld [vmem:[%s10019_s7 + $0xcf4] ss:$8 sps:$4 sm:$0xff]   ;;  %v9230_v28 = vld [vmem:[%s10019_s7 + $0xcf0] ss:$8 sps:$4 sm:$0xff]   ;;  %v10868_v43 = vld [vmem:[#allocation2 + $0xc8] sm:$0xff] }
 0x141   : > { %7133 = vmatpush1.bf16.msra.mxu0 %v9182_v47  ;;  %v7744_v2 = vcombine.high %v829_v54, %v857_v62  ;;  %v7743_v27 = vcombine.low %v829_v54, %v857_v62  ;;  %v9253_v47 = vld [vmem:[%s10019_s7 + $0x434] ss:$8 sps:$4 sm:$0xff]   ;;  %v880_v54 = vrot.slane %v879_v45, 4  ;;  %v10844_v62 = vld [vmem:[#allocation2 + $0xa8] sm:$0xff] }
 0x142   : > { %6482 = vmatpush1.bf16.msra.mxu1 %v9197_v36  ;;  %7134 = vmatprep.subr.bf16.mxu0 %v9190_v56  ;;  %v901_v36 = vshrl.u32 %v10826_v5, 16  ;;  %v9251_v56 = vld [vmem:[%s10019_s7 + $0x430] ss:$8 sps:$4 sm:$0xff]   ;;  %v9236_v4 = vld [vmem:[%s10019_s7 + $0xd00] ss:$8 sps:$4 sm:$0xff]  }
 0x143   : > { %6483 = vmatprep.subr.bf16.mxu1 %v9205_v40  ;;  %6493 = vmatprep.mubr.bf16.mxu1 %v7744_v2  ;;  %v9226_v40 = vld [vmem:[%s10019_s7 + $0xce4] ss:$8 sps:$4 sm:$0xff]   ;;  %v790_v2 = vld [vmem:[#allocation2 + $0xb8] sm:$0x11] }
 0x144   : > { %v903_v29 = vrot.slane %v901_v36, 4  ;;  %v9244_v36 = vld [vmem:[%s10019_s7 + $0xd14] ss:$8 sps:$4 sm:$0xff]   ;;  %v9262_v49 = vld [vmem:[%s10019_s7 + $0xd44] ss:$8 sps:$4 sm:$0xff]  }
 0x145   : > { %7135 = vmatpush1.bf16.msra.mxu0 %v9188_v58  ;;  %v10842_v58 = vld [vmem:[#allocation2 + $0x88] sm:$0xff]  ;;  %v798_v45 = vld [vmem:[#allocation2 + $0xf8] sm:$0x11] }
 0x146   : > { %6484 = vmatpush1.bf16.msra.mxu1 %v9203_v15  ;;  %7136 = vmatprep.subr.bf16.mxu0 %v9196_v63  ;;  %v9224_v15 = vld [vmem:[%s10019_s7 + $0xce0] ss:$8 sps:$4 sm:$0xff]   ;;  %v885_v63 = vsel %vm10212_vm0, %v880_v54, %v884_v1  ;;  %v7859_v31 = vcombine.low %v10842_v58, %v10844_v62  ;;  %v985_v1 = vshrl.u32 %v10868_v43, 16 }
 0x147   : > { %6485 = vmatprep.subr.bf16.mxu1 %v9211_v51  ;;  %v907_v51 = vor.u32 %v906_v38, %v903_v29  ;;  %v794_v29 = vld [vmem:[#allocation2 + $0xd8] sm:$0x11]  ;;  %v10870_v38 = vld [vmem:[#allocation2 + $0xe8] sm:$0xff] }
 0x148   : > { %v1013_v3 = vshrl.u32 %v10870_v38, 16  ;;  %v1016_v7 = vshll.u32 %v10870_v38, 16 }
 0x149   : > { %7137 = vmatpush1.bf16.msra.mxu0 %v9194_v6  ;;  %v932_v6 = vshll.u32 %v10842_v58, 16 }
 0x14a   : > { %6486 = vmatpush1.bf16.msra.mxu1 %v9209_v57  ;;  %7138 = vmatprep.subr.bf16.mxu0 %v9202_v10  ;;  %v908_v57 = vrot.slane %v907_v51, 4  ;;  %v9259_v10 = vld [vmem:[%s10019_s7 + $0x444] ss:$8 sps:$4 sm:$0xff]  }
 0x14b   : > { %6487 = vmatprep.subr.bf16.mxu1 %v9217_v61  ;;  %v786_v61 = vld [vmem:[#allocation2 + $0x98] sm:$0x11]  ;;  %v9271_v51 = vld [vmem:[%s10019_s7 + $0x464] ss:$8 sps:$4 sm:$0xff]  }
 0x14d   : > { %7139 = vmatpush1.bf16.msra.mxu0 %v9200_v12  ;;  %v957_v12 = vshrl.u32 %v10844_v62, 16 }
 0x14e   : > { %6488 = vmatpush1.bf16.msra.mxu1 %v9215_v46  ;;  %7140 = vmatprep.subr.bf16.mxu0 %v9208_v14  ;;  %v929_v46 = vshrl.u32 %v10842_v58, 16  ;;  %v966_v14 = vshll.u32 %v790_v2, 16  ;;  %v9269_v2 = vld [vmem:[%s10019_s7 + $0x460] ss:$8 sps:$4 sm:$0xff]  }
 0x14f   : > { %6489 = vmatprep.subr.bf16.mxu1 %v9223_v9  ;;  %v938_v9 = vshll.u32 %v786_v61, 16  ;;  %v1015_v61 = vrot.slane %v1013_v3, 4  ;;  %v9266_v3 = vld [vmem:[%s10019_s7 + $0xd50] ss:$8 sps:$4 sm:$0xff]  }
 0x150   : > { %v968_v33 = vrot.slane %v966_v14, 5  ;;  %v7863_v14 = vcombine.low %v10868_v43, %v10870_v38 }
 0x151   : > { %7141 = vmatpush1.bf16.msra.mxu0 %v9206_v20 }
 0x152   : > { %6490 = vmatpush1.bf16.msra.mxu1 %v9221_v11  ;;  %7142 = vmatprep.subr.bf16.mxu0 %v9214_v18  ;;  %v913_v11 = vsel %vm10212_vm0, %v908_v57, %v912_v52  ;;  %v931_v18 = vrot.slane %v929_v46, 4 }
 0x153   : > { %6491 = vmatprep.subr.bf16.mxu1 %v9229_v13  ;;  %v960_v13 = vshll.u32 %v10844_v62, 16  ;;  %v7748_v20 = vcombine.high %v885_v63, %v913_v11 }
 0x155   : > { %7143 = vmatpush1.bf16.msra.mxu0 %v9212_v22  ;;  %v962_v22 = vrot.slane %v960_v13, 5  ;;  %v7864_v13 = vcombine.high %v10868_v43, %v10870_v38 }
 0x156   : > { %6492 = vmatpush1.bf16.msra.mxu1 %v9227_v19  ;;  %7144 = vmatprep.subr.bf16.mxu0 %v9220_v25  ;;  %v9238_v19 = vld [vmem:[%s10019_s7 + $0xd04] ss:$8 sps:$4 sm:$0xff]  }
 0x157   : > { %6534 = vmatprep.subr.bf16.mxu1 %v9235_v21  ;;  %v7747_v21 = vcombine.low %v885_v63, %v913_v11  ;;  %v1018_v63 = vrot.slane %v1016_v7, 5  ;;  %v9295_v7 = vld [vmem:[%s10019_s7 + $0x4a4] ss:$8 sps:$4 sm:$0xff]  }
 0x159   : > { %6494 = vmatmul.mubr.bf16.vlgmr.msra.gmra.mrb[0].mxu1 %v7743_v27  ;;  %7145 = vmatpush1.bf16.msra.mxu0 %v9218_v30  ;;  %v934_v27 = vrot.slane %v932_v6, 5  ;;  %v7860_v30 = vcombine.high %v10842_v58, %v10844_v62  ;;  %v1019_v11 = vor.u32 %v1018_v63, %v1015_v61  ;;  %v9307_v61 = vld [vmem:[%s10019_s7 + $0x4c4] ss:$8 sps:$4 sm:$0xff]  }
 0x15a   : > { %6535 = vmatpush1.bf16.msra.mxu1 %v9233_v16  ;;  %7146 = vmatprep.subr.bf16.mxu0 %v9226_v40  ;;  %v959_v16 = vrot.slane %v957_v12, 4  ;;  %v9242_v40 = vld [vmem:[%s10019_s7 + $0xd10] ss:$8 sps:$4 sm:$0xff]   ;;  %v9286_v63 = vld [vmem:[%s10019_s7 + $0xd84] ss:$8 sps:$4 sm:$0xff]  }
 0x15b   : > { %6536 = vmatprep.subr.bf16.mxu1 %v9241_v23  ;;  %v9257_v23 = vld [vmem:[%s10019_s7 + $0x440] ss:$8 sps:$4 sm:$0xff]   ;;  %6503 = vmatprep.mubr.bf16.mxu1 %v7748_v20  ;;  %v935_v25 = vor.u32 %v934_v27, %v931_v18  ;;  %v9275_v20 = vld [vmem:[%s10019_s7 + $0x470] ss:$8 sps:$4 sm:$0xff]  }
 0x15c   : > { %v963_v32 = vor.u32 %v962_v22, %v959_v16  ;;  %v9254_v27 = vld [vmem:[%s10019_s7 + $0xd30] ss:$8 sps:$4 sm:$0xff]   ;;  %v1020_v16 = vrot.slane %v1019_v11, 4  ;;  %v1106_v22 = vld [vmem:[#allocation2] sm:$0xee] }
 0x15d   : > { %7147 = vmatpush1.bf16.msra.mxu0 %v9224_v15  ;;  %v936_v48 = vrot.slane %v935_v25, 4  ;;  %v988_v15 = vshll.u32 %v10868_v43, 16  ;;  %v9290_v11 = vld [vmem:[%s10019_s7 + $0xd90] ss:$8 sps:$4 sm:$0xff]   ;;  %v9389_v43 = vld [vmem:[%s10019_s7 + $0x5a0] ss:$8 sps:$4 sm:$0xff]  }
 0x15e   : > { %6537 = vmatpush1.bf16.msra.mxu1 %v9239_v26  ;;  %7148 = vmatprep.subr.bf16.mxu0 %v9232_v53  ;;  %v940_v26 = vrot.slane %v938_v9, 5  ;;  %v964_v42 = vrot.slane %v963_v32, 4  ;;  %v9250_v53 = vld [vmem:[%s10019_s7 + $0xd24] ss:$8 sps:$4 sm:$0xff]   ;;  %v9248_v9 = vld [vmem:[%s10019_s7 + $0xd20] ss:$8 sps:$4 sm:$0xff]  }
 0x15f   : > { %6538 = vmatprep.subr.bf16.mxu1 %v9247_v34  ;;  %v9263_v34 = vld [vmem:[%s10019_s7 + $0x450] ss:$8 sps:$4 sm:$0xff]   ;;  %v990_v57 = vrot.slane %v988_v15, 5  ;;  %v9268_v15 = vld [vmem:[%s10019_s7 + $0xd54] ss:$8 sps:$4 sm:$0xff]  }
 0x160   : > { %v969_v52 = vsel %vm10212_vm0, %v964_v42, %v968_v33  ;;  %v9283_v33 = vld [vmem:[%s10019_s7 + $0x484] ss:$8 sps:$4 sm:$0xff]  }
 0x161   : > { %7149 = vmatpush1.bf16.msra.mxu0 %v9230_v28  ;;  %6504 = vmatmul.mubr.bf16.gmra.mrb[4].mxu1 %v7747_v21  ;;  %v987_v28 = vrot.slane %v985_v1, 4  ;;  %v7862_v21 = vcombine.high %v10761_v37, %v10763_v41  ;;  %v9289_v1 = vld [vmem:[%s10019_s7 + $0x494] ss:$8 sps:$4 sm:$0xff]  }
 0x162   : > { %6539 = vmatpush1.bf16.msra.mxu1 %v9245_v39  ;;  %7191 = vmatprep.subr.bf16.mxu0 %v9238_v19  ;;  %v941_v39 = vsel %vm10212_vm0, %v936_v48, %v940_v26  ;;  %v9256_v19 = vld [vmem:[%s10019_s7 + $0xd34] ss:$8 sps:$4 sm:$0xff]   ;;  %v1110_v26 = vld [vmem:[#allocation2 + $0x20] sm:$0xee] }
 0x163   : > { %6540 = vmatprep.subr.bf16.mxu1 %v9253_v47  ;;  %v994_v47 = vshll.u32 %v794_v29, 16  ;;  %v7751_v54 = vcombine.low %v941_v39, %v969_v52  ;;  %v991_v46 = vor.u32 %v990_v57, %v987_v28  ;;  %v9281_v29 = vld [vmem:[%s10019_s7 + $0x480] ss:$8 sps:$4 sm:$0xff]   ;;  %v9301_v37 = vld [vmem:[%s10019_s7 + $0x4b4] ss:$8 sps:$4 sm:$0xff]  }
 0x164   : > { %7151 = vmatmul.mubr.bf16.vlgmr.msra.gmra.mrb[0].mxu0 %v7853_v44  ;;  %v1022_v44 = vshll.u32 %v798_v45, 16  ;;  %v9260_v45 = vld [vmem:[%s10019_s7 + $0xd40] ss:$8 sps:$4 sm:$0xff]   ;;  %v9280_v41 = vld [vmem:[%s10019_s7 + $0xd74] ss:$8 sps:$4 sm:$0xff]  }
 0x165   : > { %7192 = vmatpush1.bf16.msra.mxu0 %v9236_v4  ;;  %7160 = vmatprep.mubr.bf16.mxu0 %v7858_v59  ;;  %v996_v6 = vrot.slane %v994_v47, 5  ;;  %v992_v18 = vrot.slane %v991_v46, 4  ;;  %v1112_v4 = vld [vmem:[#allocation2 + $0x30] sm:$0x11]  ;;  %v10920_v47 = vld [vmem:[#allocation2] sm:$0xff] }
 0x166   : > { %6541 = vmatpush1.bf16.msra.mxu1 %v9251_v56  ;;  %7193 = vmatprep.subr.bf16.mxu0 %v9244_v36  ;;  %v7752_v56 = vcombine.high %v941_v39, %v969_v52  ;;  %v1024_v12 = vrot.slane %v1022_v44, 5  ;;  %v1183_v59 = vrot.slane %v1112_v4, 5  ;;  %v9287_v52 = vld [vmem:[%s10019_s7 + $0x490] ss:$8 sps:$4 sm:$0xff]   ;;  %v9274_v44 = vld [vmem:[%s10019_s7 + $0xd64] ss:$8 sps:$4 sm:$0xff]  }
 0x167   : > { %6542 = vmatprep.subr.bf16.mxu1 %v9259_v10  ;;  %v9277_v10 = vld [vmem:[%s10019_s7 + $0x474] ss:$8 sps:$4 sm:$0xff]   ;;  %v997_v25 = vsel %vm10212_vm0, %v992_v18, %v996_v6  ;;  %v9299_v28 = vld [vmem:[%s10019_s7 + $0x4b0] ss:$8 sps:$4 sm:$0xff]   ;;  %v9284_v46 = vld [vmem:[%s10019_s7 + $0xd80] ss:$8 sps:$4 sm:$0xff]  }
 0x168   : > { %6513 = vmatprep.mubr.bf16.mxu1 %v7752_v56  ;;  %v1025_v36 = vsel %vm10212_vm0, %v1020_v16, %v1024_v12  ;;  %v9278_v57 = vld [vmem:[%s10019_s7 + $0xd70] ss:$8 sps:$4 sm:$0xff]   ;;  %v9313_v6 = vld [vmem:[%s10019_s7 + $0x4d4] ss:$8 sps:$4 sm:$0xff]   ;;  %v9319_v12 = vld [vmem:[%s10019_s7 + $0x4e4] ss:$8 sps:$4 sm:$0xff]  }
 0x169   : > { %7194 = vmatpush1.bf16.msra.mxu0 %v9242_v40  ;;  %6514 = vmatmul.mubr.bf16.gmra.mrb[8].mxu1 %v7751_v54  ;;  %v7756_v55 = vcombine.high %v997_v25, %v1025_v36  ;;  %v1986_v40 = vld [vmem:[#allocation2 + $0x100] sm:$0xff]  ;;  %v9325_v16 = vld [vmem:[%s10019_s7 + $0x4f4] ss:$8 sps:$4 sm:$0xff]  }
 0x16a   : > { %6543 = vmatpush1.bf16.msra.mxu1 %v9257_v23  ;;  %7195 = vmatprep.subr.bf16.mxu0 %v9250_v53  ;;  %v1108_v23 = vld [vmem:[#allocation2 + $0x10] sm:$0x11]  ;;  %v9293_v53 = vld [vmem:[%s10019_s7 + $0x4a0] ss:$8 sps:$4 sm:$0xff]   ;;  %v7865_v56 = vcombine.low %v1986_v40, %v10920_v47 }
 0x16b   : > { %6544 = vmatprep.subr.bf16.mxu1 %v9265_v24  ;;  %v7757_v24 = vrot.slane %v1106_v22, 9  ;;  %v1175_v32 = vrot.slane %v1108_v23, 5  ;;  %6523 = vmatprep.mubr.bf16.mxu1 %v7756_v55  ;;  %v9272_v54 = vld [vmem:[%s10019_s7 + $0xd60] ss:$8 sps:$4 sm:$0xff]   ;;  %v1120_v23 = vld [vmem:[#allocation2 + $0x70] sm:$0x11] }
 0x16c   : > { %7161 = vmatmul.mubr.bf16.gmra.mrb[4].mxu0 %v7857_v8  ;;  %v7755_v8 = vcombine.low %v997_v25, %v1025_v36  ;;  %v1114_v18 = vld [vmem:[#allocation2 + $0x40] sm:$0xee]  ;;  %v9323_v36 = vld [vmem:[%s10019_s7 + $0x4f0] ss:$8 sps:$4 sm:$0xff]  }
 0x16d   : > { %7196 = vmatpush1.bf16.msra.mxu0 %v9248_v9  ;;  %7170 = vmatprep.mubr.bf16.mxu0 %v7862_v21  ;;  %v10908_v48 = vsel %vm10547_vm3, %v7757_v24, %v1175_v32  ;;  %v9292_v9 = vld [vmem:[%s10019_s7 + $0xd94] ss:$8 sps:$4 sm:$0xff]   ;;  %v9317_v21 = vld [vmem:[%s10019_s7 + $0x4e0] ss:$8 sps:$4 sm:$0xff]   ;;  %v7761_v25 = vrot.slane %v1114_v18, 9  ;;  %v1199_v24 = vrot.slane %v1120_v23, 5 }
 0x16e   : > { %6545 = vmatpush1.bf16.msra.mxu1 %v9263_v34  ;;  %v7759_v34 = vrot.slane %v1110_v26, 9  ;;  %7197 = vmatprep.subr.bf16.mxu0 %v9256_v19  ;;  %v9298_v19 = vld [vmem:[%s10019_s7 + $0xda4] ss:$8 sps:$4 sm:$0xff]   ;;  %v9304_v32 = vld [vmem:[%s10019_s7 + $0xdb4] ss:$8 sps:$4 sm:$0xff]  }
 0x16f   : > { %6546 = vmatprep.subr.bf16.mxu1 %v9271_v51  ;;  %v7866_v51 = vcombine.high %v1986_v40, %v10920_v47  ;;  %v1118_v22 = vld [vmem:[#allocation2 + $0x60] sm:$0xee]  ;;  %v1124_v40 = vld [vmem:[#allocation2 + $0x90] sm:$0x11]  ;;  %v1107_v23 = vld [vmem:[#allocation2 + $0x8] sm:$0xee] }
 0x170   : > { %v10912_v42 = vsel %vm10547_vm3, %v7759_v34, %v1183_v59  ;;  %v7763_v4 = vrot.slane %v1118_v22, 9  ;;  %v9331_v34 = vld [vmem:[%s10019_s7 + $0x504] ss:$8 sps:$4 sm:$0xff]  }
 0x171   : > { %v7774_v39 = vcombine.high %v10908_v48, %v10912_v42  ;;  %7198 = vmatpush1.bf16.msra.mxu0 %v9254_v27  ;;  %6524 = vmatmul.mubr.bf16.gmra.mrb[12].mxu1 %v7755_v8  ;;  %v1116_v27 = vld [vmem:[#allocation2 + $0x50] sm:$0x11]  ;;  %v9310_v55 = vld [vmem:[%s10019_s7 + $0xdc4] ss:$8 sps:$4 sm:$0xff]  }
 0x172   : > { %6547 = vmatpush1.bf16.msra.mxu1 %v9269_v2  ;;  %7199 = vmatprep.subr.bf16.mxu0 %v9262_v49  ;;  %v9305_v2 = vld [vmem:[%s10019_s7 + $0x4c0] ss:$8 sps:$4 sm:$0xff]   ;;  %v1191_v26 = vrot.slane %v1116_v27, 5  ;;  %v1200_v49 = vsel %vm10547_vm3, %v7763_v4, %v1199_v24  ;;  %v9326_v27 = vld [vmem:[%s10019_s7 + $0xdf0] ss:$8 sps:$4 sm:$0xff]  }
 0x173   : > { %6548 = vmatprep.subr.bf16.mxu1 %v9277_v10  ;;  %6566 = vmatprep.mubr.bf16.mxu1 %v7774_v39  ;;  %v9311_v10 = vld [vmem:[%s10019_s7 + $0x4d0] ss:$8 sps:$4 sm:$0xff]   ;;  %v1122_v8 = vld [vmem:[#allocation2 + $0x80] sm:$0xee]  ;;  %v7773_v39 = vcombine.low %v10908_v48, %v10912_v42  ;;  %v9316_v48 = vld [vmem:[%s10019_s7 + $0xdd4] ss:$8 sps:$4 sm:$0xff]  }
 0x174   : > { %7171 = vmatmul.mubr.bf16.gmra.mrb[8].mxu0 %v7861_v60  ;;  %v7856_v60 = vcombine.high %v10824_v17, %v10826_v5  ;;  %v1192_v59 = vsel %vm10547_vm3, %v7761_v25, %v1191_v26  ;;  %v9335_v42 = vld [vmem:[%s10019_s7 + $0x510] ss:$8 sps:$4 sm:$0xff]   ;;  %v9355_v22 = vld [vmem:[%s10019_s7 + $0x544] ss:$8 sps:$4 sm:$0xff]  }
 0x175   : > { %7200 = vmatpush1.bf16.msra.mxu0 %v9260_v45  ;;  %7180 = vmatprep.mubr.bf16.mxu0 %v7866_v51  ;;  %v9329_v45 = vld [vmem:[%s10019_s7 + $0x500] ss:$8 sps:$4 sm:$0xff]   ;;  %v9337_v51 = vld [vmem:[%s10019_s7 + $0x514] ss:$8 sps:$4 sm:$0xff]  }
 0x176   : > { %6549 = vmatpush1.bf16.msra.mxu1 %v9275_v20  ;;  %7201 = vmatprep.subr.bf16.mxu0 %v9268_v15  ;;  %v9296_v20 = vld [vmem:[%s10019_s7 + $0xda0] ss:$8 sps:$4 sm:$0xff]   ;;  %v1128_v15 = vld [vmem:[#allocation2 + $0xb0] sm:$0x11]  ;;  %v1109_v26 = vld [vmem:[#allocation2 + $0x18] sm:$0x11] }
 0x177   : > { %6550 = vmatprep.subr.bf16.mxu1 %v9283_v33  ;;  %v9302_v33 = vld [vmem:[%s10019_s7 + $0xdb0] ss:$8 sps:$4 sm:$0xff]   ;;  %v1111_v4 = vld [vmem:[#allocation2 + $0x28] sm:$0xee] }
 0x178   : > { %v1113_v24 = vld [vmem:[#allocation2 + $0x38] sm:$0x11] }
 0x179   : > { %7202 = vmatpush1.bf16.msra.mxu0 %v9266_v3  ;;  %v7765_v3 = vrot.slane %v1122_v8, 9  ;;  %v1179_v8 = vrot.slane %v1109_v26, 5  ;;  %v9391_v26 = vld [vmem:[%s10019_s7 + $0x5a4] ss:$8 sps:$4 sm:$0xff]  }
 0x17a   : > { %6551 = vmatpush1.bf16.msra.mxu1 %v9281_v29  ;;  %7203 = vmatprep.subr.bf16.mxu0 %v9274_v44  ;;  %v9308_v29 = vld [vmem:[%s10019_s7 + $0xdc0] ss:$8 sps:$4 sm:$0xff]  }
 0x17b   : > { %6552 = vmatprep.subr.bf16.mxu1 %v9289_v1  ;;  %v1126_v1 = vld [vmem:[#allocation2 + $0xa0] sm:$0xee] }
 0x17c   : > { %7181 = vmatmul.mubr.bf16.gmra.mrb[12].mxu0 %v7865_v56  ;;  %v7767_v44 = vrot.slane %v1126_v1, 9  ;;  %v9314_v56 = vld [vmem:[%s10019_s7 + $0xdd0] ss:$8 sps:$4 sm:$0xff]   ;;  %v10995_v1 = vld [vmem:[#allocation2 + $0x40] sm:$0xff] }
 0x17d   : > { %7204 = vmatpush1.bf16.msra.mxu0 %v9272_v54  ;;  %7223 = vmatprep.mubr.bf16.mxu0 %v7856_v60  ;;  %v9343_v54 = vld [vmem:[%s10019_s7 + $0x524] ss:$8 sps:$4 sm:$0xff]  }
 0x17e   : > { %6553 = vmatpush1.bf16.msra.mxu1 %v9287_v52  ;;  %7205 = vmatprep.subr.bf16.mxu0 %v9280_v41  ;;  %v7778_v52 = vcombine.high %v1192_v59, %v1200_v49  ;;  %v9322_v60 = vld [vmem:[%s10019_s7 + $0xde4] ss:$8 sps:$4 sm:$0xff]  }
 0x17f   : > { %6554 = vmatprep.subr.bf16.mxu1 %v9295_v7  ;;  %v1207_v7 = vrot.slane %v1124_v40, 5  ;;  %v7760_v40 = vrot.slane %v1111_v4, 9  ;;  %v9370_v4 = vld [vmem:[%s10019_s7 + $0xe64] ss:$8 sps:$4 sm:$0xff]  }
 0x181   : > { %7206 = vmatpush1.bf16.msra.mxu0 %v9278_v57  ;;  %v9320_v57 = vld [vmem:[%s10019_s7 + $0xde0] ss:$8 sps:$4 sm:$0xff]  }
 0x182   : > { %6555 = vmatpush1.bf16.msra.mxu1 %v9293_v53  ;;  %7207 = vmatprep.subr.bf16.mxu0 %v9286_v63  ;;  %v1215_v53 = vrot.slane %v1128_v15, 5  ;;  %v7777_v63 = vcombine.low %v1192_v59, %v1200_v49  ;;  %v9361_v59 = vld [vmem:[%s10019_s7 + $0x554] ss:$8 sps:$4 sm:$0xff]   ;;  %v2090_v15 = vld [vmem:[#allocation2 + $0x60] sm:$0xff] }
 0x183   : > { %6556 = vmatprep.subr.bf16.mxu1 %v9301_v37  ;;  %v1208_v37 = vsel %vm10547_vm3, %v7765_v3, %v1207_v7  ;;  %v9340_v49 = vld [vmem:[%s10019_s7 + $0xe14] ss:$8 sps:$4 sm:$0xff]   ;;  %v9346_v3 = vld [vmem:[%s10019_s7 + $0xe24] ss:$8 sps:$4 sm:$0xff]   ;;  %v2119_v7 = vshrl.u32 %v10995_v1, 16 }
 0x184   : > { %v1216_v41 = vsel %vm10547_vm3, %v7767_v44, %v1215_v53  ;;  %v2122_v44 = vshll.u32 %v10995_v1, 16  ;;  %v2147_v53 = vshrl.u32 %v2090_v15, 16 }
 0x185   : > { %7208 = vmatpush1.bf16.msra.mxu0 %v9284_v46  ;;  %v1130_v46 = vld [vmem:[#allocation2 + $0xc0] sm:$0xee]  ;;  %v7781_v25 = vcombine.low %v1208_v37, %v1216_v41 }
 0x186   : > { %6557 = vmatpush1.bf16.msra.mxu1 %v9299_v28  ;;  %7209 = vmatprep.subr.bf16.mxu0 %v9292_v9  ;;  %v9341_v28 = vld [vmem:[%s10019_s7 + $0x520] ss:$8 sps:$4 sm:$0xff]  }
 0x187   : > { %6558 = vmatprep.subr.bf16.mxu1 %v9307_v61  ;;  %v9349_v61 = vld [vmem:[%s10019_s7 + $0x534] ss:$8 sps:$4 sm:$0xff]   ;;  %v1134_v9 = vld [vmem:[#allocation2 + $0xe0] sm:$0xee] }
 0x189   : > { %7210 = vmatpush1.bf16.msra.mxu0 %v9290_v11  ;;  %v9328_v11 = vld [vmem:[%s10019_s7 + $0xdf4] ss:$8 sps:$4 sm:$0xff]  }
 0x18a   : > { %6559 = vmatpush1.bf16.msra.mxu1 %v9305_v2  ;;  %7211 = vmatprep.subr.bf16.mxu0 %v9298_v19  ;;  %v7782_v2 = vcombine.high %v1208_v37, %v1216_v41  ;;  %v7769_v19 = vrot.slane %v1130_v46, 9  ;;  %v9371_v37 = vld [vmem:[%s10019_s7 + $0x570] ss:$8 sps:$4 sm:$0xff]  }
 0x18b   : > { %6560 = vmatprep.subr.bf16.mxu1 %v9313_v6  ;;  %v1132_v6 = vld [vmem:[#allocation2 + $0xd0] sm:$0x11] }
 0x18c   : > { %v9350_v46 = vld [vmem:[%s10019_s7 + $0xe30] ss:$8 sps:$4 sm:$0xff]  }
 0x18d   : > { %7212 = vmatpush1.bf16.msra.mxu0 %v9296_v20  ;;  %v1223_v20 = vrot.slane %v1132_v6, 5  ;;  %v9379_v6 = vld [vmem:[%s10019_s7 + $0x584] ss:$8 sps:$4 sm:$0xff]  }
 0x18e   : > { %6561 = vmatpush1.bf16.msra.mxu1 %v9311_v10  ;;  %7213 = vmatprep.subr.bf16.mxu0 %v9304_v32  ;;  %v1136_v10 = vld [vmem:[#allocation2 + $0xf0] sm:$0x11]  ;;  %v9332_v32 = vld [vmem:[%s10019_s7 + $0xe00] ss:$8 sps:$4 sm:$0xff]  }
 0x18f   : > { %6562 = vmatprep.subr.bf16.mxu1 %v9319_v12  ;;  %v9347_v12 = vld [vmem:[%s10019_s7 + $0x530] ss:$8 sps:$4 sm:$0xff]   ;;  %v1231_v18 = vrot.slane %v1136_v10, 5  ;;  %v1987_v10 = vld [vmem:[#allocation2 + $0x108] sm:$0xff] }
 0x190   : > { %v7867_v38 = vcombine.low %v1987_v10, %v10920_v47 }
 0x191   : > { %7214 = vmatpush1.bf16.msra.mxu0 %v9302_v33  ;;  %v9353_v33 = vld [vmem:[%s10019_s7 + $0x540] ss:$8 sps:$4 sm:$0xff]  }
 0x192   : > { %6563 = vmatpush1.bf16.msra.mxu1 %v9317_v21  ;;  %7215 = vmatprep.subr.bf16.mxu0 %v9310_v55  ;;  %v7771_v21 = vrot.slane %v1134_v9, 9  ;;  %v7758_v55 = vrot.slane %v1107_v23, 9  ;;  %v9358_v9 = vld [vmem:[%s10019_s7 + $0xe44] ss:$8 sps:$4 sm:$0xff]   ;;  %v9383_v23 = vld [vmem:[%s10019_s7 + $0x590] ss:$8 sps:$4 sm:$0xff]  }
 0x193   : > { %6564 = vmatprep.subr.bf16.mxu1 %v9325_v16  ;;  %v9334_v16 = vld [vmem:[%s10019_s7 + $0xe04] ss:$8 sps:$4 sm:$0xff]  }
 0x194   : > { %v11005_v5 = vsel %vm10547_vm3, %v7758_v55, %v1179_v8  ;;  %v9403_v55 = vld [vmem:[%s10019_s7 + $0x5c4] ss:$8 sps:$4 sm:$0xff]  }
 0x195   : > { %7216 = vmatpush1.bf16.msra.mxu0 %v9308_v29  ;;  %v1187_v29 = vrot.slane %v1113_v24, 5  ;;  %v9382_v8 = vld [vmem:[%s10019_s7 + $0xe84] ss:$8 sps:$4 sm:$0xff]  }
 0x196   : > { %6565 = vmatpush1.bf16.msra.mxu1 %v9323_v36  ;;  %7217 = vmatprep.subr.bf16.mxu0 %v9316_v48  ;;  %v1224_v36 = vsel %vm10547_vm3, %v7769_v19, %v1223_v20  ;;  %v2150_v48 = vshll.u32 %v2090_v15, 16  ;;  %v9356_v19 = vld [vmem:[%s10019_s7 + $0xe40] ss:$8 sps:$4 sm:$0xff]   ;;  %v9385_v20 = vld [vmem:[%s10019_s7 + $0x594] ss:$8 sps:$4 sm:$0xff]  }
 0x197   : > { %6607 = vmatprep.subr.bf16.mxu1 %v9331_v34  ;;  %v1232_v34 = vsel %vm10547_vm3, %v7771_v21, %v1231_v18  ;;  %v9364_v21 = vld [vmem:[%s10019_s7 + $0xe54] ss:$8 sps:$4 sm:$0xff]   ;;  %v9386_v15 = vld [vmem:[%s10019_s7 + $0xe90] ss:$8 sps:$4 sm:$0xff]  }
 0x198   : > { %v7785_v17 = vcombine.low %v1224_v36, %v1232_v34 }
 0x199   : > { %6567 = vmatmul.mubr.bf16.vlgmr.msra.gmra.mrb[0].mxu1 %v7773_v39  ;;  %7218 = vmatpush1.bf16.msra.mxu0 %v9314_v56  ;;  %v9359_v39 = vld [vmem:[%s10019_s7 + $0x550] ss:$8 sps:$4 sm:$0xff]   ;;  %v9352_v56 = vld [vmem:[%s10019_s7 + $0xe34] ss:$8 sps:$4 sm:$0xff]  }
 0x19a   : > { %6608 = vmatpush1.bf16.msra.mxu1 %v9329_v45  ;;  %6576 = vmatprep.mubr.bf16.mxu1 %v7778_v52  ;;  %v7786_v45 = vcombine.high %v1224_v36, %v1232_v34  ;;  %v9367_v52 = vld [vmem:[%s10019_s7 + $0x564] ss:$8 sps:$4 sm:$0xff]   ;;  %v9376_v36 = vld [vmem:[%s10019_s7 + $0xe74] ss:$8 sps:$4 sm:$0xff]  }
 0x19b   : > { %6609 = vmatprep.subr.bf16.mxu1 %v9337_v51  ;;  %7219 = vmatprep.subr.bf16.mxu0 %v9322_v60  ;;  %v9338_v51 = vld [vmem:[%s10019_s7 + $0xe10] ss:$8 sps:$4 sm:$0xff]   ;;  %v2121_v60 = vrot.slane %v2119_v7, 4 }
 0x19c   : > { %v1117_v7 = vld [vmem:[#allocation2 + $0x58] sm:$0x11] }
 0x19d   : > { %7220 = vmatpush1.bf16.msra.mxu0 %v9320_v57  ;;  %v2149_v57 = vrot.slane %v2147_v53, 4  ;;  %v1121_v53 = vld [vmem:[#allocation2 + $0x78] sm:$0x11] }
 0x19e   : > { %6610 = vmatpush1.bf16.msra.mxu1 %v9335_v42  ;;  %7221 = vmatprep.subr.bf16.mxu0 %v9328_v11  ;;  %v9344_v42 = vld [vmem:[%s10019_s7 + $0xe20] ss:$8 sps:$4 sm:$0xff]  }
 0x19f   : > { %6611 = vmatprep.subr.bf16.mxu1 %v9343_v54  ;;  %v9373_v54 = vld [vmem:[%s10019_s7 + $0x574] ss:$8 sps:$4 sm:$0xff]  }
 0x1a1   : > { %6577 = vmatmul.mubr.bf16.gmra.mrb[4].mxu1 %v7777_v63  ;;  %7222 = vmatpush1.bf16.msra.mxu0 %v9326_v27  ;;  %v2088_v63 = vld [vmem:[#allocation2 + $0x50] sm:$0x11] }
 0x1a2   : > { %6612 = vmatpush1.bf16.msra.mxu1 %v9341_v28  ;;  %6586 = vmatprep.mubr.bf16.mxu1 %v7782_v2  ;;  %v2124_v28 = vrot.slane %v2122_v44, 5  ;;  %v2092_v2 = vld [vmem:[#allocation2 + $0x70] sm:$0x11]  ;;  %v2128_v62 = vshll.u32 %v2088_v63, 16  ;;  %v1119_v44 = vld [vmem:[#allocation2 + $0x68] sm:$0xee] }
 0x1a3   : > { %6613 = vmatprep.subr.bf16.mxu1 %v9349_v61  ;;  %7264 = vmatprep.subr.bf16.mxu0 %v9334_v16  ;;  %v2152_v61 = vrot.slane %v2150_v48, 5  ;;  %v2156_v11 = vshll.u32 %v2092_v2, 16  ;;  %v9392_v48 = vld [vmem:[%s10019_s7 + $0xea0] ss:$8 sps:$4 sm:$0xff]   ;;  %v9406_v63 = vld [vmem:[%s10019_s7 + $0xec4] ss:$8 sps:$4 sm:$0xff]  }
 0x1a4   : > { %7224 = vmatmul.mubr.bf16.vlgmr.msra.gmra.mrb[0].mxu0 %v7855_v35  ;;  %v11009_v35 = vsel %vm10547_vm3, %v7760_v40, %v1187_v29  ;;  %v2125_v58 = vor.u32 %v2124_v28, %v2121_v60  ;;  %v2130_v27 = vrot.slane %v2128_v62, 5  ;;  %v9401_v40 = vld [vmem:[%s10019_s7 + $0x5c0] ss:$8 sps:$4 sm:$0xff]   ;;  %v9400_v60 = vld [vmem:[%s10019_s7 + $0xeb4] ss:$8 sps:$4 sm:$0xff]  }
 0x1a5   : > { %7265 = vmatpush1.bf16.msra.mxu0 %v9332_v32  ;;  %7233 = vmatprep.mubr.bf16.mxu0 %v7860_v30  ;;  %v9365_v30 = vld [vmem:[%s10019_s7 + $0x560] ss:$8 sps:$4 sm:$0xff]   ;;  %v7776_v41 = vcombine.high %v11005_v5, %v11009_v35  ;;  %v9427_v2 = vld [vmem:[%s10019_s7 + $0x604] ss:$8 sps:$4 sm:$0xff]   ;;  %v1125_v62 = vld [vmem:[#allocation2 + $0x98] sm:$0x11] }
 0x1a6   : > { %6614 = vmatpush1.bf16.msra.mxu1 %v9347_v12  ;;  %7266 = vmatprep.subr.bf16.mxu0 %v9340_v49  ;;  %v9377_v12 = vld [vmem:[%s10019_s7 + $0x580] ss:$8 sps:$4 sm:$0xff]   ;;  %v2126_v18 = vrot.slane %v2125_v58, 4  ;;  %v9395_v49 = vld [vmem:[%s10019_s7 + $0x5b0] ss:$8 sps:$4 sm:$0xff]  }
 0x1a7   : > { %6615 = vmatprep.subr.bf16.mxu1 %v9355_v22  ;;  %v2158_v22 = vrot.slane %v2156_v11, 5  ;;  %v9380_v29 = vld [vmem:[%s10019_s7 + $0xe80] ss:$8 sps:$4 sm:$0xff]   ;;  %v1129_v11 = vld [vmem:[#allocation2 + $0xb8] sm:$0x11] }
 0x1a8   : > { %v11043_v24 = vsel %vm10212_vm0, %v2126_v18, %v2130_v27  ;;  %v11072_v28 = vld [vmem:[#allocation2 + $0x80] sm:$0xff]  ;;  %v1123_v58 = vld [vmem:[#allocation2 + $0x88] sm:$0xee]  ;;  %v9412_v27 = vld [vmem:[%s10019_s7 + $0xed4] ss:$8 sps:$4 sm:$0xff]  }
 0x1a9   : > { %6587 = vmatmul.mubr.bf16.gmra.mrb[8].mxu1 %v7781_v25  ;;  %7267 = vmatpush1.bf16.msra.mxu0 %v9338_v51  ;;  %v9362_v25 = vld [vmem:[%s10019_s7 + $0xe50] ss:$8 sps:$4 sm:$0xff]   ;;  %v9394_v51 = vld [vmem:[%s10019_s7 + $0xea4] ss:$8 sps:$4 sm:$0xff]  }
 0x1aa   : > { %6616 = vmatpush1.bf16.msra.mxu1 %v9353_v33  ;;  %6596 = vmatprep.mubr.bf16.mxu1 %v7786_v45  ;;  %v9397_v33 = vld [vmem:[%s10019_s7 + $0x5b4] ss:$8 sps:$4 sm:$0xff]  }
 0x1ab   : > { %6617 = vmatprep.subr.bf16.mxu1 %v9361_v59  ;;  %7268 = vmatprep.subr.bf16.mxu0 %v9346_v3  ;;  %v9374_v59 = vld [vmem:[%s10019_s7 + $0xe70] ss:$8 sps:$4 sm:$0xff]   ;;  %v9388_v45 = vld [vmem:[%s10019_s7 + $0xe94] ss:$8 sps:$4 sm:$0xff]   ;;  %v9415_v3 = vld [vmem:[%s10019_s7 + $0x5e4] ss:$8 sps:$4 sm:$0xff]  }
 0x1ac   : > { %7234 = vmatmul.mubr.bf16.gmra.mrb[4].mxu0 %v7859_v31  ;;  %v2153_v31 = vor.u32 %v2152_v61, %v2149_v57  ;;  %v9398_v57 = vld [vmem:[%s10019_s7 + $0xeb0] ss:$8 sps:$4 sm:$0xff]  }
 0x1ad   : > { %7269 = vmatpush1.bf16.msra.mxu0 %v9344_v42  ;;  %7243 = vmatprep.mubr.bf16.mxu0 %v7864_v13  ;;  %v7868_v13 = vcombine.high %v1987_v10, %v10920_v47  ;;  %v9413_v42 = vld [vmem:[%s10019_s7 + $0x5e0] ss:$8 sps:$4 sm:$0xff]   ;;  %v9419_v61 = vld [vmem:[%s10019_s7 + $0x5f0] ss:$8 sps:$4 sm:$0xff]   ;;  %v2175_v10 = vshrl.u32 %v11072_v28, 16 }
 0x1ae   : > { %6618 = vmatpush1.bf16.msra.mxu1 %v9359_v39  ;;  %7270 = vmatprep.subr.bf16.mxu0 %v9352_v56  ;;  %v2154_v16 = vrot.slane %v2153_v31, 4  ;;  %v9409_v39 = vld [vmem:[%s10019_s7 + $0x5d4] ss:$8 sps:$4 sm:$0xff]   ;;  %v1127_v31 = vld [vmem:[#allocation2 + $0xa8] sm:$0xee] }
 0x1af   : > { %6619 = vmatprep.subr.bf16.mxu1 %v9367_v52  ;;  %v9407_v52 = vld [vmem:[%s10019_s7 + $0x5d0] ss:$8 sps:$4 sm:$0xff]  }
 0x1b0   : > { %v11047_v32 = vsel %vm10212_vm0, %v2154_v16, %v2158_v22  ;;  %v9433_v16 = vld [vmem:[%s10019_s7 + $0x614] ss:$8 sps:$4 sm:$0xff]  }
 0x1b1   : > { %6597 = vmatmul.mubr.bf16.gmra.mrb[12].mxu1 %v7785_v17  ;;  %7271 = vmatpush1.bf16.msra.mxu0 %v9350_v46  ;;  %v7870_v34 = vcombine.high %v11043_v24, %v11047_v32  ;;  %v1115_v17 = vld [vmem:[#allocation2 + $0x48] sm:$0xee]  ;;  %v11078_v46 = vld [vmem:[#allocation2 + $0xa0] sm:$0xff] }
 0x1b2   : > { %6620 = vmatpush1.bf16.msra.mxu1 %v9365_v30  ;;  %6639 = vmatprep.mubr.bf16.mxu1 %v7776_v41  ;;  %v9421_v30 = vld [vmem:[%s10019_s7 + $0x5f4] ss:$8 sps:$4 sm:$0xff]   ;;  %v7762_v56 = vrot.slane %v1115_v17, 9  ;;  %v1203_v41 = vrot.slane %v1121_v53, 5  ;;  %v2206_v18 = vshll.u32 %v11078_v46, 16  ;;  %v2315_v17 = vshrl.u32 %v10920_v47, 16 }
 0x1b3   : > { %6621 = vmatprep.subr.bf16.mxu1 %v9373_v54  ;;  %7272 = vmatprep.subr.bf16.mxu0 %v9358_v9  ;;  %v1195_v54 = vrot.slane %v1117_v7, 5  ;;  %v9416_v7 = vld [vmem:[%s10019_s7 + $0xee0] ss:$8 sps:$4 sm:$0xff]   ;;  %v9445_v53 = vld [vmem:[%s10019_s7 + $0x634] ss:$8 sps:$4 sm:$0xff]  }
 0x1b4   : > { %7244 = vmatmul.mubr.bf16.gmra.mrb[8].mxu0 %v7863_v14  ;;  %v9368_v14 = vld [vmem:[%s10019_s7 + $0xe60] ss:$8 sps:$4 sm:$0xff]  }
 0x1b5   : > { %7273 = vmatpush1.bf16.msra.mxu0 %v9356_v19  ;;  %7253 = vmatprep.mubr.bf16.mxu0 %v7868_v13  ;;  %v7775_v19 = vcombine.low %v11005_v5, %v11009_v35  ;;  %v2203_v13 = vshrl.u32 %v11078_v46, 16  ;;  %v1211_v5 = vrot.slane %v1125_v62, 5  ;;  %v7768_v35 = vrot.slane %v1127_v31, 9 }
 0x1b6   : > { %6622 = vmatpush1.bf16.msra.mxu1 %v9371_v37  ;;  %7274 = vmatprep.subr.bf16.mxu0 %v9364_v21  ;;  %v7764_v37 = vrot.slane %v1119_v44, 9  ;;  %v2178_v21 = vshll.u32 %v11072_v28, 16  ;;  %v9437_v44 = vld [vmem:[%s10019_s7 + $0x620] ss:$8 sps:$4 sm:$0xff]   ;;  %v2318_v31 = vshll.u32 %v10920_v47, 16 }
 0x1b7   : > { %6623 = vmatprep.subr.bf16.mxu1 %v9379_v6  ;;  %v11082_v6 = vsel %vm10547_vm3, %v7762_v56, %v1195_v54  ;;  %v9424_v54 = vld [vmem:[%s10019_s7 + $0xef4] ss:$8 sps:$4 sm:$0xff]  }
 0x1b8   : > { %v11086_v9 = vsel %vm10547_vm3, %v7764_v37, %v1203_v41 }
 0x1b9   : > { %7275 = vmatpush1.bf16.msra.mxu0 %v9362_v25  ;;  %v7780_v22 = vcombine.high %v11082_v6, %v11086_v9  ;;  %v7766_v25 = vrot.slane %v1123_v58, 9  ;;  %v9443_v58 = vld [vmem:[%s10019_s7 + $0x630] ss:$8 sps:$4 sm:$0xff]  }
 0x1ba   : > { %6624 = vmatpush1.bf16.msra.mxu1 %v9377_v12  ;;  %7276 = vmatprep.subr.bf16.mxu0 %v9370_v4  ;;  %v9404_v12 = vld [vmem:[%s10019_s7 + $0xec0] ss:$8 sps:$4 sm:$0xff]  }
 0x1bb   : > { %6625 = vmatprep.subr.bf16.mxu1 %v9385_v20  ;;  %v9425_v20 = vld [vmem:[%s10019_s7 + $0x600] ss:$8 sps:$4 sm:$0xff]  }
 0x1bc   : > { %7254 = vmatmul.mubr.bf16.gmra.mrb[12].mxu0 %v7867_v38  ;;  %v11102_v4 = vld [vmem:[#allocation2 + $0xe0] sm:$0xff]  ;;  %v2096_v38 = vld [vmem:[#allocation2 + $0x90] sm:$0x11] }
 0x1bd   : > { %7277 = vmatpush1.bf16.msra.mxu0 %v9368_v14  ;;  %7296 = vmatprep.mubr.bf16.mxu0 %v7870_v34  ;;  %v2100_v14 = vld [vmem:[#allocation2 + $0xb0] sm:$0x11]  ;;  %v2205_v34 = vrot.slane %v2203_v13, 4 }
 0x1be   : > { %6626 = vmatpush1.bf16.msra.mxu1 %v9383_v23  ;;  %7278 = vmatprep.subr.bf16.mxu0 %v9376_v36  ;;  %v11100_v23 = vld [vmem:[#allocation2 + $0xc0] sm:$0xff]  ;;  %v2180_v36 = vrot.slane %v2178_v21, 5 }
 0x1bf   : > { %6627 = vmatprep.subr.bf16.mxu1 %v9391_v26  ;;  %v1219_v26 = vrot.slane %v1129_v11, 5 }
 0x1c1   : > { %7279 = vmatpush1.bf16.msra.mxu0 %v9374_v59  ;;  %v2208_v59 = vrot.slane %v2206_v18, 5 }
 0x1c2   : > { %6628 = vmatpush1.bf16.msra.mxu1 %v9389_v43  ;;  %7280 = vmatprep.subr.bf16.mxu0 %v9382_v8  ;;  %v9431_v43 = vld [vmem:[%s10019_s7 + $0x610] ss:$8 sps:$4 sm:$0xff]   ;;  %v2259_v8 = vshrl.u32 %v11102_v4, 16 }
 0x1c3   : > { %6629 = vmatprep.subr.bf16.mxu1 %v9397_v33  ;;  %v2177_v33 = vrot.slane %v2175_v10, 4  ;;  %v1137_v10 = vld [vmem:[#allocation2 + $0xf8] sm:$0x11] }
 0x1c5   : > { %7281 = vmatpush1.bf16.msra.mxu0 %v9380_v29  ;;  %v9410_v29 = vld [vmem:[%s10019_s7 + $0xed0] ss:$8 sps:$4 sm:$0xff]  }
 0x1c6   : > { %6630 = vmatpush1.bf16.msra.mxu1 %v9395_v49  ;;  %7282 = vmatprep.subr.bf16.mxu0 %v9388_v45  ;;  %v2231_v49 = vshrl.u32 %v11100_v23, 16  ;;  %v11113_v45 = vsel %vm10547_vm3, %v7766_v25, %v1211_v5 }
 0x1c7   : > { %6631 = vmatprep.subr.bf16.mxu1 %v9403_v55  ;;  %v2234_v55 = vshll.u32 %v11100_v23, 16 }
 0x1c8   : > { %v2233_v56 = vrot.slane %v2231_v49, 4  ;;  %v7869_v49 = vcombine.low %v11043_v24, %v11047_v32  ;;  %v2112_v32 = vld [vmem:[#allocation2 + $0x110] sm:$0x11] }
 0x1c9   : > { %7283 = vmatpush1.bf16.msra.mxu0 %v9386_v15  ;;  %v11117_v15 = vsel %vm10547_vm3, %v7768_v35, %v1219_v26  ;;  %v2236_v41 = vrot.slane %v2234_v55, 5  ;;  %v9430_v26 = vld [vmem:[%s10019_s7 + $0xf04] ss:$8 sps:$4 sm:$0xff]   ;;  %v9436_v55 = vld [vmem:[%s10019_s7 + $0xf14] ss:$8 sps:$4 sm:$0xff]  }
 0x1ca   : > { %6632 = vmatpush1.bf16.msra.mxu1 %v9401_v40  ;;  %7284 = vmatprep.subr.bf16.mxu0 %v9394_v51  ;;  %v2262_v40 = vshll.u32 %v11102_v4, 16  ;;  %v9418_v51 = vld [vmem:[%s10019_s7 + $0xee4] ss:$8 sps:$4 sm:$0xff]   ;;  %v7784_v37 = vcombine.high %v11113_v45, %v11117_v15 }
 0x1cb   : > { %6633 = vmatprep.subr.bf16.mxu1 %v9409_v39  ;;  %v9439_v39 = vld [vmem:[%s10019_s7 + $0x624] ss:$8 sps:$4 sm:$0xff]   ;;  %v2237_v47 = vor.u32 %v2236_v41, %v2233_v56  ;;  %v2296_v41 = vshll.u32 %v2112_v32, 16 }
 0x1cc   : > { %v11164_v56 = vld [vmem:[#allocation2 + $0x68] sm:$0xff] }
 0x1cd   : > { %7285 = vmatpush1.bf16.msra.mxu0 %v9392_v48  ;;  %v2181_v48 = vor.u32 %v2180_v36, %v2177_v33 }
 0x1ce   : > { %6634 = vmatpush1.bf16.msra.mxu1 %v9407_v52  ;;  %7286 = vmatprep.subr.bf16.mxu0 %v9400_v60  ;;  %v2184_v52 = vshll.u32 %v2096_v38, 16  ;;  %v2261_v60 = vrot.slane %v2259_v8, 4  ;;  %v9449_v8 = vld [vmem:[%s10019_s7 + $0x640] ss:$8 sps:$4 sm:$0xff]  }
 0x1cf   : > { %6635 = vmatprep.subr.bf16.mxu1 %v9415_v3  ;;  %v2212_v3 = vshll.u32 %v2100_v14, 16  ;;  %v2182_v11 = vrot.slane %v2181_v48, 4  ;;  %v9428_v14 = vld [vmem:[%s10019_s7 + $0xf00] ss:$8 sps:$4 sm:$0xff]  }
 0x1d0   : > { %v2186_v62 = vrot.slane %v2184_v52, 5 }
 0x1d1   : > { %7287 = vmatpush1.bf16.msra.mxu0 %v9398_v57  ;;  %v2264_v57 = vrot.slane %v2262_v40, 5  ;;  %v9457_v40 = vld [vmem:[%s10019_s7 + $0x654] ss:$8 sps:$4 sm:$0xff]  }
 0x1d2   : > { %6636 = vmatpush1.bf16.msra.mxu1 %v9413_v42  ;;  %7288 = vmatprep.subr.bf16.mxu0 %v9406_v63  ;;  %v2209_v42 = vor.u32 %v2208_v59, %v2205_v34  ;;  %v1133_v63 = vld [vmem:[#allocation2 + $0xd8] sm:$0x11]  ;;  %v11141_v33 = vsel %vm10212_vm0, %v2182_v11, %v2186_v62  ;;  %v7783_v34 = vcombine.low %v11113_v45, %v11117_v15  ;;  %v2317_v59 = vrot.slane %v2315_v17, 4  ;;  %v11177_v62 = vld [vmem:[#allocation2 + $0x20] sm:$0xff] }
 0x1d3   : > { %6637 = vmatprep.subr.bf16.mxu1 %v9421_v30  ;;  %v7779_v30 = vcombine.low %v11082_v6, %v11086_v9  ;;  %v2104_v6 = vld [vmem:[#allocation2 + $0xd0] sm:$0x11]  ;;  %v1227_v13 = vrot.slane %v1133_v63, 5  ;;  %v2265_v5 = vor.u32 %v2264_v57, %v2261_v60  ;;  %v2238_v45 = vrot.slane %v2237_v47, 4  ;;  %v9442_v57 = vld [vmem:[%s10019_s7 + $0xf24] ss:$8 sps:$4 sm:$0xff]  }
 0x1d4   : > { %v2108_v9 = vld [vmem:[#allocation2 + $0xf0] sm:$0x11]  ;;  %v2240_v25 = vshll.u32 %v2104_v6, 16  ;;  %v2164_v11 = vshll.u32 %v11164_v56, 16 }
 0x1d5   : > { %7289 = vmatpush1.bf16.msra.mxu0 %v9404_v12  ;;  %v2210_v12 = vrot.slane %v2209_v42, 4  ;;  %v2268_v35 = vshll.u32 %v2108_v9, 16  ;;  %v2266_v52 = vrot.slane %v2265_v5, 4  ;;  %v2116_v42 = vld [vmem:[#allocation2 + $0x130] sm:$0x11] }
 0x1d6   : > { %6638 = vmatpush1.bf16.msra.mxu1 %v9419_v61  ;;  %7290 = vmatprep.subr.bf16.mxu0 %v9412_v27  ;;  %v1131_v61 = vld [vmem:[#allocation2 + $0xc8] sm:$0xee]  ;;  %v1235_v27 = vrot.slane %v1137_v10, 5  ;;  %v2242_v15 = vrot.slane %v2240_v25, 5  ;;  %v7790_v25 = vcombine.high %v11177_v62, %v10995_v1  ;;  %v2089_v5 = vld [vmem:[#allocation2 + $0x58] sm:$0x11] }
 0x1d7   : > { %6680 = vmatprep.subr.bf16.mxu1 %v9427_v2  ;;  %v1135_v2 = vld [vmem:[#allocation2 + $0xe8] sm:$0xee]  ;;  %v7770_v21 = vrot.slane %v1131_v61, 9 }
 0x1d8   : > { %v7772_v18 = vrot.slane %v1135_v2, 9  ;;  %v2324_v2 = vshll.u32 %v2116_v42, 16  ;;  %v9454_v1 = vld [vmem:[%s10019_s7 + $0xf44] ss:$8 sps:$4 sm:$0xff]  }
 0x1d9   : > { %6640 = vmatmul.mubr.bf16.vlgmr.msra.gmra.mrb[0].mxu1 %v7775_v19  ;;  %7291 = vmatpush1.bf16.msra.mxu0 %v9410_v29  ;;  %v2214_v19 = vrot.slane %v2212_v3, 5  ;;  %v1228_v29 = vsel %vm10547_vm3, %v7770_v21, %v1227_v13  ;;  %v2270_v3 = vrot.slane %v2268_v35, 5  ;;  %v9469_v13 = vld [vmem:[%s10019_s7 + $0x674] ss:$8 sps:$4 sm:$0xff]   ;;  %v9446_v35 = vld [vmem:[%s10019_s7 + $0xf30] ss:$8 sps:$4 sm:$0xff]  }
 0x1da   : > { %6681 = vmatpush1.bf16.msra.mxu1 %v9425_v20  ;;  %6649 = vmatprep.mubr.bf16.mxu1 %v7780_v22  ;;  %v11131_v20 = vld [vmem:[#allocation2 + $0x100] sm:$0xff]  ;;  %v2326_v47 = vrot.slane %v2324_v2, 5 }
 0x1db   : > { %6682 = vmatprep.subr.bf16.mxu1 %v9433_v16  ;;  %7292 = vmatprep.subr.bf16.mxu0 %v9418_v51  ;;  %v9422_v16 = vld [vmem:[%s10019_s7 + $0xef0] ss:$8 sps:$4 sm:$0xff]   ;;  %v9451_v22 = vld [vmem:[%s10019_s7 + $0x644] ss:$8 sps:$4 sm:$0xff]   ;;  %v2290_v38 = vshll.u32 %v11131_v20, 16  ;;  %v11145_v36 = vsel %vm10212_vm0, %v2210_v12, %v2214_v19  ;;  %v2320_v51 = vrot.slane %v2318_v31, 5  ;;  %v11174_v61 = vsel %vm10212_vm0, %v2266_v52, %v2270_v3 }
 0x1dc   : > { %v7874_v24 = vcombine.high %v11141_v33, %v11145_v36  ;;  %v2161_v31 = vshrl.u32 %v11164_v56, 16  ;;  %v9448_v12 = vld [vmem:[%s10019_s7 + $0xf34] ss:$8 sps:$4 sm:$0xff]   ;;  %v9461_v19 = vld [vmem:[%s10019_s7 + $0x660] ss:$8 sps:$4 sm:$0xff]   ;;  %v7873_v21 = vcombine.low %v11141_v33, %v11145_v36 }
 0x1dd   : > { %7293 = vmatpush1.bf16.msra.mxu0 %v9416_v7  ;;  %v2292_v7 = vrot.slane %v2290_v38, 5  ;;  %v2321_v60 = vor.u32 %v2320_v51, %v2317_v59  ;;  %v9467_v33 = vld [vmem:[%s10019_s7 + $0x670] ss:$8 sps:$4 sm:$0xff]   ;;  %v9473_v51 = vld [vmem:[%s10019_s7 + $0x680] ss:$8 sps:$4 sm:$0xff]  }
 0x1de   : > { %6683 = vmatpush1.bf16.msra.mxu1 %v9431_v43  ;;  %7294 = vmatprep.subr.bf16.mxu0 %v9424_v54  ;;  %v2287_v43 = vshrl.u32 %v11131_v20, 16  ;;  %v9463_v54 = vld [vmem:[%s10019_s7 + $0x664] ss:$8 sps:$4 sm:$0xff]   ;;  %v2163_v38 = vrot.slane %v2161_v31, 4  ;;  %v2093_v36 = vld [vmem:[#allocation2 + $0x78] sm:$0x11] }
 0x1df   : > { %6684 = vmatprep.subr.bf16.mxu1 %v9439_v39  ;;  %v1236_v39 = vsel %vm10547_vm3, %v7772_v18, %v1235_v27  ;;  %v2298_v18 = vrot.slane %v2296_v41, 5  ;;  %v11188_v27 = vrot.slane %v2321_v60, 4  ;;  %v9460_v52 = vld [vmem:[%s10019_s7 + $0xf54] ss:$8 sps:$4 sm:$0xff]   ;;  %v9466_v42 = vld [vmem:[%s10019_s7 + $0xf64] ss:$8 sps:$4 sm:$0xff]  }
 0x1e0   : > { %v2289_v17 = vrot.slane %v2287_v43, 4  ;;  %v7788_v48 = vcombine.high %v1228_v29, %v1236_v39  ;;  %v7787_v10 = vcombine.low %v1228_v29, %v1236_v39  ;;  %v2170_v29 = vshll.u32 %v2093_v36, 16  ;;  %v9452_v39 = vld [vmem:[%s10019_s7 + $0xf40] ss:$8 sps:$4 sm:$0xff]  }
 0x1e1   : > { %6650 = vmatmul.mubr.bf16.gmra.mrb[4].mxu1 %v7779_v30  ;;  %7295 = vmatpush1.bf16.msra.mxu0 %v9422_v16  ;;  %v11162_v30 = vld [vmem:[#allocation2 + $0x48] sm:$0xff]  ;;  %v2327_v59 = vsel %vm10212_vm0, %v11188_v27, %v2326_v47 }
 0x1e2   : > { %6685 = vmatpush1.bf16.msra.mxu1 %v9437_v44  ;;  %6659 = vmatprep.mubr.bf16.mxu1 %v7784_v37  ;;  %v9434_v44 = vld [vmem:[%s10019_s7 + $0xf10] ss:$8 sps:$4 sm:$0xff]   ;;  %v11169_v37 = vsel %vm10212_vm0, %v2238_v45, %v2242_v15  ;;  %v2293_v63 = vor.u32 %v2292_v7, %v2289_v17  ;;  %v2133_v6 = vshrl.u32 %v11162_v30, 16  ;;  %v2136_v9 = vshll.u32 %v11162_v30, 16  ;;  %v9481_v15 = vld [vmem:[%s10019_s7 + $0x694] ss:$8 sps:$4 sm:$0xff]  }
 0x1e3   : > { %6686 = vmatprep.subr.bf16.mxu1 %v9445_v53  ;;  %7337 = vmatprep.subr.bf16.mxu0 %v9430_v26  ;;  %v9455_v53 = vld [vmem:[%s10019_s7 + $0x650] ss:$8 sps:$4 sm:$0xff]   ;;  %v7878_v16 = vcombine.high %v11169_v37, %v11174_v61  ;;  %v7877_v45 = vcombine.low %v11169_v37, %v11174_v61  ;;  %v2172_v7 = vrot.slane %v2170_v29, 5  ;;  %v9493_v61 = vld [vmem:[%s10019_s7 + $0x6b4] ss:$8 sps:$4 sm:$0xff]  }
 0x1e4   : > { %7297 = vmatmul.mubr.bf16.vlgmr.msra.gmra.mrb[0].mxu0 %v7869_v49  ;;  %v2135_v26 = vrot.slane %v2133_v6, 4  ;;  %v2138_v43 = vrot.slane %v2136_v9, 5  ;;  %v2142_v49 = vshll.u32 %v2089_v5, 16  ;;  %v9499_v6 = vld [vmem:[%s10019_s7 + $0x6c4] ss:$8 sps:$4 sm:$0xff]  }
 0x1e5   : > { %7338 = vmatpush1.bf16.msra.mxu0 %v9428_v14  ;;  %7306 = vmatprep.mubr.bf16.mxu0 %v7874_v24  ;;  %v2166_v14 = vrot.slane %v2164_v11, 5  ;;  %v9478_v9 = vld [vmem:[%s10019_s7 + $0xf84] ss:$8 sps:$4 sm:$0xff]   ;;  %v9476_v31 = vld [vmem:[%s10019_s7 + $0xf80] ss:$8 sps:$4 sm:$0xff]  }
 0x1e6   : > { %6687 = vmatpush1.bf16.msra.mxu1 %v9443_v58  ;;  %7339 = vmatprep.subr.bf16.mxu0 %v9436_v55  ;;  %v9440_v58 = vld [vmem:[%s10019_s7 + $0xf20] ss:$8 sps:$4 sm:$0xff]   ;;  %v2144_v32 = vrot.slane %v2142_v49, 5  ;;  %v9496_v5 = vld [vmem:[%s10019_s7 + $0xfb4] ss:$8 sps:$4 sm:$0xff]  }
 0x1e7   : > { %6688 = vmatprep.subr.bf16.mxu1 %v9451_v22  ;;  %v2294_v22 = vrot.slane %v2293_v63, 4  ;;  %v9472_v63 = vld [vmem:[%s10019_s7 + $0xf74] ss:$8 sps:$4 sm:$0xff]   ;;  %v9497_v11 = vld [vmem:[%s10019_s7 + $0x6c0] ss:$8 sps:$4 sm:$0xff]  }
 0x1e8   : > { %v9488_v47 = vld [vmem:[%s10019_s7 + $0xfa0] ss:$8 sps:$4 sm:$0xff]  }
 0x1e9   : > { %6660 = vmatmul.mubr.bf16.gmra.mrb[8].mxu1 %v7783_v34  ;;  %7340 = vmatpush1.bf16.msra.mxu0 %v9434_v44  ;;  %v9475_v34 = vld [vmem:[%s10019_s7 + $0x684] ss:$8 sps:$4 sm:$0xff]   ;;  %v2299_v55 = vsel %vm10212_vm0, %v2294_v22, %v2298_v18  ;;  %v9458_v44 = vld [vmem:[%s10019_s7 + $0xf50] ss:$8 sps:$4 sm:$0xff]   ;;  %v9509_v22 = vld [vmem:[%s10019_s7 + $0x6e0] ss:$8 sps:$4 sm:$0xff]  }
 0x1ea   : > { %6689 = vmatpush1.bf16.msra.mxu1 %v9449_v8  ;;  %6669 = vmatprep.mubr.bf16.mxu1 %v7788_v48  ;;  %v2139_v8 = vor.u32 %v2138_v43, %v2135_v26  ;;  %v7882_v3 = vcombine.high %v2299_v55, %v2327_v59  ;;  %v9487_v48 = vld [vmem:[%s10019_s7 + $0x6a4] ss:$8 sps:$4 sm:$0xff]   ;;  %v7881_v60 = vcombine.low %v2299_v55, %v2327_v59  ;;  %v9515_v26 = vld [vmem:[%s10019_s7 + $0x6f0] ss:$8 sps:$4 sm:$0xff]   ;;  %v9521_v29 = vld [vmem:[%s10019_s7 + $0x700] ss:$8 sps:$4 sm:$0xff]  }
 0x1eb   : > { %6690 = vmatprep.subr.bf16.mxu1 %v9457_v40  ;;  %7341 = vmatprep.subr.bf16.mxu0 %v9442_v57  ;;  %v2167_v40 = vor.u32 %v2166_v14, %v2163_v38  ;;  %v9464_v57 = vld [vmem:[%s10019_s7 + $0xf60] ss:$8 sps:$4 sm:$0xff]   ;;  %v9511_v18 = vld [vmem:[%s10019_s7 + $0x6e4] ss:$8 sps:$4 sm:$0xff]   ;;  %v9494_v38 = vld [vmem:[%s10019_s7 + $0xfb0] ss:$8 sps:$4 sm:$0xff]  }
 0x1ec   : > { %7307 = vmatmul.mubr.bf16.gmra.mrb[4].mxu0 %v7873_v21  ;;  %v2140_v24 = vrot.slane %v2139_v8, 4  ;;  %v9503_v21 = vld [vmem:[%s10019_s7 + $0x6d0] ss:$8 sps:$4 sm:$0xff]   ;;  %v11246_v43 = vld [vmem:[#allocation2 + $0xa8] sm:$0xff]  ;;  %v9715_v59 = vld [vmem:[#allocation2 + $0x40] sm:$0xff] }
 0x1ed   : > { %7342 = vmatpush1.bf16.msra.mxu0 %v9440_v58  ;;  %7316 = vmatprep.mubr.bf16.mxu0 %v7878_v16  ;;  %v2168_v17 = vrot.slane %v2167_v40, 4  ;;  %v9470_v58 = vld [vmem:[%s10019_s7 + $0xf70] ss:$8 sps:$4 sm:$0xff]   ;;  %v9490_v16 = vld [vmem:[%s10019_s7 + $0xfa4] ss:$8 sps:$4 sm:$0xff]   ;;  %v7789_v49 = vcombine.low %v11177_v62, %v9715_v59  ;;  %v2217_v55 = vshrl.u32 %v11246_v43, 16 }
 0x1ee   : > { %6691 = vmatpush1.bf16.msra.mxu1 %v9455_v53  ;;  %7343 = vmatprep.subr.bf16.mxu0 %v9448_v12  ;;  %v9479_v53 = vld [vmem:[%s10019_s7 + $0x690] ss:$8 sps:$4 sm:$0xff]   ;;  %v11216_v37 = vsel %vm10212_vm0, %v2140_v24, %v2144_v32  ;;  %v9505_v12 = vld [vmem:[%s10019_s7 + $0x6d4] ss:$8 sps:$4 sm:$0xff]   ;;  %v9523_v14 = vld [vmem:[%s10019_s7 + $0x704] ss:$8 sps:$4 sm:$0xff]  }
 0x1ef   : > { %6692 = vmatprep.subr.bf16.mxu1 %v9463_v54  ;;  %v9485_v54 = vld [vmem:[%s10019_s7 + $0x6a0] ss:$8 sps:$4 sm:$0xff]   ;;  %v11220_v41 = vsel %vm10212_vm0, %v2168_v17, %v2172_v7  ;;  %v2220_v8 = vshll.u32 %v11246_v43, 16  ;;  %v9508_v40 = vld [vmem:[%s10019_s7 + $0xfd4] ss:$8 sps:$4 sm:$0xff]   ;;  %v2219_v17 = vrot.slane %v2217_v55, 4 }
 0x1f0   : > { %v7872_v2 = vcombine.high %v11216_v37, %v11220_v41  ;;  %v9506_v24 = vld [vmem:[%s10019_s7 + $0xfd0] ss:$8 sps:$4 sm:$0xff]  }
 0x1f1   : > { %6670 = vmatmul.mubr.bf16.gmra.mrb[12].mxu1 %v7787_v10  ;;  %7344 = vmatpush1.bf16.msra.mxu0 %v9446_v35  ;;  %v9491_v10 = vld [vmem:[%s10019_s7 + $0x6b0] ss:$8 sps:$4 sm:$0xff]   ;;  %v11243_v35 = vld [vmem:[#allocation2 + $0x88] sm:$0xff]  ;;  %v2222_v7 = vrot.slane %v2220_v8, 5 }
 0x1f2   : > { %6693 = vmatpush1.bf16.msra.mxu1 %v9461_v19  ;;  %6712 = vmatprep.mubr.bf16.mxu1 %v7790_v25  ;;  %v9484_v19 = vld [vmem:[%s10019_s7 + $0xf94] ss:$8 sps:$4 sm:$0xff]   ;;  %v2189_v36 = vshrl.u32 %v11243_v35, 16  ;;  %v9527_v32 = vld [vmem:[%s10019_s7 + $0x710] ss:$8 sps:$4 sm:$0xff]  }
 0x1f3   : > { %6694 = vmatprep.subr.bf16.mxu1 %v9469_v13  ;;  %7345 = vmatprep.subr.bf16.mxu0 %v9454_v1  ;;  %v9482_v13 = vld [vmem:[%s10019_s7 + $0xf90] ss:$8 sps:$4 sm:$0xff]   ;;  %v9517_v25 = vld [vmem:[%s10019_s7 + $0x6f4] ss:$8 sps:$4 sm:$0xff]   ;;  %v9500_v1 = vld [vmem:[%s10019_s7 + $0xfc0] ss:$8 sps:$4 sm:$0xff]  }
 0x1f4   : > { %7317 = vmatmul.mubr.bf16.gmra.mrb[8].mxu0 %v7877_v45  ;;  %v2191_v62 = vrot.slane %v2189_v36, 4  ;;  %v9547_v36 = vld [vmem:[%s10019_s7 + $0x744] ss:$8 sps:$4 sm:$0xff]  }
 0x1f5   : > { %7346 = vmatpush1.bf16.msra.mxu0 %v9452_v39  ;;  %7326 = vmatprep.mubr.bf16.mxu0 %v7882_v3  ;;  %v9529_v39 = vld [vmem:[%s10019_s7 + $0x714] ss:$8 sps:$4 sm:$0xff]  }
 0x1f6   : > { %6695 = vmatpush1.bf16.msra.mxu1 %v9467_v33  ;;  %7347 = vmatprep.subr.bf16.mxu0 %v9460_v52  ;;  %v9502_v33 = vld [vmem:[%s10019_s7 + $0xfc4] ss:$8 sps:$4 sm:$0xff]   ;;  %v2101_v52 = vld [vmem:[#allocation2 + $0xb8] sm:$0x11] }
 0x1f7   : > { %6696 = vmatprep.subr.bf16.mxu1 %v9475_v34  ;;  %v2192_v34 = vshll.u32 %v11243_v35, 16 }
 0x1f9   : > { %7348 = vmatpush1.bf16.msra.mxu0 %v9458_v44  ;;  %v2194_v3 = vrot.slane %v2192_v34, 5  ;;  %v11263_v44 = vld [vmem:[#allocation2 + $0xc8] sm:$0xff]  ;;  %v7797_v34 = vcombine.low %v11078_v46, %v11100_v23 }
 0x1fa   : > { %6697 = vmatpush1.bf16.msra.mxu1 %v9473_v51  ;;  %7349 = vmatprep.subr.bf16.mxu0 %v9466_v42  ;;  %v9716_v51 = vld [vmem:[#allocation2 + $0x60] sm:$0xff] }
 0x1fb   : > { %6698 = vmatprep.subr.bf16.mxu1 %v9481_v15  ;;  %v7794_v45 = vcombine.high %v9716_v51, %v11072_v28  ;;  %v2097_v15 = vld [vmem:[#allocation2 + $0x98] sm:$0x11] }
 0x1fc   : > { %7327 = vmatmul.mubr.bf16.gmra.mrb[12].mxu0 %v7881_v60  ;;  %v2198_v42 = vshll.u32 %v2097_v15, 16  ;;  %v9514_v60 = vld [vmem:[%s10019_s7 + $0xfe4] ss:$8 sps:$4 sm:$0xff]   ;;  %v9545_v15 = vld [vmem:[%s10019_s7 + $0x740] ss:$8 sps:$4 sm:$0xff]  }
 0x1fd   : > { %7350 = vmatpush1.bf16.msra.mxu0 %v9464_v57  ;;  %7369 = vmatprep.mubr.bf16.mxu0 %v7872_v2  ;;  %v2195_v57 = vor.u32 %v2194_v3, %v2191_v62  ;;  %v9512_v2 = vld [vmem:[%s10019_s7 + $0xfe0] ss:$8 sps:$4 sm:$0xff]   ;;  %v9551_v62 = vld [vmem:[%s10019_s7 + $0x750] ss:$8 sps:$4 sm:$0xff]  }
 0x1fe   : > { %6699 = vmatpush1.bf16.msra.mxu1 %v9479_v53  ;;  %7351 = vmatprep.subr.bf16.mxu0 %v9472_v63  ;;  %v11265_v53 = vld [vmem:[#allocation2 + $0xe8] sm:$0xff]  ;;  %v2248_v63 = vshll.u32 %v11263_v44, 16 }
 0x1ff   : > { %6700 = vmatprep.subr.bf16.mxu1 %v9487_v48  ;;  %v9535_v48 = vld [vmem:[%s10019_s7 + $0x724] ss:$8 sps:$4 sm:$0xff]  }
 0x201   : > { %7352 = vmatpush1.bf16.msra.mxu0 %v9470_v58  ;;  %v7793_v58 = vcombine.low %v9716_v51, %v11072_v28  ;;  %v2196_v28 = vrot.slane %v2195_v57, 4  ;;  %v9559_v57 = vld [vmem:[%s10019_s7 + $0x764] ss:$8 sps:$4 sm:$0xff]  }
 0x202   : > { %6701 = vmatpush1.bf16.msra.mxu1 %v9485_v54  ;;  %7353 = vmatprep.subr.bf16.mxu0 %v9478_v9  ;;  %v2226_v54 = vshll.u32 %v2101_v52, 16  ;;  %v2276_v9 = vshll.u32 %v11265_v53, 16  ;;  %v9553_v52 = vld [vmem:[%s10019_s7 + $0x754] ss:$8 sps:$4 sm:$0xff]  }
 0x203   : > { %6702 = vmatprep.subr.bf16.mxu1 %v9493_v61  ;;  %v2245_v61 = vshrl.u32 %v11263_v44, 16 }
 0x205   : > { %7354 = vmatpush1.bf16.msra.mxu0 %v9476_v31  ;;  %v9520_v31 = vld [vmem:[%s10019_s7 + $0xff4] ss:$8 sps:$4 sm:$0xff]  }
 0x206   : > { %6703 = vmatpush1.bf16.msra.mxu1 %v9491_v10  ;;  %7355 = vmatprep.subr.bf16.mxu0 %v9484_v19  ;;  %v2223_v10 = vor.u32 %v2222_v7, %v2219_v17  ;;  %v9541_v19 = vld [vmem:[%s10019_s7 + $0x734] ss:$8 sps:$4 sm:$0xff]   ;;  %v9530_v7 = vld [vmem:[%s10019_s7 + $0x1010] ss:$8 sps:$4 sm:$0xff]  }
 0x207   : > { %6704 = vmatprep.subr.bf16.mxu1 %v9499_v6  ;;  %v2273_v6 = vshrl.u32 %v11265_v53, 16 }
 0x209   : > { %7356 = vmatpush1.bf16.msra.mxu0 %v9482_v13  ;;  %v2228_v13 = vrot.slane %v2226_v54, 5 }
 0x20a   : > { %6705 = vmatpush1.bf16.msra.mxu1 %v9497_v11  ;;  %7357 = vmatprep.subr.bf16.mxu0 %v9490_v16  ;;  %v9533_v11 = vld [vmem:[%s10019_s7 + $0x720] ss:$8 sps:$4 sm:$0xff]   ;;  %v2105_v16 = vld [vmem:[#allocation2 + $0xd8] sm:$0x11] }
 0x20b   : > { %6706 = vmatprep.subr.bf16.mxu1 %v9505_v12  ;;  %v7798_v12 = vcombine.high %v11078_v46, %v11100_v23  ;;  %v2254_v55 = vshll.u32 %v2105_v16, 16  ;;  %v7871_v23 = vcombine.low %v11216_v37, %v11220_v41  ;;  %v7802_v37 = vcombine.high %v11102_v4, %v11131_v20  ;;  %v2113_v41 = vld [vmem:[#allocation2 + $0x118] sm:$0x11] }
 0x20d   : > { %7358 = vmatpush1.bf16.msra.mxu0 %v9488_v47  ;;  %v2250_v47 = vrot.slane %v2248_v63, 5 }
 0x20e   : > { %6707 = vmatpush1.bf16.msra.mxu1 %v9503_v21  ;;  %7359 = vmatprep.subr.bf16.mxu0 %v9496_v5  ;;  %v2200_v21 = vrot.slane %v2198_v42, 5  ;;  %v2224_v5 = vrot.slane %v2223_v10, 4 }
 0x20f   : > { %6708 = vmatprep.subr.bf16.mxu1 %v9511_v18  ;;  %v9539_v18 = vld [vmem:[%s10019_s7 + $0x730] ss:$8 sps:$4 sm:$0xff]  }
 0x210   : > { %v11290_v59 = vsel %vm10212_vm0, %v2196_v28, %v2200_v21 }
 0x211   : > { %7360 = vmatpush1.bf16.msra.mxu0 %v9494_v38  ;;  %v2275_v38 = vrot.slane %v2273_v6, 4  ;;  %v2310_v6 = vshll.u32 %v2113_v41, 16  ;;  %v9587_v41 = vld [vmem:[%s10019_s7 + $0x7b0] ss:$8 sps:$4 sm:$0xff]  }
 0x212   : > { %6709 = vmatpush1.bf16.msra.mxu1 %v9509_v22  ;;  %7361 = vmatprep.subr.bf16.mxu0 %v9502_v33  ;;  %v2247_v22 = vrot.slane %v2245_v61, 4  ;;  %v11282_v33 = vld [vmem:[#allocation2 + $0x108] sm:$0xff] }
 0x213   : > { %6710 = vmatprep.subr.bf16.mxu1 %v9517_v25  ;;  %v9518_v25 = vld [vmem:[%s10019_s7 + $0xff0] ss:$8 sps:$4 sm:$0xff]   ;;  %v2301_v51 = vshrl.u32 %v11282_v33, 16  ;;  %v2304_v46 = vshll.u32 %v11282_v33, 16  ;;  %v9538_v61 = vld [vmem:[%s10019_s7 + $0x1024] ss:$8 sps:$4 sm:$0xff]  }
 0x215   : > { %7362 = vmatpush1.bf16.msra.mxu0 %v9500_v1  ;;  %v9526_v1 = vld [vmem:[%s10019_s7 + $0x1004] ss:$8 sps:$4 sm:$0xff]   ;;  %v2303_v42 = vrot.slane %v2301_v51, 4  ;;  %v2306_v54 = vrot.slane %v2304_v46, 5 }
 0x216   : > { %6711 = vmatpush1.bf16.msra.mxu1 %v9515_v26  ;;  %7363 = vmatprep.subr.bf16.mxu0 %v9508_v40  ;;  %v2109_v26 = vld [vmem:[#allocation2 + $0xf8] sm:$0x11]  ;;  %v9524_v40 = vld [vmem:[%s10019_s7 + $0x1000] ss:$8 sps:$4 sm:$0xff]  }
 0x217   : > { %6753 = vmatprep.subr.bf16.mxu1 %v9523_v14  ;;  %v2278_v14 = vrot.slane %v2276_v9, 5  ;;  %v2282_v8 = vshll.u32 %v2109_v26, 16  ;;  %v9569_v26 = vld [vmem:[%s10019_s7 + $0x780] ss:$8 sps:$4 sm:$0xff]  }
 0x219   : > { %6713 = vmatmul.mubr.bf16.vlgmr.msra.gmra.mrb[0].mxu1 %v7789_v49  ;;  %7364 = vmatpush1.bf16.msra.mxu0 %v9506_v24  ;;  %v2251_v49 = vor.u32 %v2250_v47, %v2247_v22  ;;  %v2284_v17 = vrot.slane %v2282_v8, 5  ;;  %v9563_v22 = vld [vmem:[%s10019_s7 + $0x770] ss:$8 sps:$4 sm:$0xff]   ;;  %v9577_v8 = vld [vmem:[%s10019_s7 + $0x794] ss:$8 sps:$4 sm:$0xff]  }
 0x21a   : > { %6754 = vmatpush1.bf16.msra.mxu1 %v9521_v29  ;;  %6722 = vmatprep.mubr.bf16.mxu1 %v7794_v45  ;;  %v2229_v29 = vsel %vm10212_vm0, %v2224_v5, %v2228_v13  ;;  %v9532_v45 = vld [vmem:[%s10019_s7 + $0x1014] ss:$8 sps:$4 sm:$0xff]   ;;  %v9542_v47 = vld [vmem:[%s10019_s7 + $0x1030] ss:$8 sps:$4 sm:$0xff]   ;;  %v9550_v5 = vld [vmem:[%s10019_s7 + $0x1044] ss:$8 sps:$4 sm:$0xff]  }
 0x21b   : > { %6755 = vmatprep.subr.bf16.mxu1 %v9529_v39  ;;  %7365 = vmatprep.subr.bf16.mxu0 %v9514_v60  ;;  %v2279_v39 = vor.u32 %v2278_v14, %v2275_v38  ;;  %v7876_v3 = vcombine.high %v11290_v59, %v2229_v29  ;;  %v2252_v24 = vrot.slane %v2251_v49, 4  ;;  %v2117_v60 = vld [vmem:[#allocation2 + $0x138] sm:$0x11]  ;;  %v2428_v49 = vld [vmem:[#allocation2 + $0x70] sm:$0x11] }
 0x21c   : > { %v2338_v9 = vshll.u32 %v2117_v60, 16  ;;  %v2496_v46 = vrot.slane %v2428_v49, 5  ;;  %v9574_v60 = vld [vmem:[%s10019_s7 + $0x1084] ss:$8 sps:$4 sm:$0xff]  }
 0x21d   : > { %7366 = vmatpush1.bf16.msra.mxu0 %v9512_v2  ;;  %v7801_v2 = vcombine.low %v11102_v4, %v11131_v20  ;;  %v9565_v4 = vld [vmem:[%s10019_s7 + $0x774] ss:$8 sps:$4 sm:$0xff]   ;;  %v2434_v49 = vld [vmem:[#allocation2 + $0xa0] sm:$0xee] }
 0x21e   : > { %6756 = vmatpush1.bf16.msra.mxu1 %v9527_v32  ;;  %7367 = vmatprep.subr.bf16.mxu0 %v9520_v31  ;;  %v2256_v32 = vrot.slane %v2254_v55, 5  ;;  %v9557_v31 = vld [vmem:[%s10019_s7 + $0x760] ss:$8 sps:$4 sm:$0xff]   ;;  %v9544_v20 = vld [vmem:[%s10019_s7 + $0x1034] ss:$8 sps:$4 sm:$0xff]   ;;  %v2340_v28 = vrot.slane %v2338_v9, 5 }
 0x21f   : > { %6757 = vmatprep.subr.bf16.mxu1 %v9535_v48  ;;  %v2280_v48 = vrot.slane %v2279_v39, 4  ;;  %v9548_v55 = vld [vmem:[%s10019_s7 + $0x1040] ss:$8 sps:$4 sm:$0xff]   ;;  %v9586_v9 = vld [vmem:[%s10019_s7 + $0x10a4] ss:$8 sps:$4 sm:$0xff]  }
 0x220   : > { %v2257_v63 = vsel %vm10212_vm0, %v2252_v24, %v2256_v32  ;;  %v2341_v14 = vsel %vm10212_vm0, %v11188_v27, %v2340_v28  ;;  %v9560_v24 = vld [vmem:[%s10019_s7 + $0x1060] ss:$8 sps:$4 sm:$0xff]  }
 0x221   : > { %6723 = vmatmul.mubr.bf16.gmra.mrb[4].mxu1 %v7793_v58  ;;  %7368 = vmatpush1.bf16.msra.mxu0 %v9518_v25  ;;  %v2285_v10 = vsel %vm10212_vm0, %v2280_v48, %v2284_v17  ;;  %v2307_v58 = vor.u32 %v2306_v54, %v2303_v42  ;;  %v9571_v25 = vld [vmem:[%s10019_s7 + $0x784] ss:$8 sps:$4 sm:$0xff]   ;;  %v9581_v32 = vld [vmem:[%s10019_s7 + $0x7a0] ss:$8 sps:$4 sm:$0xff]   ;;  %v9568_v48 = vld [vmem:[%s10019_s7 + $0x1074] ss:$8 sps:$4 sm:$0xff]  }
 0x222   : > { %6758 = vmatpush1.bf16.msra.mxu1 %v9533_v11  ;;  %6732 = vmatprep.mubr.bf16.mxu1 %v7798_v12  ;;  %v7875_v11 = vcombine.low %v11290_v59, %v2229_v29  ;;  %v11317_v12 = vld [vmem:[#allocation2 + $0x28] sm:$0xff]  ;;  %v7880_v21 = vcombine.high %v2257_v63, %v2285_v10  ;;  %v2426_v59 = vld [vmem:[#allocation2 + $0x60] sm:$0xee]  ;;  %v9566_v42 = vld [vmem:[%s10019_s7 + $0x1070] ss:$8 sps:$4 sm:$0xff]  }
 0x223   : > { %6759 = vmatprep.subr.bf16.mxu1 %v9541_v19  ;;  %7410 = vmatprep.subr.bf16.mxu0 %v9526_v1  ;;  %v9536_v19 = vld [vmem:[%s10019_s7 + $0x1020] ss:$8 sps:$4 sm:$0xff]   ;;  %v2308_v13 = vrot.slane %v2307_v58, 4  ;;  %v7792_v16 = vcombine.high %v11317_v12, %v11162_v30  ;;  %v7879_v1 = vcombine.low %v2257_v63, %v2285_v10  ;;  %v7887_v51 = vrot.slane %v2426_v59, 9  ;;  %v9595_v54 = vld [vmem:[%s10019_s7 + $0x7c4] ss:$8 sps:$4 sm:$0xff]  }
 0x224   : > { %7370 = vmatmul.mubr.bf16.vlgmr.msra.gmra.mrb[0].mxu0 %v7871_v23  ;;  %v9575_v23 = vld [vmem:[%s10019_s7 + $0x790] ss:$8 sps:$4 sm:$0xff]   ;;  %v9601_v63 = vld [vmem:[%s10019_s7 + $0x7d4] ss:$8 sps:$4 sm:$0xff]   ;;  %v7791_v28 = vcombine.low %v11317_v12, %v11162_v30  ;;  %v9631_v30 = vld [vmem:[%s10019_s7 + $0x824] ss:$8 sps:$4 sm:$0xff]  }
 0x225   : > { %7411 = vmatpush1.bf16.msra.mxu0 %v9524_v40  ;;  %7379 = vmatprep.mubr.bf16.mxu0 %v7876_v3  ;;  %v9556_v40 = vld [vmem:[%s10019_s7 + $0x1054] ss:$8 sps:$4 sm:$0xff]   ;;  %v11347_v3 = vsel %vm10547_vm3, %v7887_v51, %v2496_v46  ;;  %v9599_v10 = vld [vmem:[%s10019_s7 + $0x7d0] ss:$8 sps:$4 sm:$0xff]   ;;  %v1429_v12 = vld [vmem:[#allocation2 + $0x20] sm:$0xff] }
 0x226   : > { %6760 = vmatpush1.bf16.msra.mxu1 %v9539_v18  ;;  %7412 = vmatprep.subr.bf16.mxu0 %v9532_v45  ;;  %v2312_v18 = vrot.slane %v2310_v6, 5  ;;  %v9554_v45 = vld [vmem:[%s10019_s7 + $0x1050] ss:$8 sps:$4 sm:$0xff]   ;;  %v9607_v6 = vld [vmem:[%s10019_s7 + $0x7e4] ss:$8 sps:$4 sm:$0xff]  }
 0x227   : > { %6761 = vmatprep.subr.bf16.mxu1 %v9547_v36  ;;  %v2422_v36 = vld [vmem:[#allocation2 + $0x40] sm:$0xee]  ;;  %v9578_v58 = vld [vmem:[%s10019_s7 + $0x1090] ss:$8 sps:$4 sm:$0xff]  }
 0x228   : > { %v2313_v38 = vsel %vm10212_vm0, %v2308_v13, %v2312_v18  ;;  %v7885_v39 = vrot.slane %v2422_v36, 9  ;;  %v9619_v13 = vld [vmem:[%s10019_s7 + $0x804] ss:$8 sps:$4 sm:$0xff]   ;;  %v2432_v59 = vld [vmem:[#allocation2 + $0x90] sm:$0x11] }
 0x229   : > { %6733 = vmatmul.mubr.bf16.gmra.mrb[8].mxu1 %v7797_v34  ;;  %7413 = vmatpush1.bf16.msra.mxu0 %v9530_v7  ;;  %v2424_v34 = vld [vmem:[#allocation2 + $0x50] sm:$0x11]  ;;  %v7884_v29 = vcombine.high %v2313_v38, %v2341_v14  ;;  %v7883_v17 = vcombine.low %v2313_v38, %v2341_v14  ;;  %v9598_v18 = vld [vmem:[%s10019_s7 + $0x10c4] ss:$8 sps:$4 sm:$0xff]   ;;  %v9608_v46 = vld [vmem:[%s10019_s7 + $0x10e0] ss:$8 sps:$4 sm:$0xff]  }
 0x22a   : > { %6762 = vmatpush1.bf16.msra.mxu1 %v9545_v15  ;;  %6742 = vmatprep.mubr.bf16.mxu1 %v7802_v37  ;;  %v2488_v27 = vrot.slane %v2424_v34, 5  ;;  %v9583_v15 = vld [vmem:[%s10019_s7 + $0x7a4] ss:$8 sps:$4 sm:$0xff]   ;;  %v9589_v7 = vld [vmem:[%s10019_s7 + $0x7b4] ss:$8 sps:$4 sm:$0xff]  }
 0x22b   : > { %6763 = vmatprep.subr.bf16.mxu1 %v9553_v52  ;;  %7414 = vmatprep.subr.bf16.mxu0 %v9538_v61  ;;  %v9562_v52 = vld [vmem:[%s10019_s7 + $0x1064] ss:$8 sps:$4 sm:$0xff]   ;;  %v9572_v61 = vld [vmem:[%s10019_s7 + $0x1080] ss:$8 sps:$4 sm:$0xff]   ;;  %v9623_v38 = vld [vmem:[%s10019_s7 + $0x810] ss:$8 sps:$4 sm:$0xff]  }
 0x22c   : > { %7380 = vmatmul.mubr.bf16.gmra.mrb[4].mxu0 %v7875_v11  ;;  %v9584_v11 = vld [vmem:[%s10019_s7 + $0x10a0] ss:$8 sps:$4 sm:$0xff]   ;;  %v9610_v36 = vld [vmem:[%s10019_s7 + $0x10e4] ss:$8 sps:$4 sm:$0xff]  }
 0x22d   : > { %7415 = vmatpush1.bf16.msra.mxu0 %v9536_v19  ;;  %7389 = vmatprep.mubr.bf16.mxu0 %v7880_v21  ;;  %v9613_v19 = vld [vmem:[%s10019_s7 + $0x7f4] ss:$8 sps:$4 sm:$0xff]   ;;  %v9590_v21 = vld [vmem:[%s10019_s7 + $0x10b0] ss:$8 sps:$4 sm:$0xff]   ;;  %v1433_v14 = vld [vmem:[#allocation2 + $0x40] sm:$0xff] }
 0x22e   : > { %6764 = vmatpush1.bf16.msra.mxu1 %v9551_v62  ;;  %7416 = vmatprep.subr.bf16.mxu0 %v9544_v20  ;;  %v11343_v62 = vsel %vm10547_vm3, %v7885_v39, %v2488_v27  ;;  %v9611_v20 = vld [vmem:[%s10019_s7 + $0x7f0] ss:$8 sps:$4 sm:$0xff]   ;;  %v9629_v34 = vld [vmem:[%s10019_s7 + $0x820] ss:$8 sps:$4 sm:$0xff]   ;;  %v1465_v39 = vshll.u32 %v1429_v12, 16  ;;  %v1490_v27 = vshrl.u32 %v1433_v14, 16 }
 0x22f   : > { %6765 = vmatprep.subr.bf16.mxu1 %v9559_v57  ;;  %v7902_v37 = vcombine.high %v11343_v62, %v11347_v3  ;;  %v9593_v57 = vld [vmem:[%s10019_s7 + $0x7c0] ss:$8 sps:$4 sm:$0xff]   ;;  %v1493_v51 = vshll.u32 %v1433_v14, 16 }
 0x230   : > { %v9653_v14 = vld [vmem:[%s10019_s7 + $0x860] ss:$8 sps:$4 sm:$0xff]  }
 0x231   : > { %6743 = vmatmul.mubr.bf16.gmra.mrb[12].mxu1 %v7801_v2  ;;  %7417 = vmatpush1.bf16.msra.mxu0 %v9542_v47  ;;  %v9580_v2 = vld [vmem:[%s10019_s7 + $0x1094] ss:$8 sps:$4 sm:$0xff]   ;;  %v9596_v47 = vld [vmem:[%s10019_s7 + $0x10c0] ss:$8 sps:$4 sm:$0xff]  }
 0x232   : > { %6766 = vmatpush1.bf16.msra.mxu1 %v9557_v31  ;;  %6785 = vmatprep.mubr.bf16.mxu1 %v7792_v16  ;;  %v9605_v31 = vld [vmem:[%s10019_s7 + $0x7e0] ss:$8 sps:$4 sm:$0xff]  }
 0x233   : > { %6767 = vmatprep.subr.bf16.mxu1 %v9565_v4  ;;  %7418 = vmatprep.subr.bf16.mxu0 %v9550_v5  ;;  %v9592_v4 = vld [vmem:[%s10019_s7 + $0x10b4] ss:$8 sps:$4 sm:$0xff]   ;;  %v9617_v16 = vld [vmem:[%s10019_s7 + $0x800] ss:$8 sps:$4 sm:$0xff]  }
 0x234   : > { %7390 = vmatmul.mubr.bf16.gmra.mrb[8].mxu0 %v7879_v1  ;;  %v9604_v5 = vld [vmem:[%s10019_s7 + $0x10d4] ss:$8 sps:$4 sm:$0xff]   ;;  %v2430_v1 = vld [vmem:[#allocation2 + $0x80] sm:$0xee] }
 0x235   : > { %7419 = vmatpush1.bf16.msra.mxu0 %v9548_v55  ;;  %7399 = vmatprep.mubr.bf16.mxu0 %v7884_v29  ;;  %v7795_v55 = vcombine.low %v11164_v56, %v11243_v35  ;;  %v1462_v29 = vshrl.u32 %v1429_v12, 16  ;;  %v9634_v12 = vld [vmem:[%s10019_s7 + $0x1124] ss:$8 sps:$4 sm:$0xff]  }
 0x236   : > { %6768 = vmatpush1.bf16.msra.mxu1 %v9563_v22  ;;  %7420 = vmatprep.subr.bf16.mxu0 %v9556_v40  ;;  %v7796_v22 = vcombine.high %v11164_v56, %v11243_v35  ;;  %v2436_v40 = vld [vmem:[#allocation2 + $0xb0] sm:$0x11]  ;;  %v2504_v56 = vrot.slane %v2432_v59, 5  ;;  %v7891_v35 = vrot.slane %v2434_v49, 9  ;;  %v7803_v59 = vcombine.low %v11265_v53, %v11282_v33 }
 0x237   : > { %6769 = vmatprep.subr.bf16.mxu1 %v9571_v25  ;;  %v9625_v25 = vld [vmem:[%s10019_s7 + $0x814] ss:$8 sps:$4 sm:$0xff]  }
 0x239   : > { %7421 = vmatpush1.bf16.msra.mxu0 %v9554_v45  ;;  %v9616_v45 = vld [vmem:[%s10019_s7 + $0x10f4] ss:$8 sps:$4 sm:$0xff]  }
 0x23a   : > { %6770 = vmatpush1.bf16.msra.mxu1 %v9569_v26  ;;  %7422 = vmatprep.subr.bf16.mxu0 %v9562_v52  ;;  %v9602_v26 = vld [vmem:[%s10019_s7 + $0x10d0] ss:$8 sps:$4 sm:$0xff]   ;;  %v7889_v52 = vrot.slane %v2430_v1, 9  ;;  %v2446_v1 = vld [vmem:[#allocation2 + $0x100] sm:$0xee] }
 0x23b   : > { %6771 = vmatprep.subr.bf16.mxu1 %v9577_v8  ;;  %v7800_v8 = vcombine.high %v11246_v43, %v11263_v44 }
 0x23c   : > { %7400 = vmatmul.mubr.bf16.gmra.mrb[12].mxu0 %v7883_v17  ;;  %v1464_v17 = vrot.slane %v1462_v29, 4 }
 0x23d   : > { %7423 = vmatpush1.bf16.msra.mxu0 %v9560_v24  ;;  %7442 = vmatprep.mubr.bf16.mxu0 %v7902_v37  ;;  %v2512_v24 = vrot.slane %v2436_v40, 5  ;;  %v1495_v37 = vrot.slane %v1493_v51, 5  ;;  %v2452_v40 = vld [vmem:[#allocation2 + $0x130] sm:$0x11] }
 0x23e   : > { %6772 = vmatpush1.bf16.msra.mxu1 %v9575_v23  ;;  %7424 = vmatprep.subr.bf16.mxu0 %v9568_v48  ;;  %v9637_v23 = vld [vmem:[%s10019_s7 + $0x834] ss:$8 sps:$4 sm:$0xff]   ;;  %v1492_v48 = vrot.slane %v1490_v27, 4  ;;  %v9632_v27 = vld [vmem:[%s10019_s7 + $0x1120] ss:$8 sps:$4 sm:$0xff]  }
 0x23f   : > { %6773 = vmatprep.subr.bf16.mxu1 %v9583_v15  ;;  %v9614_v15 = vld [vmem:[%s10019_s7 + $0x10f0] ss:$8 sps:$4 sm:$0xff]  }
 0x241   : > { %7425 = vmatpush1.bf16.msra.mxu0 %v9566_v42  ;;  %v1431_v42 = vld [vmem:[#allocation2 + $0x30] sm:$0x11] }
 0x242   : > { %6774 = vmatpush1.bf16.msra.mxu1 %v9581_v32  ;;  %7426 = vmatprep.subr.bf16.mxu0 %v9574_v60  ;;  %v9635_v32 = vld [vmem:[%s10019_s7 + $0x830] ss:$8 sps:$4 sm:$0xff]   ;;  %v9622_v60 = vld [vmem:[%s10019_s7 + $0x1104] ss:$8 sps:$4 sm:$0xff]  }
 0x243   : > { %6775 = vmatprep.subr.bf16.mxu1 %v9589_v7  ;;  %v1467_v7 = vrot.slane %v1465_v39, 5 }
 0x245   : > { %7427 = vmatpush1.bf16.msra.mxu0 %v9572_v61  ;;  %v9641_v61 = vld [vmem:[%s10019_s7 + $0x840] ss:$8 sps:$4 sm:$0xff]  }
 0x246   : > { %6776 = vmatpush1.bf16.msra.mxu1 %v9587_v41  ;;  %7428 = vmatprep.subr.bf16.mxu0 %v9580_v2  ;;  %v9643_v41 = vld [vmem:[%s10019_s7 + $0x844] ss:$8 sps:$4 sm:$0xff]   ;;  %v11408_v2 = vsel %vm10547_vm3, %v7891_v35, %v2512_v24  ;;  %v9638_v35 = vld [vmem:[%s10019_s7 + $0x1130] ss:$8 sps:$4 sm:$0xff]  }
 0x247   : > { %6777 = vmatprep.subr.bf16.mxu1 %v9595_v54  ;;  %v1435_v54 = vld [vmem:[#allocation2 + $0x50] sm:$0x11]  ;;  %v9667_v24 = vld [vmem:[%s10019_s7 + $0x884] ss:$8 sps:$4 sm:$0xff]  }
 0x249   : > { %7429 = vmatpush1.bf16.msra.mxu0 %v9578_v58  ;;  %v2440_v58 = vld [vmem:[#allocation2 + $0xd0] sm:$0x11] }
 0x24a   : > { %6778 = vmatpush1.bf16.msra.mxu1 %v9593_v57  ;;  %7430 = vmatprep.subr.bf16.mxu0 %v9586_v9  ;;  %v7901_v57 = vcombine.low %v11343_v62, %v11347_v3  ;;  %v2442_v9 = vld [vmem:[#allocation2 + $0xe0] sm:$0xee]  ;;  %v1468_v62 = vor.u32 %v1467_v7, %v1464_v17  ;;  %v1471_v3 = vshll.u32 %v1431_v42, 16  ;;  %v2425_v42 = vld [vmem:[#allocation2 + $0x58] sm:$0x11] }
 0x24b   : > { %6779 = vmatprep.subr.bf16.mxu1 %v9601_v63  ;;  %v11404_v63 = vsel %vm10547_vm3, %v7889_v52, %v2504_v56  ;;  %v9659_v56 = vld [vmem:[%s10019_s7 + $0x870] ss:$8 sps:$4 sm:$0xff]   ;;  %v9665_v17 = vld [vmem:[%s10019_s7 + $0x880] ss:$8 sps:$4 sm:$0xff]  }
 0x24c   : > { %v7905_v49 = vcombine.low %v11404_v63, %v11408_v2 }
 0x24d   : > { %7431 = vmatpush1.bf16.msra.mxu0 %v9584_v11  ;;  %v1496_v11 = vor.u32 %v1495_v37, %v1492_v48  ;;  %v2423_v37 = vld [vmem:[#allocation2 + $0x48] sm:$0xee] }
 0x24e   : > { %6780 = vmatpush1.bf16.msra.mxu1 %v9599_v10  ;;  %7432 = vmatprep.subr.bf16.mxu0 %v9592_v4  ;;  %v2438_v10 = vld [vmem:[#allocation2 + $0xc0] sm:$0xee] }
 0x24f   : > { %6781 = vmatprep.subr.bf16.mxu1 %v9607_v6  ;;  %v7799_v6 = vcombine.low %v11246_v43, %v11263_v44  ;;  %v9620_v4 = vld [vmem:[%s10019_s7 + $0x1100] ss:$8 sps:$4 sm:$0xff]   ;;  %v7804_v43 = vcombine.high %v11265_v53, %v11282_v33  ;;  %v7893_v44 = vrot.slane %v2438_v10, 9  ;;  %v9661_v53 = vld [vmem:[%s10019_s7 + $0x874] ss:$8 sps:$4 sm:$0xff]   ;;  %v7886_v10 = vrot.slane %v2423_v37, 9 }
 0x250   : > { %v9640_v33 = vld [vmem:[%s10019_s7 + $0x1134] ss:$8 sps:$4 sm:$0xff]   ;;  %v9701_v37 = vld [vmem:[%s10019_s7 + $0x8e0] ss:$8 sps:$4 sm:$0xff]  }
 0x251   : > { %7433 = vmatpush1.bf16.msra.mxu0 %v9590_v21  ;;  %v9628_v21 = vld [vmem:[%s10019_s7 + $0x1114] ss:$8 sps:$4 sm:$0xff]  }
 0x252   : > { %6782 = vmatpush1.bf16.msra.mxu1 %v9605_v31  ;;  %7434 = vmatprep.subr.bf16.mxu0 %v9598_v18  ;;  %v2444_v31 = vld [vmem:[#allocation2 + $0xf0] sm:$0x11]  ;;  %v2520_v18 = vrot.slane %v2440_v58, 5  ;;  %v2492_v58 = vrot.slane %v2425_v42, 5 }
 0x253   : > { %6783 = vmatprep.subr.bf16.mxu1 %v9613_v19  ;;  %v1499_v19 = vshll.u32 %v1435_v54, 16  ;;  %v2427_v54 = vld [vmem:[#allocation2 + $0x68] sm:$0xee] }
 0x255   : > { %7435 = vmatpush1.bf16.msra.mxu0 %v9596_v47  ;;  %v1469_v47 = vrot.slane %v1468_v62, 4  ;;  %v9650_v62 = vld [vmem:[%s10019_s7 + $0x1150] ss:$8 sps:$4 sm:$0xff]  }
 0x256   : > { %6784 = vmatpush1.bf16.msra.mxu1 %v9611_v20  ;;  %7436 = vmatprep.subr.bf16.mxu0 %v9604_v5  ;;  %v9649_v20 = vld [vmem:[%s10019_s7 + $0x854] ss:$8 sps:$4 sm:$0xff]   ;;  %v1497_v5 = vrot.slane %v1496_v11, 4  ;;  %v9658_v11 = vld [vmem:[%s10019_s7 + $0x1164] ss:$8 sps:$4 sm:$0xff]  }
 0x257   : > { %6826 = vmatprep.subr.bf16.mxu1 %v9619_v13  ;;  %v7906_v13 = vcombine.high %v11404_v63, %v11408_v2  ;;  %v9652_v63 = vld [vmem:[%s10019_s7 + $0x1154] ss:$8 sps:$4 sm:$0xff]  }
 0x259   : > { %6786 = vmatmul.mubr.bf16.vlgmr.msra.gmra.mrb[0].mxu1 %v7791_v28  ;;  %7437 = vmatpush1.bf16.msra.mxu0 %v9602_v26  ;;  %v7895_v28 = vrot.slane %v2442_v9, 9  ;;  %v1501_v26 = vrot.slane %v1499_v19, 5  ;;  %v11463_v19 = vsel %vm10547_vm3, %v7886_v10, %v2492_v58  ;;  %v1451_v10 = vld [vmem:[#allocation2 + $0xd0] sm:$0x11] }
 0x25a   : > { %6827 = vmatpush1.bf16.msra.mxu1 %v9617_v16  ;;  %6795 = vmatprep.mubr.bf16.mxu1 %v7796_v22  ;;  %v2528_v16 = vrot.slane %v2444_v31, 5  ;;  %v9647_v22 = vld [vmem:[%s10019_s7 + $0x850] ss:$8 sps:$4 sm:$0xff]  }
 0x25b   : > { %6828 = vmatprep.subr.bf16.mxu1 %v9625_v25  ;;  %7438 = vmatprep.subr.bf16.mxu0 %v9610_v36  ;;  %v1473_v25 = vrot.slane %v1471_v3, 5  ;;  %v2521_v36 = vsel %vm10547_vm3, %v7893_v44, %v2520_v18  ;;  %v11438_v39 = vsel %vm10212_vm0, %v1497_v5, %v1501_v26  ;;  %v9671_v31 = vld [vmem:[%s10019_s7 + $0x890] ss:$8 sps:$4 sm:$0xff]   ;;  %v9679_v3 = vld [vmem:[%s10019_s7 + $0x8a4] ss:$8 sps:$4 sm:$0xff]  }
 0x25c   : > { %v9685_v44 = vld [vmem:[%s10019_s7 + $0x8b4] ss:$8 sps:$4 sm:$0xff]   ;;  %v1441_v18 = vld [vmem:[#allocation2 + $0x80] sm:$0xff] }
 0x25d   : > { %7439 = vmatpush1.bf16.msra.mxu0 %v9608_v46  ;;  %v11434_v29 = vsel %vm10212_vm0, %v1469_v47, %v1473_v25  ;;  %v7897_v46 = vrot.slane %v2446_v1, 9  ;;  %v9683_v25 = vld [vmem:[%s10019_s7 + $0x8b0] ss:$8 sps:$4 sm:$0xff]   ;;  %v1546_v5 = vshrl.u32 %v1441_v18, 16  ;;  %v1549_v26 = vshll.u32 %v1441_v18, 16 }
 0x25e   : > { %6829 = vmatpush1.bf16.msra.mxu1 %v9623_v38  ;;  %7440 = vmatprep.subr.bf16.mxu0 %v9616_v45  ;;  %v9626_v38 = vld [vmem:[%s10019_s7 + $0x1110] ss:$8 sps:$4 sm:$0xff]   ;;  %v7806_v52 = vcombine.high %v11434_v29, %v11438_v39  ;;  %v9689_v1 = vld [vmem:[%s10019_s7 + $0x8c0] ss:$8 sps:$4 sm:$0xff]  }
 0x25f   : > { %6830 = vmatprep.subr.bf16.mxu1 %v9631_v30  ;;  %v9655_v30 = vld [vmem:[%s10019_s7 + $0x864] ss:$8 sps:$4 sm:$0xff]   ;;  %v9686_v18 = vld [vmem:[%s10019_s7 + $0x11b0] ss:$8 sps:$4 sm:$0xff]  }
 0x261   : > { %6796 = vmatmul.mubr.bf16.gmra.mrb[4].mxu1 %v7795_v55  ;;  %7441 = vmatpush1.bf16.msra.mxu0 %v9614_v15  ;;  %v2448_v55 = vld [vmem:[#allocation2 + $0x110] sm:$0x11]  ;;  %v2544_v15 = vrot.slane %v2452_v40, 5 }
 0x262   : > { %6831 = vmatpush1.bf16.msra.mxu1 %v9629_v34  ;;  %6805 = vmatprep.mubr.bf16.mxu1 %v7800_v8  ;;  %v2529_v34 = vsel %vm10547_vm3, %v7895_v28, %v2528_v16  ;;  %v2450_v8 = vld [vmem:[#allocation2 + $0x120] sm:$0xee]  ;;  %v9664_v28 = vld [vmem:[%s10019_s7 + $0x1174] ss:$8 sps:$4 sm:$0xff]  }
 0x263   : > { %6832 = vmatprep.subr.bf16.mxu1 %v9637_v23  ;;  %7483 = vmatprep.subr.bf16.mxu0 %v9622_v60  ;;  %v7910_v51 = vcombine.high %v2521_v36, %v2529_v34  ;;  %v2536_v23 = vrot.slane %v2448_v55, 5  ;;  %v7899_v45 = vrot.slane %v2450_v8, 9  ;;  %v2429_v60 = vld [vmem:[#allocation2 + $0x78] sm:$0x11]  ;;  %v1551_v55 = vrot.slane %v1549_v26, 5 }
 0x264   : > { %7443 = vmatmul.mubr.bf16.vlgmr.msra.gmra.mrb[0].mxu0 %v7901_v57  ;;  %v9644_v57 = vld [vmem:[%s10019_s7 + $0x1140] ss:$8 sps:$4 sm:$0xff]   ;;  %v2500_v9 = vrot.slane %v2429_v60, 5  ;;  %v9697_v8 = vld [vmem:[%s10019_s7 + $0x8d4] ss:$8 sps:$4 sm:$0xff]  }
 0x265   : > { %7484 = vmatpush1.bf16.msra.mxu0 %v9620_v4  ;;  %7452 = vmatprep.mubr.bf16.mxu0 %v7906_v13  ;;  %v2537_v7 = vsel %vm10547_vm3, %v7897_v46, %v2536_v23  ;;  %v2545_v48 = vsel %vm10547_vm3, %v7899_v45, %v2544_v15  ;;  %v1437_v13 = vld [vmem:[#allocation2 + $0x60] sm:$0xff]  ;;  %v1443_v40 = vld [vmem:[#allocation2 + $0x90] sm:$0x11] }
 0x266   : > { %6833 = vmatpush1.bf16.msra.mxu1 %v9635_v32  ;;  %7485 = vmatprep.subr.bf16.mxu0 %v9628_v21  ;;  %v9646_v32 = vld [vmem:[%s10019_s7 + $0x1144] ss:$8 sps:$4 sm:$0xff]   ;;  %v7914_v2 = vcombine.high %v2537_v7, %v2545_v48  ;;  %v7913_v21 = vcombine.low %v2537_v7, %v2545_v48  ;;  %v1521_v47 = vshll.u32 %v1437_v13, 16  ;;  %v9695_v23 = vld [vmem:[%s10019_s7 + $0x8d0] ss:$8 sps:$4 sm:$0xff]   ;;  %v1555_v15 = vshll.u32 %v1443_v40, 16 }
 0x267   : > { %6834 = vmatprep.subr.bf16.mxu1 %v9643_v41  ;;  %v7909_v41 = vcombine.low %v2521_v36, %v2529_v34  ;;  %v9682_v7 = vld [vmem:[%s10019_s7 + $0x11a4] ss:$8 sps:$4 sm:$0xff]   ;;  %v9680_v48 = vld [vmem:[%s10019_s7 + $0x11a0] ss:$8 sps:$4 sm:$0xff]   ;;  %v1459_v40 = vld [vmem:[#allocation2 + $0x110] sm:$0x11] }
 0x268   : > { %v1523_v34 = vrot.slane %v1521_v47, 5 }
 0x269   : > { %6806 = vmatmul.mubr.bf16.gmra.mrb[8].mxu1 %v7799_v6  ;;  %7486 = vmatpush1.bf16.msra.mxu0 %v9626_v38  ;;  %v7888_v6 = vrot.slane %v2427_v54, 9  ;;  %v9662_v38 = vld [vmem:[%s10019_s7 + $0x1170] ss:$8 sps:$4 sm:$0xff]  }
 0x26a   : > { %6835 = vmatpush1.bf16.msra.mxu1 %v9641_v61  ;;  %6815 = vmatprep.mubr.bf16.mxu1 %v7804_v43  ;;  %v9673_v61 = vld [vmem:[%s10019_s7 + $0x894] ss:$8 sps:$4 sm:$0xff]   ;;  %v9656_v43 = vld [vmem:[%s10019_s7 + $0x1160] ss:$8 sps:$4 sm:$0xff]  }
 0x26b   : > { %6836 = vmatprep.subr.bf16.mxu1 %v9649_v20  ;;  %7487 = vmatprep.subr.bf16.mxu0 %v9634_v12  ;;  %v11467_v4 = vsel %vm10547_vm3, %v7888_v6, %v2500_v9  ;;  %v9677_v20 = vld [vmem:[%s10019_s7 + $0x8a0] ss:$8 sps:$4 sm:$0xff]   ;;  %v9670_v12 = vld [vmem:[%s10019_s7 + $0x1184] ss:$8 sps:$4 sm:$0xff]  }
 0x26c   : > { %7453 = vmatmul.mubr.bf16.gmra.mrb[4].mxu0 %v7905_v49  ;;  %v7904_v16 = vcombine.high %v11463_v19, %v11467_v4  ;;  %v1548_v49 = vrot.slane %v1546_v5, 4  ;;  %v1453_v9 = vld [vmem:[#allocation2 + $0xe0] sm:$0xff]  ;;  %v7805_v5 = vcombine.low %v11434_v29, %v11438_v39 }
 0x26d   : > { %7488 = vmatpush1.bf16.msra.mxu0 %v9632_v27  ;;  %7462 = vmatprep.mubr.bf16.mxu0 %v7910_v51  ;;  %v1445_v27 = vld [vmem:[#allocation2 + $0xa0] sm:$0xff] }
 0x26e   : > { %6837 = vmatpush1.bf16.msra.mxu1 %v9647_v22  ;;  %7489 = vmatprep.subr.bf16.mxu0 %v9640_v33  ;;  %v1518_v22 = vshrl.u32 %v1437_v13, 16  ;;  %v1449_v33 = vld [vmem:[#allocation2 + $0xc0] sm:$0xff]  ;;  %v1552_v45 = vor.u32 %v1551_v55, %v1548_v49 }
 0x26f   : > { %6838 = vmatprep.subr.bf16.mxu1 %v9655_v30  ;;  %v9691_v30 = vld [vmem:[%s10019_s7 + $0x8c4] ss:$8 sps:$4 sm:$0xff]  }
 0x270   : > { %v1520_v36 = vrot.slane %v1518_v22, 4  ;;  %v1553_v60 = vrot.slane %v1552_v45, 4  ;;  %v2431_v45 = vld [vmem:[#allocation2 + $0x88] sm:$0xee] }
 0x271   : > { %6816 = vmatmul.mubr.bf16.gmra.mrb[12].mxu1 %v7803_v59  ;;  %7490 = vmatpush1.bf16.msra.mxu0 %v9638_v35  ;;  %v1439_v59 = vld [vmem:[#allocation2 + $0x70] sm:$0x11] }
 0x272   : > { %6839 = vmatpush1.bf16.msra.mxu1 %v9653_v14  ;;  %6858 = vmatprep.mubr.bf16.mxu1 %v7806_v52  ;;  %v9668_v14 = vld [vmem:[%s10019_s7 + $0x1180] ss:$8 sps:$4 sm:$0xff]   ;;  %v1524_v51 = vor.u32 %v1523_v34, %v1520_v36  ;;  %v1527_v46 = vshll.u32 %v1439_v59, 16  ;;  %v1574_v52 = vshrl.u32 %v1445_v27, 16  ;;  %v9674_v35 = vld [vmem:[%s10019_s7 + $0x1190] ss:$8 sps:$4 sm:$0xff]  }
 0x273   : > { %6840 = vmatprep.subr.bf16.mxu1 %v9661_v53  ;;  %7491 = vmatprep.subr.bf16.mxu0 %v9646_v32  ;;  %v9676_v53 = vld [vmem:[%s10019_s7 + $0x1194] ss:$8 sps:$4 sm:$0xff]   ;;  %v1602_v32 = vshrl.u32 %v1449_v33, 16 }
 0x274   : > { %7463 = vmatmul.mubr.bf16.gmra.mrb[8].mxu0 %v7909_v41  ;;  %v9709_v41 = vld [vmem:[%s10019_s7 + $0x8f4] ss:$8 sps:$4 sm:$0xff]   ;;  %v1525_v42 = vrot.slane %v1524_v51, 4  ;;  %v1529_v54 = vrot.slane %v1527_v46, 5  ;;  %v1667_v46 = vshll.u32 %v1459_v40, 16 }
 0x275   : > { %7492 = vmatpush1.bf16.msra.mxu0 %v9644_v57  ;;  %7472 = vmatprep.mubr.bf16.mxu0 %v7914_v2  ;;  %v1557_v57 = vrot.slane %v1555_v15, 5  ;;  %v1604_v58 = vrot.slane %v1602_v32, 4  ;;  %v2433_v15 = vld [vmem:[#allocation2 + $0x98] sm:$0x11]  ;;  %v9704_v32 = vld [vmem:[%s10019_s7 + $0x11e0] ss:$8 sps:$4 sm:$0xff]  }
 0x276   : > { %6841 = vmatpush1.bf16.msra.mxu1 %v9659_v56  ;;  %7493 = vmatprep.subr.bf16.mxu0 %v9652_v63  ;;  %v1577_v56 = vshll.u32 %v1445_v27, 16  ;;  %v1576_v63 = vrot.slane %v1574_v52, 4  ;;  %v9698_v27 = vld [vmem:[%s10019_s7 + $0x11d0] ss:$8 sps:$4 sm:$0xff]   ;;  %v2435_v52 = vld [vmem:[#allocation2 + $0xa8] sm:$0xee] }
 0x277   : > { %6842 = vmatprep.subr.bf16.mxu1 %v9667_v24  ;;  %v9703_v24 = vld [vmem:[%s10019_s7 + $0x8e4] ss:$8 sps:$4 sm:$0xff]  }
 0x278   : > { %v1579_v2 = vrot.slane %v1577_v56, 5  ;;  %v2437_v56 = vld [vmem:[#allocation2 + $0xb8] sm:$0x11] }
 0x279   : > { %7494 = vmatpush1.bf16.msra.mxu0 %v9650_v62  ;;  %v1457_v62 = vld [vmem:[#allocation2 + $0x100] sm:$0xff] }
 0x27a   : > { %6843 = vmatpush1.bf16.msra.mxu1 %v9665_v17  ;;  %7495 = vmatprep.subr.bf16.mxu0 %v9658_v11  ;;  %v1605_v17 = vshll.u32 %v1449_v33, 16  ;;  %v1580_v13 = vor.u32 %v1579_v2, %v1576_v63  ;;  %v1658_v22 = vshrl.u32 %v1457_v62, 16  ;;  %v1661_v47 = vshll.u32 %v1457_v62, 16  ;;  %v2445_v62 = vld [vmem:[#allocation2 + $0xf8] sm:$0x11] }
 0x27b   : > { %6844 = vmatprep.subr.bf16.mxu1 %v9673_v61  ;;  %v1447_v61 = vld [vmem:[#allocation2 + $0xb0] sm:$0x11] }
 0x27c   : > { %7473 = vmatmul.mubr.bf16.gmra.mrb[12].mxu0 %v7913_v21  ;;  %v1607_v6 = vrot.slane %v1605_v17, 5  ;;  %v1583_v11 = vshll.u32 %v1447_v61, 16  ;;  %v1558_v21 = vsel %vm10212_vm0, %v1553_v60, %v1557_v57  ;;  %v1660_v49 = vrot.slane %v1658_v22, 4  ;;  %v9710_v61 = vld [vmem:[%s10019_s7 + $0x11f0] ss:$8 sps:$4 sm:$0xff]  }
 0x27d   : > { %7496 = vmatpush1.bf16.msra.mxu0 %v9656_v43  ;;  %7515 = vmatprep.mubr.bf16.mxu0 %v7904_v16  ;;  %v1611_v43 = vshll.u32 %v1451_v10, 16  ;;  %v1633_v16 = vshll.u32 %v1453_v9, 16  ;;  %v1663_v55 = vrot.slane %v1661_v47, 5  ;;  %v7892_v60 = vrot.slane %v2435_v52, 9  ;;  %v2449_v22 = vld [vmem:[#allocation2 + $0x118] sm:$0x11] }
 0x27e   : > { %6845 = vmatpush1.bf16.msra.mxu1 %v9671_v31  ;;  %7497 = vmatprep.subr.bf16.mxu0 %v9664_v28  ;;  %v9688_v31 = vld [vmem:[%s10019_s7 + $0x11b4] ss:$8 sps:$4 sm:$0xff]   ;;  %v1608_v28 = vor.u32 %v1607_v6, %v1604_v58  ;;  %v1585_v26 = vrot.slane %v1583_v11, 5  ;;  %v2516_v57 = vrot.slane %v2437_v56, 5  ;;  %v2439_v6 = vld [vmem:[#allocation2 + $0xc8] sm:$0xee]  ;;  %v7903_v11 = vcombine.low %v11463_v19, %v11467_v4 }
 0x27f   : > { %6846 = vmatprep.subr.bf16.mxu1 %v9679_v3  ;;  %v11493_v3 = vsel %vm10212_vm0, %v1525_v42, %v1529_v54  ;;  %v1635_v59 = vrot.slane %v1633_v16, 5  ;;  %v1664_v51 = vor.u32 %v1663_v55, %v1660_v49  ;;  %v7890_v42 = vrot.slane %v2431_v45, 9  ;;  %v2447_v16 = vld [vmem:[#allocation2 + $0x108] sm:$0xee]  ;;  %v2453_v4 = vld [vmem:[#allocation2 + $0x138] sm:$0x11] }
 0x280   : > { %v1609_v34 = vrot.slane %v1608_v28, 4  ;;  %v2508_v54 = vrot.slane %v2433_v15, 5  ;;  %v2517_v58 = vsel %vm10547_vm3, %v7892_v60, %v2516_v57  ;;  %v7894_v0 = vrot.slane %v2439_v6, 9  ;;  %v2451_v19 = vld [vmem:[#allocation2 + $0x128] sm:$0xee] }
 0x281   : > { %7498 = vmatpush1.bf16.msra.mxu0 %v9662_v38  ;;  %v9692_v38 = vld [vmem:[%s10019_s7 + $0x11c0] ss:$8 sps:$4 sm:$0xff]   ;;  %v3352_v49 = vlaneseq }
 0x282   : > { %6847 = vmatpush1.bf16.msra.mxu1 %v9677_v20  ;;  %7499 = vmatprep.subr.bf16.mxu0 %v9670_v12  ;;  %v9707_v20 = vld [vmem:[%s10019_s7 + $0x8f0] ss:$8 sps:$4 sm:$0xff]   ;;  %v1581_v12 = vrot.slane %v1580_v13, 4  ;;  %v2509_v10 = vsel %vm10547_vm3, %v7890_v42, %v2508_v54 }
 0x283   : > { %6848 = vmatprep.subr.bf16.mxu1 %v9685_v44  ;;  %v1630_v44 = vshrl.u32 %v1453_v9, 16  ;;  %v2441_v9 = vld [vmem:[#allocation2 + $0xd8] sm:$0x11]  ;;  %v3353_v40 = vshrl.u32 %v3352_v49, 7 }
 0x284   : > { %v1586_v29 = vsel %vm10212_vm0, %v1581_v12, %v1585_v26  ;;  %v2524_v13 = vrot.slane %v2441_v9, 5  ;;  %v7898_v26 = vrot.slane %v2447_v16, 9  ;;  %v2548_v12 = vrot.slane %v2453_v4, 5 }
 0x285   : > { %7500 = vmatpush1.bf16.msra.mxu0 %v9668_v14  ;;  %v1613_v14 = vrot.slane %v1611_v43, 5  ;;  %v1632_v36 = vrot.slane %v1630_v44, 4  ;;  %v2532_v44 = vrot.slane %v2445_v62, 5 }
 0x286   : > { %6849 = vmatpush1.bf16.msra.mxu1 %v9683_v25  ;;  %7501 = vmatprep.subr.bf16.mxu0 %v9676_v53  ;;  %v9694_v25 = vld [vmem:[%s10019_s7 + $0x11c4] ss:$8 sps:$4 sm:$0xff]  }
 0x287   : > { %6850 = vmatprep.subr.bf16.mxu1 %v9691_v30  ;;  %v7810_v30 = vcombine.high %v11493_v3, %v1558_v21  ;;  %v1614_v53 = vsel %vm10212_vm0, %v1609_v34, %v1613_v14  ;;  %v1636_v33 = vor.u32 %v1635_v59, %v1632_v36 }
 0x289   : > { %7502 = vmatpush1.bf16.msra.mxu0 %v9674_v35  ;;  %v7809_v35 = vcombine.low %v11493_v3, %v1558_v21  ;;  %v1637_v17 = vrot.slane %v1636_v33, 4  ;;  %v7813_v3 = vcombine.low %v1586_v29, %v1614_v53  ;;  %v7908_v21 = vcombine.high %v2509_v10, %v2517_v58 }
 0x28a   : > { %6851 = vmatpush1.bf16.msra.mxu1 %v9689_v1  ;;  %7503 = vmatprep.subr.bf16.mxu0 %v9682_v7  ;;  %v1455_v1 = vld [vmem:[#allocation2 + $0xf0] sm:$0x11]  ;;  %v3358_v33 = vsub.s32 1, %v3353_v40 }
 0x28b   : > { %6852 = vmatprep.subr.bf16.mxu1 %v9697_v8  ;;  %v9700_v8 = vld [vmem:[%s10019_s7 + $0x11d4] ss:$8 sps:$4 sm:$0xff]   ;;  %v1639_v39 = vshll.u32 %v1455_v1, 16 }
 0x28d   : > { %7504 = vmatpush1.bf16.msra.mxu0 %v9680_v48  ;;  %v1641_v7 = vrot.slane %v1639_v39, 5  ;;  %v1665_v48 = vrot.slane %v1664_v51, 4 }
 0x28e   : > { %6853 = vmatpush1.bf16.msra.mxu1 %v9695_v23  ;;  %7505 = vmatprep.subr.bf16.mxu0 %v9688_v31  ;;  %v9706_v23 = vld [vmem:[%s10019_s7 + $0x11e4] ss:$8 sps:$4 sm:$0xff]  }
 0x28f   : > { %6854 = vmatprep.subr.bf16.mxu1 %v9703_v24  ;;  %v7814_v24 = vcombine.high %v1586_v29, %v1614_v53  ;;  %v1642_v63 = vsel %vm10212_vm0, %v1637_v17, %v1641_v7  ;;  %v2443_v31 = vld [vmem:[#allocation2 + $0xe8] sm:$0xee]  ;;  %v3350_v53 = vld [vmem:[%s10027_s20] sm:$0x3] }
 0x290   : > { %v7896_v43 = vrot.slane %v2443_v31, 9  ;;  %v11536_v45 = vrot.slane %v3350_v53, %v3358_v33 }
 0x291   : > { %7506 = vmatpush1.bf16.msra.mxu0 %v9686_v18  ;;  %v2525_v18 = vsel %vm10547_vm3, %v7894_v0, %v2524_v13 }
 0x292   : > { %6855 = vmatpush1.bf16.msra.mxu1 %v9701_v37  ;;  %7507 = vmatprep.subr.bf16.mxu0 %v9694_v25  ;;  %v1669_v37 = vrot.slane %v1667_v46, 5  ;;  %v2533_v28 = vsel %vm10547_vm3, %v7896_v43, %v2532_v44  ;;  %v7907_v25 = vcombine.low %v2509_v10, %v2517_v58 }
 0x293   : > { %6856 = vmatprep.subr.bf16.mxu1 %v9709_v41  ;;  %v9712_v41 = vld [vmem:[%s10019_s7 + $0x11f4] ss:$8 sps:$4 sm:$0xff]   ;;  %v7911_v34 = vcombine.low %v2525_v18, %v2533_v28  ;;  %s7692_s7 = sshll.u32 %s10015_s19, 7 }
 0x294   : > { %v1670_v2 = vsel %vm10212_vm0, %v1665_v48, %v1669_v37  ;;  %s11543_s20 = scalar_lea.vmem [#allocation9], %s7692_s7 }
 0x295   : > { %7508 = vmatpush1.bf16.msra.mxu0 %v9692_v38  ;;  %v7817_v47 = vcombine.low %v1642_v63, %v1670_v2  ;;  %v2540_v38 = vrot.slane %v2449_v22, 5  ;;  %s7586_s10 = sshll.u32 %s11543_s20, 4  ;;  %s11577_s10 = int_to_ptr.vmem [resolvable:$true] %s7586_s10 }
 0x296   : > { %6857 = vmatpush1.bf16.msra.mxu1 %v9707_v20  ;;  %7509 = vmatprep.subr.bf16.mxu0 %v9700_v8  ;;  %v7818_v20 = vcombine.high %v1642_v63, %v1670_v2  ;;  %s9777_s4 = scalar_lea.vmem %s11577_s10, 2048  ;;  %p9784_p7 = scmp.lt.s32.totalorder %s11577_s10, %s9782_s22 }
 0x297   : > { %v2541_v14 = vsel %vm10547_vm3, %v7898_v26, %v2540_v38  ;;  %p9778_p13 = scmp.ne.s32.totalorder %s11577_s10, %s9777_s4  ;;  %p9785_p8 = scmp.lt.s32.totalorder %s9783_s27, %s9777_s4 }
 0x299   : > { %6859 = vmatmul.mubr.bf16.vlgmr.msra.gmra.mrb[0].mxu1 %v7805_v5  ;;  %7510 = vmatpush1.bf16.msra.mxu0 %v9698_v27  ;;  %v7912_v5 = vcombine.high %v2525_v18, %v2533_v28  ;;  %v3354_v27 = vsub.s32 0, %v3353_v40  ;;  %p9779_p12 = pnand %p9778_p13, %p11654_p2  ;;  %p9786_p9 = por %p9785_p8, %p9784_p7 }
 0x29a   : > { %6868 = vmatprep.mubr.bf16.mxu1 %v7810_v30  ;;  %7511 = vmatprep.subr.bf16.mxu0 %v9706_v23  ;;  %v7900_v30 = vrot.slane %v2451_v19, 9 }
 0x29b   : > { %v11534_v50 = vrot.slane %v3350_v53, %v3354_v27  ;;  %p9780_p5 = pneg %p9779_p12 }
 0x29c   : > { %v2549_v36 = vsel %vm10547_vm3, %v7900_v30, %v2548_v12 }
 0x29d   : > { %7512 = vmatpush1.bf16.msra.mxu0 %v9704_v32  ;;  %v7916_v1 = vcombine.high %v2541_v14, %v2549_v36  ;;  %v7915_v59 = vcombine.low %v2541_v14, %v2549_v36  ;;  %p9787_p11 = pnand %p9786_p9, %p9780_p5 }
 0x29e   : > { %7513 = vmatprep.subr.bf16.mxu0 %v9712_v41 }
 0x2a1   : > { %6869 = vmatmul.mubr.bf16.gmra.mrb[4].mxu1 %v7809_v35  ;;  %7514 = vmatpush1.bf16.msra.mxu0 %v9710_v61 }
 0x2a2   : > { %6878 = vmatprep.mubr.bf16.mxu1 %v7814_v24 }
 0x2a4   : > { %7516 = vmatmul.mubr.bf16.vlgmr.msra.gmra.mrb[0].mxu0 %v7903_v11 }
 0x2a5   : > { %7525 = vmatprep.mubr.bf16.mxu0 %v7908_v21 }
 0x2a9   : > { %6879 = vmatmul.mubr.bf16.gmra.mrb[8].mxu1 %v7813_v3 }
 0x2aa   : > { %6888 = vmatprep.mubr.bf16.mxu1 %v7818_v20 }
 0x2ac   : > { %7526 = vmatmul.mubr.bf16.gmra.mrb[4].mxu0 %v7907_v25 }
 0x2ad   : > { %7535 = vmatprep.mubr.bf16.mxu0 %v7912_v5 }
 0x2b1   : > { %6889 = vmatmul.mubr.bf16.gmra.mrb[12].mxu1 %v7817_v47 }
 0x2b4   : > { %7536 = vmatmul.mubr.bf16.gmra.mrb[8].mxu0 %v7911_v34 }
 0x2b5   : > { %7545 = vmatprep.mubr.bf16.mxu0 %v7916_v1 }
 0x2bc   : > { %7546 = vmatmul.mubr.bf16.gmra.mrb[12].mxu0 %v7915_v59 }
 0x36c   : > { %v6860_v55 = vpop.f32.mrb[0].mxu1 }
 0x36d   : > { %v6862_v8 = vpop.f32.mrb[1].mxu1  ;;  %v8501_v52 = vadd.f32 %v6860_v55, %v11534_v50 }
 0x36e   : > { %v6864_v29 = vpop.f32.mrb[2].mxu1  ;;  %v8503_v56 = vadd.f32 %v6862_v8, %v11536_v45 }
 0x36f   : > { %v6866_v39 = vpop.f32.mrb[3].mxu1  ;;  %v8505_v35 = vadd.f32 %v6864_v29, %v11534_v50 }
 0x370   : > { %v8507_v17 = vadd.f32 %v6866_v39, %v11536_v45 }
 0x374   : > { %v6870_v51 = vpop.f32.mrb[4].mxu1 }
 0x375   : > { %v6872_v46 = vpop.f32.mrb[5].mxu1  ;;  %v8509_v2 = vadd.f32 %v6870_v51, %v11534_v50 }
 0x376   : > { %v6874_v23 = vpop.f32.mrb[6].mxu1  ;;  %v8511_v10 = vadd.f32 %v6872_v46, %v11536_v45 }
 0x377   : > { %v6876_v15 = vpop.f32.mrb[7].mxu1  ;;  %v7517_v32 = vpop.f32.mrb[0].mxu0  ;;  %v8513_v58 = vadd.f32 %v6874_v23, %v11534_v50 }
 0x378   : > { %v8502_v48 = vadd.f32 %v8501_v52, %v7517_v32  ;;  %v7519_v37 = vpop.f32.mrb[1].mxu0  ;;  %v8515_v31 = vadd.f32 %v6876_v15, %v11536_v45 }
 0x379   : > { %v8504_v42 = vadd.f32 %v8503_v56, %v7519_v37  ;;  %v7521_v54 = vpop.f32.mrb[2].mxu0 }
 0x37a   : > { %7556 = vst [vmem:[%s11543_s20] sm:$0xff] %v8502_v48  ;;  %v8506_v57 = vadd.f32 %v8505_v35, %v7521_v54  ;;  %v7523_v61 = vpop.f32.mrb[3].mxu0 }
 0x37b   : > { %7557 = vst [vmem:[%s11543_s20 + $0x8] sm:$0xff] %v8504_v42  ;;  %v8508_v63 = vadd.f32 %v8507_v17, %v7523_v61 }
 0x37c   : > { %v6880_v24 = vpop.f32.mrb[8].mxu1  ;;  %7558 = vst [vmem:[%s11543_s20 + $0x10] sm:$0xff] %v8506_v57 }
 0x37d   : > { %v6882_v7 = vpop.f32.mrb[9].mxu1  ;;  %7559 = vst [vmem:[%s11543_s20 + $0x18] sm:$0xff] %v8508_v63  ;;  %v8517_v28 = vadd.f32 %v6880_v24, %v11534_v50 }
 0x37e   : > { %v6884_v41 = vpop.f32.mrb[10].mxu1  ;;  %v8519_v16 = vadd.f32 %v6882_v7, %v11536_v45 }
 0x37f   : > { %v6886_v60 = vpop.f32.mrb[11].mxu1  ;;  %v7527_v9 = vpop.f32.mrb[4].mxu0  ;;  %v8521_v22 = vadd.f32 %v6884_v41, %v11534_v50 }
 0x380   : > { %v8510_v3 = vadd.f32 %v8509_v2, %v7527_v9  ;;  %v7529_v11 = vpop.f32.mrb[5].mxu0  ;;  %v8523_v4 = vadd.f32 %v6886_v60, %v11536_v45 }
 0x381   : > { %v8512_v21 = vadd.f32 %v8511_v10, %v7529_v11  ;;  %v7531_v0 = vpop.f32.mrb[6].mxu0 }
 0x382   : > { %7560 = vst [vmem:[%s11543_s20 + $0x20] sm:$0xff] %v8510_v3  ;;  %v8514_v43 = vadd.f32 %v8513_v58, %v7531_v0  ;;  %v7533_v44 = vpop.f32.mrb[7].mxu0 }
 0x383   : > { %7561 = vst [vmem:[%s11543_s20 + $0x28] sm:$0xff] %v8512_v21  ;;  %v8516_v18 = vadd.f32 %v8515_v31, %v7533_v44 }
 0x384   : > { %v6890_v6 = vpop.f32.mrb[12].mxu1  ;;  %7562 = vst [vmem:[%s11543_s20 + $0x30] sm:$0xff] %v8514_v43 }
 0x385   : > { %v6892_v62 = vpop.f32.mrb[13].mxu1  ;;  %7563 = vst [vmem:[%s11543_s20 + $0x38] sm:$0xff] %v8516_v18  ;;  %v8525_v14 = vadd.f32 %v6890_v6, %v11534_v50 }
 0x386   : > { %v6894_v20 = vpop.f32.mrb[14].mxu1  ;;  %v8527_v36 = vadd.f32 %v6892_v62, %v11536_v45 }
 0x387   : > { %v6896_v13 = vpop.f32.mrb[15].mxu1  ;;  %v7537_v19 = vpop.f32.mrb[8].mxu0  ;;  %v8529_v34 = vadd.f32 %v6894_v20, %v11534_v50 }
 0x388   : > { %v8518_v47 = vadd.f32 %v8517_v28, %v7537_v19  ;;  %v7539_v25 = vpop.f32.mrb[9].mxu0  ;;  %v8531_v59 = vadd.f32 %v6896_v13, %v11536_v45 }
 0x389   : > { %v8520_v5 = vadd.f32 %v8519_v16, %v7539_v25  ;;  %v7541_v26 = vpop.f32.mrb[10].mxu0 }
 0x38a   : > { %7564 = vst [vmem:[%s11543_s20 + $0x40] sm:$0xff] %v8518_v47  ;;  %v8522_v38 = vadd.f32 %v8521_v22, %v7541_v26  ;;  %v7543_v30 = vpop.f32.mrb[11].mxu0 }
 0x38b   : > { %7565 = vst [vmem:[%s11543_s20 + $0x48] sm:$0xff] %v8520_v5  ;;  %v8524_v12 = vadd.f32 %v8523_v4, %v7543_v30 }
 0x38c   : > { %7566 = vst [vmem:[%s11543_s20 + $0x50] sm:$0xff] %v8522_v38 }
 0x38d   : > { %7567 = vst [vmem:[%s11543_s20 + $0x58] sm:$0xff] %v8524_v12 }
 0x38f   : > { %v7547_v1 = vpop.f32.mrb[12].mxu0 }
 0x390   : > { %v8526_v49 = vadd.f32 %v8525_v14, %v7547_v1  ;;  %v7549_v55 = vpop.f32.mrb[13].mxu0 }
 0x391   : > { %v8528_v8 = vadd.f32 %v8527_v36, %v7549_v55  ;;  %v7551_v40 = vpop.f32.mrb[14].mxu0 }
 0x392   : > { %7568 = vst [vmem:[%s11543_s20 + $0x60] sm:$0xff] %v8526_v49  ;;  %v8530_v29 = vadd.f32 %v8529_v34, %v7551_v40  ;;  %v7553_v39 = vpop.f32.mrb[15].mxu0 }
 0x393   : > { %7569 = vst [vmem:[%s11543_s20 + $0x68] sm:$0xff] %v8528_v8  ;;  %v8532_v27 = vadd.f32 %v8531_v59, %v7553_v39 }
 0x394   : > { %7570 = vst [vmem:[%s11543_s20 + $0x70] sm:$0xff] %v8530_v29 }
 0x395   : > { %7571 = vst [vmem:[%s11543_s20 + $0x78] sm:$0xff] %v8532_v27 }
 0x396   : > { %9790 = shalt.err (!%p9787_p11)
}
 0x397   : > { %s9791_s30 = scalar_lea.hbm %s11574_s6, 2048  ;;  %s9795_s5 = scalar_lea.hbm %s11627_s3, 4096 }
 0x398   : > { %p9792_p0 = scmp.ne.s32.totalorder %s11574_s6, %s9791_s30  ;;  %p9796_p3 = scmp.lt.u32.totalorder %s11574_s6, %s11627_s3 }
 0x399   : > { %p9797_p10 = scmp.lt.u32.totalorder %s9795_s5, %s9791_s30  ;;  %p9799_p13 = scmp.lt.u32.totalorder %s9791_s30, %s11574_s6 }
 0x39a   : > { %p9793_p4 = pnand %p9792_p0, %p11654_p2 }
 0x39b   : > { %p9798_p6 = por %p9797_p10, %p9796_p3 }
 0x39c   : > { %p9794_p1 = pneg %p9793_p4 }
 0x39d   : > { %p9800_p12 = por %p9799_p13, %p9798_p6 }
 0x39f   : > { %p9801_p5 = pnand %p9800_p12, %p9794_p1 }
 0x3a1   : > { %9804 = shalt.err (!%p9801_p5)
}
 0x3a2   : > { %s9856_s7 = smov 256   ;;  %s9857_s20 = smov 512  }
 0x3a3   : > { %s9858_s9 = smov 16  }
 0x3a4   : > { %8795 = dma.vmem_to_hbm [thread:$0]  (%p11654_p2), %s11577_s10, 2048, %s11574_s6, %s7573_s16, %s9856_s7, %s9857_s20, %s9858_s9  }
 0x3a5 PF: > { %s7601_s17 = sand.u32 1, %s9835_s12   ;;  %p11655_p7 = scmp.ne.s32.totalorder %s11632_s24, 0 }
 0x3a6   : > { %p11656_p8 = scmp.ge.s32.totalorder %s9847_s15, 2  ;;  %s7602_s26 = scalar_lea.sflag [#allocation6], %s7601_s17 }
 0x3a8   : > { %p8805_p9 = pnand %p11656_p8, %p11655_p7 }
 0x3aa   : > { %9830 = dma.done.wait (!%p8805_p9), %s7602_s26, 2048  }
 0x3ab   : > { %9832 = vsyncadd (!%p8805_p9), %s7602_s26, 4294965248  ;;  %p19_p11 = scmp.ge.s32.totalorder %s9904_s18, 4   ;;  %s11657_s12 = smov %s9839_s13 }
 0x3ac   : > { %s11658_s13 = smov %s9843_s14  ;;  %s11659_s14 = smov %s9916_s21 }
 0x3ad   : > { %s11660_s15 = smov %s9904_s18  ;;  %21 = sbr.rel (!%p19_p11) target bundleno = 7 (0x7), region = 93 }
 0x3b4   :  { %7607 = vsyncpa [#allocation5], 1 }
 0x3b5   :  { %7609 = vsyncpa [#allocation5 + $0x1], 1 }
 0x3b6   :  { %7610 = vsyncpa [#allocation8], 1 }
 0x3b7   :  { %7612 = vsyncpa [#allocation8 + $0x1], 1 }
 0x3b8   :  { %7613 = vsyncpa [#allocation6], 1 }
 0x3b9   :  { %7615 = vsyncpa [#allocation6 + $0x1], 1 }

</bundles_post_ra>
